<compile_context>
chip_gen: v7x
topology: tpu7x:2x2x1
jax: 0.10.0
libtpu: 0.0.40
codegen_flags: <defaults>
</compile_context>

<pallas_src>
import functools

import jax
import jax.numpy as jnp
import numpy as np
from jax.experimental import pallas as pl
from jax.experimental.pallas import tpu as pltpu

# ----------------------------- small shapes ---------------------------------
B = 8      # n_traj
T = 8      # n_tp
D = 16     # input_dim  (first D//2 = features, last D//2 = observation mask)
L = 32     # latent_dim
U = 64     # n_gru_units (module default is 100; small synthetic value)
UO = 32    # hidden units of the ODE-func MLP
UT = 100   # hidden units of transform_z0 (hard-coded 100 in the original)
UTP = 128  # UT zero-padded to a full lane tile (mathematically exact)
Z0 = L     # z0_dim

# row offsets inside the packed (4L, 2U) = (128, 128) weight slab
_UR1Y, _UR1S, _T1Y, _T1S = 0, L, 2 * L, 3 * L
# row offsets inside the packed (384, 64) weight slab
_N1Y, _N1S, _UR2, _N2, _T2 = 0, L, 2 * L, 2 * L + 2 * U, 2 * L + 2 * U + U
# bias rows inside the packed (8, 3U) bias slab
_BX, _BO1, _BO2, _BUR2, _BN2, _BT1, _BT2 = 0, 1, 2, 3, 4, 5, 6


# ----------------------------- Pallas kernel ---------------------------------
def encoder_kernel(dt_ref,            # SMEM (T,)       per backward step dt
                   x_ref,             # VMEM (T*B, D)   time-major flattened data
                   y0_ref, std0_ref,  # VMEM (B, L)     initial hidden mean / std
                   wp128_ref,         # VMEM (4L, 2U)   [wur1y; wur1s; wt1y; wt1s]
                   wp64_ref,          # VMEM (384, 2L)  [wn1y; wn1s; wur2(blockdiag); wn2; wt2]
                   wode_ref,          # VMEM (L+UO, UO) [wo1; wo2]
                   wx_ref,            # VMEM (D, 3U)    [wu1x | wr1x | wn1x]
                   bias_ref,          # VMEM (8, 3U)    packed biases (see offsets above)
                   mean_ref, std_ref  # VMEM (B, Z0) outputs
                   ):
    dot = lambda a, b: jnp.dot(a, b, preferred_element_type=jnp.float32)

    x_all = x_ref[...]                                            # (T*B, D)
    # "any dim observed" indicator per (time, trajectory)
    obs_all = (jnp.sum(x_all[:, D // 2:], axis=-1, keepdims=True) > 0
               ).astype(jnp.float32)                              # (T*B, 1)
    # Hoisted x projection: one matmul covers the x-dependent contribution of
    # every gate net for every step; first-layer biases are folded in.
    xproj = dot(x_all, wx_ref[...]) + bias_ref[_BX:_BX + 1, :]    # (T*B, 3U)

    prev_y = y0_ref[...]                                          # (B, L)
    prev_std = std0_ref[...]

    for t in range(T):             # run_backwards=True: step t uses time index i
        i = T - 1 - t
        dt = dt_ref[t]
        xp = xproj[i * B:(i + 1) * B, :]                          # (B, 3U)
        obs = obs_all[i * B:(i + 1) * B, :]                       # (B, 1)

        # --- single Euler ODE step: yi_ode = prev_y + ode_func(prev_y) * dt
        h_ode = jnp.tanh(dot(prev_y, wode_ref[0:L, :])
                         + bias_ref[_BO1:_BO1 + 1, 0:UO])
        yi_ode = prev_y + (dot(h_ode, wode_ref[L:L + UO, :])
                           + bias_ref[_BO2:_BO2 + 1, 0:L]) * dt

        # --- fused update+reset gates (lane-dense 2U = 128-wide hidden)
        ur_h = jnp.tanh(dot(yi_ode, wp128_ref[_UR1Y:_UR1Y + L, :])
                        + dot(prev_std, wp128_ref[_UR1S:_UR1S + L, :])
                        + xp[:, 0:2 * U])
        gates = jax.nn.sigmoid(dot(ur_h, wp64_ref[_UR2:_UR2 + 2 * U, :])
                               + bias_ref[_BUR2:_BUR2 + 1, 0:2 * L])   # (B, 2L)
        update_gate = gates[:, 0:L]
        reset_gate = gates[:, L:2 * L]

        # --- new-state net (mean / std heads fused along N)
        ns_h = jnp.tanh(dot(yi_ode * reset_gate, wp64_ref[_N1Y:_N1Y + L, :])
                        + dot(prev_std * reset_gate, wp64_ref[_N1S:_N1S + L, :])
                        + xp[:, 2 * U:3 * U])
        ns = dot(ns_h, wp64_ref[_N2:_N2 + U, :]) + bias_ref[_BN2:_BN2 + 1, 0:2 * L]
        new_state = ns[:, 0:L]
        new_state_std = jnp.abs(ns[:, L:2 * L])

        new_y = (1.0 - update_gate) * new_state + update_gate * yi_ode
        new_y_std = (1.0 - update_gate) * new_state_std + update_gate * prev_std

        # masked update: trajectories with no observation keep the ODE-evolved state
        prev_y = obs * new_y + (1.0 - obs) * yi_ode
        prev_std = obs * new_y_std + (1.0 - obs) * prev_std

    # --- fused transform_z0 tail: Linear(2L, UT) -> tanh -> Linear(UT, 2*Z0)
    h = jnp.tanh(dot(prev_y, wp128_ref[_T1Y:_T1Y + L, :])
                 + dot(prev_std, wp128_ref[_T1S:_T1S + L, :])
                 + bias_ref[_BT1:_BT1 + 1, 0:UTP])
    out = dot(h, wp64_ref[_T2:_T2 + UTP, :]) + bias_ref[_BT2:_BT2 + 1, 0:2 * Z0]
    mean_ref[...] = out[:, 0:Z0]
    std_ref[...] = jnp.abs(out[:, Z0:2 * Z0])


# --------------------------- parameter packing --------------------------------
def pack_params(p):
    # (4L, 2U): update|reset first layers fused along N; transform_z0 first layer
    # zero-padded UT -> UTP so every hidden activation is a full 128-lane vreg.
    wp128 = jnp.concatenate([
        jnp.concatenate([p["wu1y"], p["wr1y"]], axis=1),
        jnp.concatenate([p["wu1s"], p["wr1s"]], axis=1),
        jnp.pad(p["wt1y"], ((0, 0), (0, UTP - UT))),
        jnp.pad(p["wt1s"], ((0, 0), (0, UTP - UT))),
    ], axis=0)

    z = jnp.zeros((U, L), jnp.float32)
    wur2 = jnp.concatenate([jnp.concatenate([p["wu2"], z], axis=1),
                            jnp.concatenate([z, p["wr2"]], axis=1)], axis=0)   # (2U, 2L)
    wn2 = jnp.concatenate([p["wn2m"], p["wn2s"]], axis=1)                      # (U, 2L)
    wt2 = jnp.pad(jnp.concatenate([p["wt2m"], p["wt2s"]], axis=1),
                  ((0, UTP - UT), (0, 0)))                                     # (UTP, 2Z0)
    wp64 = jnp.concatenate([p["wn1y"], p["wn1s"], wur2, wn2, wt2], axis=0)     # (384, 2L)

    wode = jnp.concatenate([p["wo1"], p["wo2"]], axis=0)                       # (L+UO, UO)
    wx = jnp.concatenate([p["wu1x"], p["wr1x"], p["wn1x"]], axis=1)            # (D, 3U)

    bias = jnp.zeros((8, 3 * U), jnp.float32)
    bias = bias.at[_BX, :].set(jnp.concatenate([p["bu1"], p["br1"], p["bn1"]], axis=1)[0])
    bias = bias.at[_BO1, 0:UO].set(p["bo1"][0])
    bias = bias.at[_BO2, 0:L].set(p["bo2"][0])
    bias = bias.at[_BUR2, 0:2 * L].set(jnp.concatenate([p["bu2"], p["br2"]], axis=1)[0])
    bias = bias.at[_BN2, 0:2 * L].set(jnp.concatenate([p["bn2m"], p["bn2s"]], axis=1)[0])
    bias = bias.at[_BT1, 0:UTP].set(jnp.pad(p["bt1"], ((0, 0), (0, UTP - UT)))[0])
    bias = bias.at[_BT2, 0:2 * Z0].set(jnp.concatenate([p["bt2m"], p["bt2s"]], axis=1)[0])
    return wp128, wp64, wode, wx, bias


# ------------------------------- wrapper -------------------------------------
@jax.jit
def encoder_forward(data, time_steps, params, y0, std0):
    # time-major flatten (single tiny XLA transpose); the backwards iteration
    # order (flip) is handled by static indexing inside the kernel.
    x_tm = jnp.transpose(data, (1, 0, 2)).reshape(T * B, D)       # (T*B, D)
    ts = time_steps.astype(jnp.float32)
    t_rev = ts[::-1]                                              # prev_t per backward step
    t_i_seq = jnp.concatenate([ts[:1] - 1e-5, t_rev[:-1]])        # t_i before each step
    dt = (t_i_seq - t_rev).astype(jnp.float32)                    # (T,) backward-step order

    wp128, wp64, wode, wx, bias = pack_params(params)

    smem = pl.BlockSpec(memory_space=pltpu.MemorySpace.SMEM)
    vmem = pl.BlockSpec(memory_space=pltpu.MemorySpace.VMEM)
    mean, std = pl.pallas_call(
        encoder_kernel,
        out_shape=(jax.ShapeDtypeStruct((B, Z0), jnp.float32),
                   jax.ShapeDtypeStruct((B, Z0), jnp.float32)),
        in_specs=[smem] + [vmem] * 8,
        out_specs=(vmem, vmem),
    )(dt, x_tm, y0, std0, wp128, wp64, wode, wx, bias)

    # PyTorch forward returns (1, n_traj, z0_dim)
    return mean[None], std[None]


# ------------------------- deterministic parameters --------------------------
def init_params(key):
    def nw(k, shape):   # init_network_weights: weight ~ N(0, 0.1), bias = 0
        return jax.random.normal(k, shape, jnp.float32) * 0.1

    ks = iter(jax.random.split(key, 40))
    p = {}
    # ODE func MLP: L -> UO -> L
    p["wo1"] = nw(next(ks), (L, UO)); p["bo1"] = jnp.zeros((1, UO), jnp.float32)
    p["wo2"] = nw(next(ks), (UO, L)); p["bo2"] = jnp.zeros((1, L), jnp.float32)
    # GRU update / reset gates: Linear(2L+D, U) -> Tanh -> Linear(U, L) -> Sigmoid
    for g in ("u", "r"):
        p[f"w{g}1y"] = nw(next(ks), (L, U))
        p[f"w{g}1s"] = nw(next(ks), (L, U))
        p[f"w{g}1x"] = nw(next(ks), (D, U))
        p[f"b{g}1"] = jnp.zeros((1, U), jnp.float32)
        p[f"w{g}2"] = nw(next(ks), (U, L))
        p[f"b{g}2"] = jnp.zeros((1, L), jnp.float32)
    # new_state_net: Linear(2L+D, U) -> Tanh -> Linear(U, 2L)  (split into mean/std)
    p["wn1y"] = nw(next(ks), (L, U)); p["wn1s"] = nw(next(ks), (L, U))
    p["wn1x"] = nw(next(ks), (D, U)); p["bn1"] = jnp.zeros((1, U), jnp.float32)
    p["wn2m"] = nw(next(ks), (U, L)); p["wn2s"] = nw(next(ks), (U, L))
    p["bn2m"] = jnp.zeros((1, L), jnp.float32); p["bn2s"] = jnp.zeros((1, L), jnp.float32)
    # transform_z0: Linear(2L, UT) -> Tanh -> Linear(UT, 2*Z0)
    p["wt1y"] = nw(next(ks), (L, UT)); p["wt1s"] = nw(next(ks), (L, UT))
    p["bt1"] = jnp.zeros((1, UT), jnp.float32)
    p["wt2m"] = nw(next(ks), (UT, Z0)); p["wt2s"] = nw(next(ks), (UT, Z0))
    p["bt2m"] = jnp.zeros((1, Z0), jnp.float32); p["bt2s"] = jnp.zeros((1, Z0), jnp.float32)
    return p


# --------------------------- pure-JAX reference -------------------------------
def reference_forward(data, time_steps, p, y0, std0):
    hp = functools.partial(jnp.dot, precision=jax.lax.Precision.HIGHEST)
    x_seq = jnp.flip(jnp.transpose(data, (1, 0, 2)), axis=0)
    ts = time_steps.astype(jnp.float32)
    t_rev = ts[::-1]
    t_i_seq = jnp.concatenate([ts[:1] - 1e-5, t_rev[:-1]])
    dt = t_i_seq - t_rev

    prev_y, prev_std = y0, std0
    for s in range(T):
        x = x_seq[s]
        h = jnp.tanh(hp(prev_y, p["wo1"]) + p["bo1"])
        yi_ode = prev_y + (hp(h, p["wo2"]) + p["bo2"]) * dt[s]

        ug_h = jnp.tanh(hp(yi_ode, p["wu1y"]) + hp(prev_std, p["wu1s"])
                        + hp(x, p["wu1x"]) + p["bu1"])
        ug = jax.nn.sigmoid(hp(ug_h, p["wu2"]) + p["bu2"])
        rg_h = jnp.tanh(hp(yi_ode, p["wr1y"]) + hp(prev_std, p["wr1s"])
                        + hp(x, p["wr1x"]) + p["br1"])
        rg = jax.nn.sigmoid(hp(rg_h, p["wr2"]) + p["br2"])
        ns_h = jnp.tanh(hp(yi_ode * rg, p["wn1y"]) + hp(prev_std * rg, p["wn1s"])
                        + hp(x, p["wn1x"]) + p["bn1"])
        new_state = hp(ns_h, p["wn2m"]) + p["bn2m"]
        new_state_std = jnp.abs(hp(ns_h, p["wn2s"]) + p["bn2s"])
        new_y = (1.0 - ug) * new_state + ug * yi_ode
        new_y_std = (1.0 - ug) * new_state_std + ug * prev_std
        obs = (jnp.sum(x[:, D // 2:], -1, keepdims=True) > 0).astype(jnp.float32)
        prev_y = obs * new_y + (1.0 - obs) * yi_ode
        prev_std = obs * new_y_std + (1.0 - obs) * prev_std

    h = jnp.tanh(hp(prev_y, p["wt1y"]) + hp(prev_std, p["wt1s"]) + p["bt1"])
    mean = hp(h, p["wt2m"]) + p["bt2m"]
    std = jnp.abs(hp(h, p["wt2s"]) + p["bt2s"])
    return mean[None], std[None]


# ----------------------------------- main -------------------------------------
if __name__ == "__main__":
    key = jax.random.PRNGKey(0)
    kd, km, ky, ks, kp = jax.random.split(key, 5)

    feats = jax.random.normal(kd, (B, T, D // 2), jnp.float32)
    mask = (jax.random.uniform(km, (B, T, D // 2)) > 0.3).astype(jnp.float32)
    data = jnp.concatenate([feats * mask, mask], axis=-1)   # (B, T, D)
    time_steps = jnp.linspace(0.0, 1.0, T).astype(jnp.float32)

    # prev_y / prev_std ~ N(0, 1e-4) as in run_odernn
    y0 = jax.random.normal(ky, (B, L), jnp.float32) * 1e-4
    std0 = jax.random.normal(ks, (B, L), jnp.float32) * 1e-4

    params = init_params(kp)

    mean_z0, std_z0 = encoder_forward(data, time_steps, params, y0, std0)
    jax.block_until_ready((mean_z0, std_z0))

    ref_mean, ref_std = reference_forward(data, time_steps, params, y0, std0)
    np.testing.assert_allclose(np.asarray(mean_z0), np.asarray(ref_mean), rtol=1e-2, atol=1e-3)
    np.testing.assert_allclose(np.asarray(std_z0), np.asarray(ref_std), rtol=1e-2, atol=1e-3)

    assert mean_z0.shape == (1, B, Z0) and std_z0.shape == (1, B, Z0)
    print("KERNEL_OK")
</pallas_src>

<mosaic_0001>
module attributes {stable_mosaic.version = 11 : i64} {
  func.func @encoder_kernel(%arg0: memref<8xf32, #tpu.memory_space<smem>>, %arg1: memref<64x16xf32, #tpu.memory_space<vmem>>, %arg2: memref<8x32xf32, #tpu.memory_space<vmem>>, %arg3: memref<8x32xf32, #tpu.memory_space<vmem>>, %arg4: memref<128x128xf32, #tpu.memory_space<vmem>>, %arg5: memref<384x64xf32, #tpu.memory_space<vmem>>, %arg6: memref<64x32xf32, #tpu.memory_space<vmem>>, %arg7: memref<16x192xf32, #tpu.memory_space<vmem>>, %arg8: memref<8x192xf32, #tpu.memory_space<vmem>>, %arg9: memref<8x32xf32, #tpu.memory_space<vmem>>, %arg10: memref<8x32xf32, #tpu.memory_space<vmem>>) attributes {dimension_semantics = [], scalar_prefetch = 0 : i64, scratch_operands = 0 : i64, tpu.core_type = #tpu.core_type<tc>} {
    %c0 = arith.constant 0 : index
    %c0_0 = arith.constant 0 : index
    %0 = vector.load %arg1[%c0, %c0_0] : memref<64x16xf32, #tpu.memory_space<vmem>>, vector<64x16xf32>
    %1 = vector.extract_strided_slice %0 {offsets = [0, 8], sizes = [64, 8], strides = [1, 1]} : vector<64x16xf32> to vector<64x8xf32>
    %cst = arith.constant dense<0.000000e+00> : vector<64xf32>
    %2 = vector.multi_reduction <add>, %1, %cst [1] : vector<64x8xf32> to vector<64xf32>
    %3 = vector.shape_cast %2 : vector<64xf32> to vector<64x1xf32>
    %cst_1 = arith.constant 0.000000e+00 : f32
    %4 = vector.broadcast %cst_1 : f32 to vector<64x1xf32>
    %5 = arith.cmpf ogt, %3, %4 : vector<64x1xf32>
    %6 = arith.extui %5 : vector<64x1xi1> to vector<64x1xi32>
    %7 = arith.sitofp %6 : vector<64x1xi32> to vector<64x1xf32>
    %c0_2 = arith.constant 0 : index
    %c0_3 = arith.constant 0 : index
    %8 = vector.load %arg7[%c0_2, %c0_3] : memref<16x192xf32, #tpu.memory_space<vmem>>, vector<16x192xf32>
    %cst_4 = arith.constant dense<0.000000e+00> : vector<64x192xf32>
    %9 = tpu.matmul %0, %8, %cst_4 {dimension_numbers = #tpu.dot_dimension_numbers<[1], [0], [0], [1], [0, 0, 1, 1], [], []>} : vector<64x16xf32>, vector<16x192xf32>, vector<64x192xf32> -> vector<64x192xf32>
    %c0_5 = arith.constant 0 : index
    %c0_6 = arith.constant 0 : index
    %10 = vector.load %arg8[%c0_5, %c0_6] : memref<8x192xf32, #tpu.memory_space<vmem>>, vector<1x192xf32>
    %11 = vector.broadcast %10 : vector<1x192xf32> to vector<64x192xf32>
    %12 = arith.addf %9, %11 : vector<64x192xf32>
    %c0_7 = arith.constant 0 : index
    %c0_8 = arith.constant 0 : index
    %13 = vector.load %arg2[%c0_7, %c0_8] : memref<8x32xf32, #tpu.memory_space<vmem>>, vector<8x32xf32>
    %c0_9 = arith.constant 0 : index
    %c0_10 = arith.constant 0 : index
    %14 = vector.load %arg3[%c0_9, %c0_10] : memref<8x32xf32, #tpu.memory_space<vmem>>, vector<8x32xf32>
    %c0_11 = arith.constant 0 : index
    %15 = memref.load %arg0[%c0_11] : memref<8xf32, #tpu.memory_space<smem>>
    %16 = vector.extract_strided_slice %12 {offsets = [56, 0], sizes = [8, 192], strides = [1, 1]} : vector<64x192xf32> to vector<8x192xf32>
    %17 = vector.extract_strided_slice %7 {offsets = [56, 0], sizes = [8, 1], strides = [1, 1]} : vector<64x1xf32> to vector<8x1xf32>
    %c0_12 = arith.constant 0 : index
    %c0_13 = arith.constant 0 : index
    %18 = vector.load %arg6[%c0_12, %c0_13] : memref<64x32xf32, #tpu.memory_space<vmem>>, vector<32x32xf32>
    %cst_14 = arith.constant dense<0.000000e+00> : vector<8x32xf32>
    %19 = tpu.matmul %13, %18, %cst_14 {dimension_numbers = #tpu.dot_dimension_numbers<[1], [0], [0], [1], [0, 0, 1, 1], [], []>} : vector<8x32xf32>, vector<32x32xf32>, vector<8x32xf32> -> vector<8x32xf32>
    %c1 = arith.constant 1 : index
    %c0_15 = arith.constant 0 : index
    %20 = vector.load %arg8[%c1, %c0_15] : memref<8x192xf32, #tpu.memory_space<vmem>>, vector<1x32xf32>
    %21 = vector.broadcast %20 : vector<1x32xf32> to vector<8x32xf32>
    %22 = arith.addf %19, %21 : vector<8x32xf32>
    %23 = math.tanh %22 : vector<8x32xf32>
    %c32 = arith.constant 32 : index
    %c0_16 = arith.constant 0 : index
    %24 = vector.load %arg6[%c32, %c0_16] : memref<64x32xf32, #tpu.memory_space<vmem>>, vector<32x32xf32>
    %cst_17 = arith.constant dense<0.000000e+00> : vector<8x32xf32>
    %25 = tpu.matmul %23, %24, %cst_17 {dimension_numbers = #tpu.dot_dimension_numbers<[1], [0], [0], [1], [0, 0, 1, 1], [], []>} : vector<8x32xf32>, vector<32x32xf32>, vector<8x32xf32> -> vector<8x32xf32>
    %c2 = arith.constant 2 : index
    %c0_18 = arith.constant 0 : index
    %26 = vector.load %arg8[%c2, %c0_18] : memref<8x192xf32, #tpu.memory_space<vmem>>, vector<1x32xf32>
    %27 = vector.broadcast %26 : vector<1x32xf32> to vector<8x32xf32>
    %28 = arith.addf %25, %27 : vector<8x32xf32>
    %29 = vector.broadcast %15 : f32 to vector<8x32xf32>
    %30 = arith.mulf %28, %29 : vector<8x32xf32>
    %31 = arith.addf %13, %30 : vector<8x32xf32>
    %c0_19 = arith.constant 0 : index
    %c0_20 = arith.constant 0 : index
    %32 = vector.load %arg4[%c0_19, %c0_20] : memref<128x128xf32, #tpu.memory_space<vmem>>, vector<32x128xf32>
    %cst_21 = arith.constant dense<0.000000e+00> : vector<8x128xf32>
    %33 = tpu.matmul %31, %32, %cst_21 {dimension_numbers = #tpu.dot_dimension_numbers<[1], [0], [0], [1], [0, 0, 1, 1], [], []>} : vector<8x32xf32>, vector<32x128xf32>, vector<8x128xf32> -> vector<8x128xf32>
    %c32_22 = arith.constant 32 : index
    %c0_23 = arith.constant 0 : index
    %34 = vector.load %arg4[%c32_22, %c0_23] : memref<128x128xf32, #tpu.memory_space<vmem>>, vector<32x128xf32>
    %cst_24 = arith.constant dense<0.000000e+00> : vector<8x128xf32>
    %35 = tpu.matmul %14, %34, %cst_24 {dimension_numbers = #tpu.dot_dimension_numbers<[1], [0], [0], [1], [0, 0, 1, 1], [], []>} : vector<8x32xf32>, vector<32x128xf32>, vector<8x128xf32> -> vector<8x128xf32>
    %36 = arith.addf %33, %35 : vector<8x128xf32>
    %37 = vector.extract_strided_slice %16 {offsets = [0, 0], sizes = [8, 128], strides = [1, 1]} : vector<8x192xf32> to vector<8x128xf32>
    %38 = arith.addf %36, %37 : vector<8x128xf32>
    %39 = math.tanh %38 : vector<8x128xf32>
    %c64 = arith.constant 64 : index
    %c0_25 = arith.constant 0 : index
    %40 = vector.load %arg5[%c64, %c0_25] : memref<384x64xf32, #tpu.memory_space<vmem>>, vector<128x64xf32>
    %cst_26 = arith.constant dense<0.000000e+00> : vector<8x64xf32>
    %41 = tpu.matmul %39, %40, %cst_26 {dimension_numbers = #tpu.dot_dimension_numbers<[1], [0], [0], [1], [0, 0, 1, 1], [], []>} : vector<8x128xf32>, vector<128x64xf32>, vector<8x64xf32> -> vector<8x64xf32>
    %c3 = arith.constant 3 : index
    %c0_27 = arith.constant 0 : index
    %42 = vector.load %arg8[%c3, %c0_27] : memref<8x192xf32, #tpu.memory_space<vmem>>, vector<1x64xf32>
    %43 = vector.broadcast %42 : vector<1x64xf32> to vector<8x64xf32>
    %44 = arith.addf %41, %43 : vector<8x64xf32>
    %45 = arith.negf %44 : vector<8x64xf32>
    %46 = math.exp %45 : vector<8x64xf32>
    %cst_28 = arith.constant 1.000000e+00 : f32
    %47 = vector.broadcast %cst_28 : f32 to vector<8x64xf32>
    %48 = arith.addf %47, %46 : vector<8x64xf32>
    %49 = arith.divf %47, %48 : vector<8x64xf32>
    %50 = vector.extract_strided_slice %49 {offsets = [0, 0], sizes = [8, 32], strides = [1, 1]} : vector<8x64xf32> to vector<8x32xf32>
    %51 = vector.extract_strided_slice %49 {offsets = [0, 32], sizes = [8, 32], strides = [1, 1]} : vector<8x64xf32> to vector<8x32xf32>
    %52 = arith.mulf %31, %51 : vector<8x32xf32>
    %c0_29 = arith.constant 0 : index
    %c0_30 = arith.constant 0 : index
    %53 = vector.load %arg5[%c0_29, %c0_30] : memref<384x64xf32, #tpu.memory_space<vmem>>, vector<32x64xf32>
    %cst_31 = arith.constant dense<0.000000e+00> : vector<8x64xf32>
    %54 = tpu.matmul %52, %53, %cst_31 {dimension_numbers = #tpu.dot_dimension_numbers<[1], [0], [0], [1], [0, 0, 1, 1], [], []>} : vector<8x32xf32>, vector<32x64xf32>, vector<8x64xf32> -> vector<8x64xf32>
    %55 = arith.mulf %14, %51 : vector<8x32xf32>
    %c32_32 = arith.constant 32 : index
    %c0_33 = arith.constant 0 : index
    %56 = vector.load %arg5[%c32_32, %c0_33] : memref<384x64xf32, #tpu.memory_space<vmem>>, vector<32x64xf32>
    %cst_34 = arith.constant dense<0.000000e+00> : vector<8x64xf32>
    %57 = tpu.matmul %55, %56, %cst_34 {dimension_numbers = #tpu.dot_dimension_numbers<[1], [0], [0], [1], [0, 0, 1, 1], [], []>} : vector<8x32xf32>, vector<32x64xf32>, vector<8x64xf32> -> vector<8x64xf32>
    %58 = arith.addf %54, %57 : vector<8x64xf32>
    %59 = vector.extract_strided_slice %16 {offsets = [0, 128], sizes = [8, 64], strides = [1, 1]} : vector<8x192xf32> to vector<8x64xf32>
    %60 = arith.addf %58, %59 : vector<8x64xf32>
    %61 = math.tanh %60 : vector<8x64xf32>
    %c192 = arith.constant 192 : index
    %c0_35 = arith.constant 0 : index
    %62 = vector.load %arg5[%c192, %c0_35] : memref<384x64xf32, #tpu.memory_space<vmem>>, vector<64x64xf32>
    %cst_36 = arith.constant dense<0.000000e+00> : vector<8x64xf32>
    %63 = tpu.matmul %61, %62, %cst_36 {dimension_numbers = #tpu.dot_dimension_numbers<[1], [0], [0], [1], [0, 0, 1, 1], [], []>} : vector<8x64xf32>, vector<64x64xf32>, vector<8x64xf32> -> vector<8x64xf32>
    %c4 = arith.constant 4 : index
    %c0_37 = arith.constant 0 : index
    %64 = vector.load %arg8[%c4, %c0_37] : memref<8x192xf32, #tpu.memory_space<vmem>>, vector<1x64xf32>
    %65 = vector.broadcast %64 : vector<1x64xf32> to vector<8x64xf32>
    %66 = arith.addf %63, %65 : vector<8x64xf32>
    %67 = vector.extract_strided_slice %66 {offsets = [0, 0], sizes = [8, 32], strides = [1, 1]} : vector<8x64xf32> to vector<8x32xf32>
    %68 = vector.extract_strided_slice %66 {offsets = [0, 32], sizes = [8, 32], strides = [1, 1]} : vector<8x64xf32> to vector<8x32xf32>
    %69 = math.absf %68 : vector<8x32xf32>
    %cst_38 = arith.constant 1.000000e+00 : f32
    %70 = vector.broadcast %cst_38 : f32 to vector<8x32xf32>
    %71 = arith.subf %70, %50 : vector<8x32xf32>
    %72 = arith.mulf %71, %67 : vector<8x32xf32>
    %73 = arith.mulf %50, %31 : vector<8x32xf32>
    %74 = arith.addf %72, %73 : vector<8x32xf32>
    %cst_39 = arith.constant 1.000000e+00 : f32
    %75 = vector.broadcast %cst_39 : f32 to vector<8x32xf32>
    %76 = arith.subf %75, %50 : vector<8x32xf32>
    %77 = arith.mulf %76, %69 : vector<8x32xf32>
    %78 = arith.mulf %50, %14 : vector<8x32xf32>
    %79 = arith.addf %77, %78 : vector<8x32xf32>
    %80 = vector.broadcast %17 : vector<8x1xf32> to vector<8x32xf32>
    %81 = arith.mulf %80, %74 : vector<8x32xf32>
    %cst_40 = arith.constant 1.000000e+00 : f32
    %82 = vector.broadcast %cst_40 : f32 to vector<8x1xf32>
    %83 = arith.subf %82, %17 : vector<8x1xf32>
    %84 = vector.broadcast %83 : vector<8x1xf32> to vector<8x32xf32>
    %85 = arith.mulf %84, %31 : vector<8x32xf32>
    %86 = arith.addf %81, %85 : vector<8x32xf32>
    %87 = vector.broadcast %17 : vector<8x1xf32> to vector<8x32xf32>
    %88 = arith.mulf %87, %79 : vector<8x32xf32>
    %cst_41 = arith.constant 1.000000e+00 : f32
    %89 = vector.broadcast %cst_41 : f32 to vector<8x1xf32>
    %90 = arith.subf %89, %17 : vector<8x1xf32>
    %91 = vector.broadcast %90 : vector<8x1xf32> to vector<8x32xf32>
    %92 = arith.mulf %91, %14 : vector<8x32xf32>
    %93 = arith.addf %88, %92 : vector<8x32xf32>
    %c1_42 = arith.constant 1 : index
    %94 = memref.load %arg0[%c1_42] : memref<8xf32, #tpu.memory_space<smem>>
    %95 = vector.extract_strided_slice %12 {offsets = [48, 0], sizes = [8, 192], strides = [1, 1]} : vector<64x192xf32> to vector<8x192xf32>
    %96 = vector.extract_strided_slice %7 {offsets = [48, 0], sizes = [8, 1], strides = [1, 1]} : vector<64x1xf32> to vector<8x1xf32>
    %c0_43 = arith.constant 0 : index
    %c0_44 = arith.constant 0 : index
    %97 = vector.load %arg6[%c0_43, %c0_44] : memref<64x32xf32, #tpu.memory_space<vmem>>, vector<32x32xf32>
    %cst_45 = arith.constant dense<0.000000e+00> : vector<8x32xf32>
    %98 = tpu.matmul %86, %97, %cst_45 {dimension_numbers = #tpu.dot_dimension_numbers<[1], [0], [0], [1], [0, 0, 1, 1], [], []>} : vector<8x32xf32>, vector<32x32xf32>, vector<8x32xf32> -> vector<8x32xf32>
    %c1_46 = arith.constant 1 : index
    %c0_47 = arith.constant 0 : index
    %99 = vector.load %arg8[%c1_46, %c0_47] : memref<8x192xf32, #tpu.memory_space<vmem>>, vector<1x32xf32>
    %100 = vector.broadcast %99 : vector<1x32xf32> to vector<8x32xf32>
    %101 = arith.addf %98, %100 : vector<8x32xf32>
    %102 = math.tanh %101 : vector<8x32xf32>
    %c32_48 = arith.constant 32 : index
    %c0_49 = arith.constant 0 : index
    %103 = vector.load %arg6[%c32_48, %c0_49] : memref<64x32xf32, #tpu.memory_space<vmem>>, vector<32x32xf32>
    %cst_50 = arith.constant dense<0.000000e+00> : vector<8x32xf32>
    %104 = tpu.matmul %102, %103, %cst_50 {dimension_numbers = #tpu.dot_dimension_numbers<[1], [0], [0], [1], [0, 0, 1, 1], [], []>} : vector<8x32xf32>, vector<32x32xf32>, vector<8x32xf32> -> vector<8x32xf32>
    %c2_51 = arith.constant 2 : index
    %c0_52 = arith.constant 0 : index
    %105 = vector.load %arg8[%c2_51, %c0_52] : memref<8x192xf32, #tpu.memory_space<vmem>>, vector<1x32xf32>
    %106 = vector.broadcast %105 : vector<1x32xf32> to vector<8x32xf32>
    %107 = arith.addf %104, %106 : vector<8x32xf32>
    %108 = vector.broadcast %94 : f32 to vector<8x32xf32>
    %109 = arith.mulf %107, %108 : vector<8x32xf32>
    %110 = arith.addf %86, %109 : vector<8x32xf32>
    %c0_53 = arith.constant 0 : index
    %c0_54 = arith.constant 0 : index
    %111 = vector.load %arg4[%c0_53, %c0_54] : memref<128x128xf32, #tpu.memory_space<vmem>>, vector<32x128xf32>
    %cst_55 = arith.constant dense<0.000000e+00> : vector<8x128xf32>
    %112 = tpu.matmul %110, %111, %cst_55 {dimension_numbers = #tpu.dot_dimension_numbers<[1], [0], [0], [1], [0, 0, 1, 1], [], []>} : vector<8x32xf32>, vector<32x128xf32>, vector<8x128xf32> -> vector<8x128xf32>
    %c32_56 = arith.constant 32 : index
    %c0_57 = arith.constant 0 : index
    %113 = vector.load %arg4[%c32_56, %c0_57] : memref<128x128xf32, #tpu.memory_space<vmem>>, vector<32x128xf32>
    %cst_58 = arith.constant dense<0.000000e+00> : vector<8x128xf32>
    %114 = tpu.matmul %93, %113, %cst_58 {dimension_numbers = #tpu.dot_dimension_numbers<[1], [0], [0], [1], [0, 0, 1, 1], [], []>} : vector<8x32xf32>, vector<32x128xf32>, vector<8x128xf32> -> vector<8x128xf32>
    %115 = arith.addf %112, %114 : vector<8x128xf32>
    %116 = vector.extract_strided_slice %95 {offsets = [0, 0], sizes = [8, 128], strides = [1, 1]} : vector<8x192xf32> to vector<8x128xf32>
    %117 = arith.addf %115, %116 : vector<8x128xf32>
    %118 = math.tanh %117 : vector<8x128xf32>
    %c64_59 = arith.constant 64 : index
    %c0_60 = arith.constant 0 : index
    %119 = vector.load %arg5[%c64_59, %c0_60] : memref<384x64xf32, #tpu.memory_space<vmem>>, vector<128x64xf32>
    %cst_61 = arith.constant dense<0.000000e+00> : vector<8x64xf32>
    %120 = tpu.matmul %118, %119, %cst_61 {dimension_numbers = #tpu.dot_dimension_numbers<[1], [0], [0], [1], [0, 0, 1, 1], [], []>} : vector<8x128xf32>, vector<128x64xf32>, vector<8x64xf32> -> vector<8x64xf32>
    %c3_62 = arith.constant 3 : index
    %c0_63 = arith.constant 0 : index
    %121 = vector.load %arg8[%c3_62, %c0_63] : memref<8x192xf32, #tpu.memory_space<vmem>>, vector<1x64xf32>
    %122 = vector.broadcast %121 : vector<1x64xf32> to vector<8x64xf32>
    %123 = arith.addf %120, %122 : vector<8x64xf32>
    %124 = arith.negf %123 : vector<8x64xf32>
    %125 = math.exp %124 : vector<8x64xf32>
    %cst_64 = arith.constant 1.000000e+00 : f32
    %126 = vector.broadcast %cst_64 : f32 to vector<8x64xf32>
    %127 = arith.addf %126, %125 : vector<8x64xf32>
    %128 = arith.divf %126, %127 : vector<8x64xf32>
    %129 = vector.extract_strided_slice %128 {offsets = [0, 0], sizes = [8, 32], strides = [1, 1]} : vector<8x64xf32> to vector<8x32xf32>
    %130 = vector.extract_strided_slice %128 {offsets = [0, 32], sizes = [8, 32], strides = [1, 1]} : vector<8x64xf32> to vector<8x32xf32>
    %131 = arith.mulf %110, %130 : vector<8x32xf32>
    %c0_65 = arith.constant 0 : index
    %c0_66 = arith.constant 0 : index
    %132 = vector.load %arg5[%c0_65, %c0_66] : memref<384x64xf32, #tpu.memory_space<vmem>>, vector<32x64xf32>
    %cst_67 = arith.constant dense<0.000000e+00> : vector<8x64xf32>
    %133 = tpu.matmul %131, %132, %cst_67 {dimension_numbers = #tpu.dot_dimension_numbers<[1], [0], [0], [1], [0, 0, 1, 1], [], []>} : vector<8x32xf32>, vector<32x64xf32>, vector<8x64xf32> -> vector<8x64xf32>
    %134 = arith.mulf %93, %130 : vector<8x32xf32>
    %c32_68 = arith.constant 32 : index
    %c0_69 = arith.constant 0 : index
    %135 = vector.load %arg5[%c32_68, %c0_69] : memref<384x64xf32, #tpu.memory_space<vmem>>, vector<32x64xf32>
    %cst_70 = arith.constant dense<0.000000e+00> : vector<8x64xf32>
    %136 = tpu.matmul %134, %135, %cst_70 {dimension_numbers = #tpu.dot_dimension_numbers<[1], [0], [0], [1], [0, 0, 1, 1], [], []>} : vector<8x32xf32>, vector<32x64xf32>, vector<8x64xf32> -> vector<8x64xf32>
    %137 = arith.addf %133, %136 : vector<8x64xf32>
    %138 = vector.extract_strided_slice %95 {offsets = [0, 128], sizes = [8, 64], strides = [1, 1]} : vector<8x192xf32> to vector<8x64xf32>
    %139 = arith.addf %137, %138 : vector<8x64xf32>
    %140 = math.tanh %139 : vector<8x64xf32>
    %c192_71 = arith.constant 192 : index
    %c0_72 = arith.constant 0 : index
    %141 = vector.load %arg5[%c192_71, %c0_72] : memref<384x64xf32, #tpu.memory_space<vmem>>, vector<64x64xf32>
    %cst_73 = arith.constant dense<0.000000e+00> : vector<8x64xf32>
    %142 = tpu.matmul %140, %141, %cst_73 {dimension_numbers = #tpu.dot_dimension_numbers<[1], [0], [0], [1], [0, 0, 1, 1], [], []>} : vector<8x64xf32>, vector<64x64xf32>, vector<8x64xf32> -> vector<8x64xf32>
    %c4_74 = arith.constant 4 : index
    %c0_75 = arith.constant 0 : index
    %143 = vector.load %arg8[%c4_74, %c0_75] : memref<8x192xf32, #tpu.memory_space<vmem>>, vector<1x64xf32>
    %144 = vector.broadcast %143 : vector<1x64xf32> to vector<8x64xf32>
    %145 = arith.addf %142, %144 : vector<8x64xf32>
    %146 = vector.extract_strided_slice %145 {offsets = [0, 0], sizes = [8, 32], strides = [1, 1]} : vector<8x64xf32> to vector<8x32xf32>
    %147 = vector.extract_strided_slice %145 {offsets = [0, 32], sizes = [8, 32], strides = [1, 1]} : vector<8x64xf32> to vector<8x32xf32>
    %148 = math.absf %147 : vector<8x32xf32>
    %cst_76 = arith.constant 1.000000e+00 : f32
    %149 = vector.broadcast %cst_76 : f32 to vector<8x32xf32>
    %150 = arith.subf %149, %129 : vector<8x32xf32>
    %151 = arith.mulf %150, %146 : vector<8x32xf32>
    %152 = arith.mulf %129, %110 : vector<8x32xf32>
    %153 = arith.addf %151, %152 : vector<8x32xf32>
    %cst_77 = arith.constant 1.000000e+00 : f32
    %154 = vector.broadcast %cst_77 : f32 to vector<8x32xf32>
    %155 = arith.subf %154, %129 : vector<8x32xf32>
    %156 = arith.mulf %155, %148 : vector<8x32xf32>
    %157 = arith.mulf %129, %93 : vector<8x32xf32>
    %158 = arith.addf %156, %157 : vector<8x32xf32>
    %159 = vector.broadcast %96 : vector<8x1xf32> to vector<8x32xf32>
    %160 = arith.mulf %159, %153 : vector<8x32xf32>
    %cst_78 = arith.constant 1.000000e+00 : f32
    %161 = vector.broadcast %cst_78 : f32 to vector<8x1xf32>
    %162 = arith.subf %161, %96 : vector<8x1xf32>
    %163 = vector.broadcast %162 : vector<8x1xf32> to vector<8x32xf32>
    %164 = arith.mulf %163, %110 : vector<8x32xf32>
    %165 = arith.addf %160, %164 : vector<8x32xf32>
    %166 = vector.broadcast %96 : vector<8x1xf32> to vector<8x32xf32>
    %167 = arith.mulf %166, %158 : vector<8x32xf32>
    %cst_79 = arith.constant 1.000000e+00 : f32
    %168 = vector.broadcast %cst_79 : f32 to vector<8x1xf32>
    %169 = arith.subf %168, %96 : vector<8x1xf32>
    %170 = vector.broadcast %169 : vector<8x1xf32> to vector<8x32xf32>
    %171 = arith.mulf %170, %93 : vector<8x32xf32>
    %172 = arith.addf %167, %171 : vector<8x32xf32>
    %c2_80 = arith.constant 2 : index
    %173 = memref.load %arg0[%c2_80] : memref<8xf32, #tpu.memory_space<smem>>
    %174 = vector.extract_strided_slice %12 {offsets = [40, 0], sizes = [8, 192], strides = [1, 1]} : vector<64x192xf32> to vector<8x192xf32>
    %175 = vector.extract_strided_slice %7 {offsets = [40, 0], sizes = [8, 1], strides = [1, 1]} : vector<64x1xf32> to vector<8x1xf32>
    %c0_81 = arith.constant 0 : index
    %c0_82 = arith.constant 0 : index
    %176 = vector.load %arg6[%c0_81, %c0_82] : memref<64x32xf32, #tpu.memory_space<vmem>>, vector<32x32xf32>
    %cst_83 = arith.constant dense<0.000000e+00> : vector<8x32xf32>
    %177 = tpu.matmul %165, %176, %cst_83 {dimension_numbers = #tpu.dot_dimension_numbers<[1], [0], [0], [1], [0, 0, 1, 1], [], []>} : vector<8x32xf32>, vector<32x32xf32>, vector<8x32xf32> -> vector<8x32xf32>
    %c1_84 = arith.constant 1 : index
    %c0_85 = arith.constant 0 : index
    %178 = vector.load %arg8[%c1_84, %c0_85] : memref<8x192xf32, #tpu.memory_space<vmem>>, vector<1x32xf32>
    %179 = vector.broadcast %178 : vector<1x32xf32> to vector<8x32xf32>
    %180 = arith.addf %177, %179 : vector<8x32xf32>
    %181 = math.tanh %180 : vector<8x32xf32>
    %c32_86 = arith.constant 32 : index
    %c0_87 = arith.constant 0 : index
    %182 = vector.load %arg6[%c32_86, %c0_87] : memref<64x32xf32, #tpu.memory_space<vmem>>, vector<32x32xf32>
    %cst_88 = arith.constant dense<0.000000e+00> : vector<8x32xf32>
    %183 = tpu.matmul %181, %182, %cst_88 {dimension_numbers = #tpu.dot_dimension_numbers<[1], [0], [0], [1], [0, 0, 1, 1], [], []>} : vector<8x32xf32>, vector<32x32xf32>, vector<8x32xf32> -> vector<8x32xf32>
    %c2_89 = arith.constant 2 : index
    %c0_90 = arith.constant 0 : index
    %184 = vector.load %arg8[%c2_89, %c0_90] : memref<8x192xf32, #tpu.memory_space<vmem>>, vector<1x32xf32>
    %185 = vector.broadcast %184 : vector<1x32xf32> to vector<8x32xf32>
    %186 = arith.addf %183, %185 : vector<8x32xf32>
    %187 = vector.broadcast %173 : f32 to vector<8x32xf32>
    %188 = arith.mulf %186, %187 : vector<8x32xf32>
    %189 = arith.addf %165, %188 : vector<8x32xf32>
    %c0_91 = arith.constant 0 : index
    %c0_92 = arith.constant 0 : index
    %190 = vector.load %arg4[%c0_91, %c0_92] : memref<128x128xf32, #tpu.memory_space<vmem>>, vector<32x128xf32>
    %cst_93 = arith.constant dense<0.000000e+00> : vector<8x128xf32>
    %191 = tpu.matmul %189, %190, %cst_93 {dimension_numbers = #tpu.dot_dimension_numbers<[1], [0], [0], [1], [0, 0, 1, 1], [], []>} : vector<8x32xf32>, vector<32x128xf32>, vector<8x128xf32> -> vector<8x128xf32>
    %c32_94 = arith.constant 32 : index
    %c0_95 = arith.constant 0 : index
    %192 = vector.load %arg4[%c32_94, %c0_95] : memref<128x128xf32, #tpu.memory_space<vmem>>, vector<32x128xf32>
    %cst_96 = arith.constant dense<0.000000e+00> : vector<8x128xf32>
    %193 = tpu.matmul %172, %192, %cst_96 {dimension_numbers = #tpu.dot_dimension_numbers<[1], [0], [0], [1], [0, 0, 1, 1], [], []>} : vector<8x32xf32>, vector<32x128xf32>, vector<8x128xf32> -> vector<8x128xf32>
    %194 = arith.addf %191, %193 : vector<8x128xf32>
    %195 = vector.extract_strided_slice %174 {offsets = [0, 0], sizes = [8, 128], strides = [1, 1]} : vector<8x192xf32> to vector<8x128xf32>
    %196 = arith.addf %194, %195 : vector<8x128xf32>
    %197 = math.tanh %196 : vector<8x128xf32>
    %c64_97 = arith.constant 64 : index
    %c0_98 = arith.constant 0 : index
    %198 = vector.load %arg5[%c64_97, %c0_98] : memref<384x64xf32, #tpu.memory_space<vmem>>, vector<128x64xf32>
    %cst_99 = arith.constant dense<0.000000e+00> : vector<8x64xf32>
    %199 = tpu.matmul %197, %198, %cst_99 {dimension_numbers = #tpu.dot_dimension_numbers<[1], [0], [0], [1], [0, 0, 1, 1], [], []>} : vector<8x128xf32>, vector<128x64xf32>, vector<8x64xf32> -> vector<8x64xf32>
    %c3_100 = arith.constant 3 : index
    %c0_101 = arith.constant 0 : index
    %200 = vector.load %arg8[%c3_100, %c0_101] : memref<8x192xf32, #tpu.memory_space<vmem>>, vector<1x64xf32>
    %201 = vector.broadcast %200 : vector<1x64xf32> to vector<8x64xf32>
    %202 = arith.addf %199, %201 : vector<8x64xf32>
    %203 = arith.negf %202 : vector<8x64xf32>
    %204 = math.exp %203 : vector<8x64xf32>
    %cst_102 = arith.constant 1.000000e+00 : f32
    %205 = vector.broadcast %cst_102 : f32 to vector<8x64xf32>
    %206 = arith.addf %205, %204 : vector<8x64xf32>
    %207 = arith.divf %205, %206 : vector<8x64xf32>
    %208 = vector.extract_strided_slice %207 {offsets = [0, 0], sizes = [8, 32], strides = [1, 1]} : vector<8x64xf32> to vector<8x32xf32>
    %209 = vector.extract_strided_slice %207 {offsets = [0, 32], sizes = [8, 32], strides = [1, 1]} : vector<8x64xf32> to vector<8x32xf32>
    %210 = arith.mulf %189, %209 : vector<8x32xf32>
    %c0_103 = arith.constant 0 : index
    %c0_104 = arith.constant 0 : index
    %211 = vector.load %arg5[%c0_103, %c0_104] : memref<384x64xf32, #tpu.memory_space<vmem>>, vector<32x64xf32>
    %cst_105 = arith.constant dense<0.000000e+00> : vector<8x64xf32>
    %212 = tpu.matmul %210, %211, %cst_105 {dimension_numbers = #tpu.dot_dimension_numbers<[1], [0], [0], [1], [0, 0, 1, 1], [], []>} : vector<8x32xf32>, vector<32x64xf32>, vector<8x64xf32> -> vector<8x64xf32>
    %213 = arith.mulf %172, %209 : vector<8x32xf32>
    %c32_106 = arith.constant 32 : index
    %c0_107 = arith.constant 0 : index
    %214 = vector.load %arg5[%c32_106, %c0_107] : memref<384x64xf32, #tpu.memory_space<vmem>>, vector<32x64xf32>
    %cst_108 = arith.constant dense<0.000000e+00> : vector<8x64xf32>
    %215 = tpu.matmul %213, %214, %cst_108 {dimension_numbers = #tpu.dot_dimension_numbers<[1], [0], [0], [1], [0, 0, 1, 1], [], []>} : vector<8x32xf32>, vector<32x64xf32>, vector<8x64xf32> -> vector<8x64xf32>
    %216 = arith.addf %212, %215 : vector<8x64xf32>
    %217 = vector.extract_strided_slice %174 {offsets = [0, 128], sizes = [8, 64], strides = [1, 1]} : vector<8x192xf32> to vector<8x64xf32>
    %218 = arith.addf %216, %217 : vector<8x64xf32>
    %219 = math.tanh %218 : vector<8x64xf32>
    %c192_109 = arith.constant 192 : index
    %c0_110 = arith.constant 0 : index
    %220 = vector.load %arg5[%c192_109, %c0_110] : memref<384x64xf32, #tpu.memory_space<vmem>>, vector<64x64xf32>
    %cst_111 = arith.constant dense<0.000000e+00> : vector<8x64xf32>
    %221 = tpu.matmul %219, %220, %cst_111 {dimension_numbers = #tpu.dot_dimension_numbers<[1], [0], [0], [1], [0, 0, 1, 1], [], []>} : vector<8x64xf32>, vector<64x64xf32>, vector<8x64xf32> -> vector<8x64xf32>
    %c4_112 = arith.constant 4 : index
    %c0_113 = arith.constant 0 : index
    %222 = vector.load %arg8[%c4_112, %c0_113] : memref<8x192xf32, #tpu.memory_space<vmem>>, vector<1x64xf32>
    %223 = vector.broadcast %222 : vector<1x64xf32> to vector<8x64xf32>
    %224 = arith.addf %221, %223 : vector<8x64xf32>
    %225 = vector.extract_strided_slice %224 {offsets = [0, 0], sizes = [8, 32], strides = [1, 1]} : vector<8x64xf32> to vector<8x32xf32>
    %226 = vector.extract_strided_slice %224 {offsets = [0, 32], sizes = [8, 32], strides = [1, 1]} : vector<8x64xf32> to vector<8x32xf32>
    %227 = math.absf %226 : vector<8x32xf32>
    %cst_114 = arith.constant 1.000000e+00 : f32
    %228 = vector.broadcast %cst_114 : f32 to vector<8x32xf32>
    %229 = arith.subf %228, %208 : vector<8x32xf32>
    %230 = arith.mulf %229, %225 : vector<8x32xf32>
    %231 = arith.mulf %208, %189 : vector<8x32xf32>
    %232 = arith.addf %230, %231 : vector<8x32xf32>
    %cst_115 = arith.constant 1.000000e+00 : f32
    %233 = vector.broadcast %cst_115 : f32 to vector<8x32xf32>
    %234 = arith.subf %233, %208 : vector<8x32xf32>
    %235 = arith.mulf %234, %227 : vector<8x32xf32>
    %236 = arith.mulf %208, %172 : vector<8x32xf32>
    %237 = arith.addf %235, %236 : vector<8x32xf32>
    %238 = vector.broadcast %175 : vector<8x1xf32> to vector<8x32xf32>
    %239 = arith.mulf %238, %232 : vector<8x32xf32>
    %cst_116 = arith.constant 1.000000e+00 : f32
    %240 = vector.broadcast %cst_116 : f32 to vector<8x1xf32>
    %241 = arith.subf %240, %175 : vector<8x1xf32>
    %242 = vector.broadcast %241 : vector<8x1xf32> to vector<8x32xf32>
    %243 = arith.mulf %242, %189 : vector<8x32xf32>
    %244 = arith.addf %239, %243 : vector<8x32xf32>
    %245 = vector.broadcast %175 : vector<8x1xf32> to vector<8x32xf32>
    %246 = arith.mulf %245, %237 : vector<8x32xf32>
    %cst_117 = arith.constant 1.000000e+00 : f32
    %247 = vector.broadcast %cst_117 : f32 to vector<8x1xf32>
    %248 = arith.subf %247, %175 : vector<8x1xf32>
    %249 = vector.broadcast %248 : vector<8x1xf32> to vector<8x32xf32>
    %250 = arith.mulf %249, %172 : vector<8x32xf32>
    %251 = arith.addf %246, %250 : vector<8x32xf32>
    %c3_118 = arith.constant 3 : index
    %252 = memref.load %arg0[%c3_118] : memref<8xf32, #tpu.memory_space<smem>>
    %253 = vector.extract_strided_slice %12 {offsets = [32, 0], sizes = [8, 192], strides = [1, 1]} : vector<64x192xf32> to vector<8x192xf32>
    %254 = vector.extract_strided_slice %7 {offsets = [32, 0], sizes = [8, 1], strides = [1, 1]} : vector<64x1xf32> to vector<8x1xf32>
    %c0_119 = arith.constant 0 : index
    %c0_120 = arith.constant 0 : index
    %255 = vector.load %arg6[%c0_119, %c0_120] : memref<64x32xf32, #tpu.memory_space<vmem>>, vector<32x32xf32>
    %cst_121 = arith.constant dense<0.000000e+00> : vector<8x32xf32>
    %256 = tpu.matmul %244, %255, %cst_121 {dimension_numbers = #tpu.dot_dimension_numbers<[1], [0], [0], [1], [0, 0, 1, 1], [], []>} : vector<8x32xf32>, vector<32x32xf32>, vector<8x32xf32> -> vector<8x32xf32>
    %c1_122 = arith.constant 1 : index
    %c0_123 = arith.constant 0 : index
    %257 = vector.load %arg8[%c1_122, %c0_123] : memref<8x192xf32, #tpu.memory_space<vmem>>, vector<1x32xf32>
    %258 = vector.broadcast %257 : vector<1x32xf32> to vector<8x32xf32>
    %259 = arith.addf %256, %258 : vector<8x32xf32>
    %260 = math.tanh %259 : vector<8x32xf32>
    %c32_124 = arith.constant 32 : index
    %c0_125 = arith.constant 0 : index
    %261 = vector.load %arg6[%c32_124, %c0_125] : memref<64x32xf32, #tpu.memory_space<vmem>>, vector<32x32xf32>
    %cst_126 = arith.constant dense<0.000000e+00> : vector<8x32xf32>
    %262 = tpu.matmul %260, %261, %cst_126 {dimension_numbers = #tpu.dot_dimension_numbers<[1], [0], [0], [1], [0, 0, 1, 1], [], []>} : vector<8x32xf32>, vector<32x32xf32>, vector<8x32xf32> -> vector<8x32xf32>
    %c2_127 = arith.constant 2 : index
    %c0_128 = arith.constant 0 : index
    %263 = vector.load %arg8[%c2_127, %c0_128] : memref<8x192xf32, #tpu.memory_space<vmem>>, vector<1x32xf32>
    %264 = vector.broadcast %263 : vector<1x32xf32> to vector<8x32xf32>
    %265 = arith.addf %262, %264 : vector<8x32xf32>
    %266 = vector.broadcast %252 : f32 to vector<8x32xf32>
    %267 = arith.mulf %265, %266 : vector<8x32xf32>
    %268 = arith.addf %244, %267 : vector<8x32xf32>
    %c0_129 = arith.constant 0 : index
    %c0_130 = arith.constant 0 : index
    %269 = vector.load %arg4[%c0_129, %c0_130] : memref<128x128xf32, #tpu.memory_space<vmem>>, vector<32x128xf32>
    %cst_131 = arith.constant dense<0.000000e+00> : vector<8x128xf32>
    %270 = tpu.matmul %268, %269, %cst_131 {dimension_numbers = #tpu.dot_dimension_numbers<[1], [0], [0], [1], [0, 0, 1, 1], [], []>} : vector<8x32xf32>, vector<32x128xf32>, vector<8x128xf32> -> vector<8x128xf32>
    %c32_132 = arith.constant 32 : index
    %c0_133 = arith.constant 0 : index
    %271 = vector.load %arg4[%c32_132, %c0_133] : memref<128x128xf32, #tpu.memory_space<vmem>>, vector<32x128xf32>
    %cst_134 = arith.constant dense<0.000000e+00> : vector<8x128xf32>
    %272 = tpu.matmul %251, %271, %cst_134 {dimension_numbers = #tpu.dot_dimension_numbers<[1], [0], [0], [1], [0, 0, 1, 1], [], []>} : vector<8x32xf32>, vector<32x128xf32>, vector<8x128xf32> -> vector<8x128xf32>
    %273 = arith.addf %270, %272 : vector<8x128xf32>
    %274 = vector.extract_strided_slice %253 {offsets = [0, 0], sizes = [8, 128], strides = [1, 1]} : vector<8x192xf32> to vector<8x128xf32>
    %275 = arith.addf %273, %274 : vector<8x128xf32>
    %276 = math.tanh %275 : vector<8x128xf32>
    %c64_135 = arith.constant 64 : index
    %c0_136 = arith.constant 0 : index
    %277 = vector.load %arg5[%c64_135, %c0_136] : memref<384x64xf32, #tpu.memory_space<vmem>>, vector<128x64xf32>
    %cst_137 = arith.constant dense<0.000000e+00> : vector<8x64xf32>
    %278 = tpu.matmul %276, %277, %cst_137 {dimension_numbers = #tpu.dot_dimension_numbers<[1], [0], [0], [1], [0, 0, 1, 1], [], []>} : vector<8x128xf32>, vector<128x64xf32>, vector<8x64xf32> -> vector<8x64xf32>
    %c3_138 = arith.constant 3 : index
    %c0_139 = arith.constant 0 : index
    %279 = vector.load %arg8[%c3_138, %c0_139] : memref<8x192xf32, #tpu.memory_space<vmem>>, vector<1x64xf32>
    %280 = vector.broadcast %279 : vector<1x64xf32> to vector<8x64xf32>
    %281 = arith.addf %278, %280 : vector<8x64xf32>
    %282 = arith.negf %281 : vector<8x64xf32>
    %283 = math.exp %282 : vector<8x64xf32>
    %cst_140 = arith.constant 1.000000e+00 : f32
    %284 = vector.broadcast %cst_140 : f32 to vector<8x64xf32>
    %285 = arith.addf %284, %283 : vector<8x64xf32>
    %286 = arith.divf %284, %285 : vector<8x64xf32>
    %287 = vector.extract_strided_slice %286 {offsets = [0, 0], sizes = [8, 32], strides = [1, 1]} : vector<8x64xf32> to vector<8x32xf32>
    %288 = vector.extract_strided_slice %286 {offsets = [0, 32], sizes = [8, 32], strides = [1, 1]} : vector<8x64xf32> to vector<8x32xf32>
    %289 = arith.mulf %268, %288 : vector<8x32xf32>
    %c0_141 = arith.constant 0 : index
    %c0_142 = arith.constant 0 : index
    %290 = vector.load %arg5[%c0_141, %c0_142] : memref<384x64xf32, #tpu.memory_space<vmem>>, vector<32x64xf32>
    %cst_143 = arith.constant dense<0.000000e+00> : vector<8x64xf32>
    %291 = tpu.matmul %289, %290, %cst_143 {dimension_numbers = #tpu.dot_dimension_numbers<[1], [0], [0], [1], [0, 0, 1, 1], [], []>} : vector<8x32xf32>, vector<32x64xf32>, vector<8x64xf32> -> vector<8x64xf32>
    %292 = arith.mulf %251, %288 : vector<8x32xf32>
    %c32_144 = arith.constant 32 : index
    %c0_145 = arith.constant 0 : index
    %293 = vector.load %arg5[%c32_144, %c0_145] : memref<384x64xf32, #tpu.memory_space<vmem>>, vector<32x64xf32>
    %cst_146 = arith.constant dense<0.000000e+00> : vector<8x64xf32>
    %294 = tpu.matmul %292, %293, %cst_146 {dimension_numbers = #tpu.dot_dimension_numbers<[1], [0], [0], [1], [0, 0, 1, 1], [], []>} : vector<8x32xf32>, vector<32x64xf32>, vector<8x64xf32> -> vector<8x64xf32>
    %295 = arith.addf %291, %294 : vector<8x64xf32>
    %296 = vector.extract_strided_slice %253 {offsets = [0, 128], sizes = [8, 64], strides = [1, 1]} : vector<8x192xf32> to vector<8x64xf32>
    %297 = arith.addf %295, %296 : vector<8x64xf32>
    %298 = math.tanh %297 : vector<8x64xf32>
    %c192_147 = arith.constant 192 : index
    %c0_148 = arith.constant 0 : index
    %299 = vector.load %arg5[%c192_147, %c0_148] : memref<384x64xf32, #tpu.memory_space<vmem>>, vector<64x64xf32>
    %cst_149 = arith.constant dense<0.000000e+00> : vector<8x64xf32>
    %300 = tpu.matmul %298, %299, %cst_149 {dimension_numbers = #tpu.dot_dimension_numbers<[1], [0], [0], [1], [0, 0, 1, 1], [], []>} : vector<8x64xf32>, vector<64x64xf32>, vector<8x64xf32> -> vector<8x64xf32>
    %c4_150 = arith.constant 4 : index
    %c0_151 = arith.constant 0 : index
    %301 = vector.load %arg8[%c4_150, %c0_151] : memref<8x192xf32, #tpu.memory_space<vmem>>, vector<1x64xf32>
    %302 = vector.broadcast %301 : vector<1x64xf32> to vector<8x64xf32>
    %303 = arith.addf %300, %302 : vector<8x64xf32>
    %304 = vector.extract_strided_slice %303 {offsets = [0, 0], sizes = [8, 32], strides = [1, 1]} : vector<8x64xf32> to vector<8x32xf32>
    %305 = vector.extract_strided_slice %303 {offsets = [0, 32], sizes = [8, 32], strides = [1, 1]} : vector<8x64xf32> to vector<8x32xf32>
    %306 = math.absf %305 : vector<8x32xf32>
    %cst_152 = arith.constant 1.000000e+00 : f32
    %307 = vector.broadcast %cst_152 : f32 to vector<8x32xf32>
    %308 = arith.subf %307, %287 : vector<8x32xf32>
    %309 = arith.mulf %308, %304 : vector<8x32xf32>
    %310 = arith.mulf %287, %268 : vector<8x32xf32>
    %311 = arith.addf %309, %310 : vector<8x32xf32>
    %cst_153 = arith.constant 1.000000e+00 : f32
    %312 = vector.broadcast %cst_153 : f32 to vector<8x32xf32>
    %313 = arith.subf %312, %287 : vector<8x32xf32>
    %314 = arith.mulf %313, %306 : vector<8x32xf32>
    %315 = arith.mulf %287, %251 : vector<8x32xf32>
    %316 = arith.addf %314, %315 : vector<8x32xf32>
    %317 = vector.broadcast %254 : vector<8x1xf32> to vector<8x32xf32>
    %318 = arith.mulf %317, %311 : vector<8x32xf32>
    %cst_154 = arith.constant 1.000000e+00 : f32
    %319 = vector.broadcast %cst_154 : f32 to vector<8x1xf32>
    %320 = arith.subf %319, %254 : vector<8x1xf32>
    %321 = vector.broadcast %320 : vector<8x1xf32> to vector<8x32xf32>
    %322 = arith.mulf %321, %268 : vector<8x32xf32>
    %323 = arith.addf %318, %322 : vector<8x32xf32>
    %324 = vector.broadcast %254 : vector<8x1xf32> to vector<8x32xf32>
    %325 = arith.mulf %324, %316 : vector<8x32xf32>
    %cst_155 = arith.constant 1.000000e+00 : f32
    %326 = vector.broadcast %cst_155 : f32 to vector<8x1xf32>
    %327 = arith.subf %326, %254 : vector<8x1xf32>
    %328 = vector.broadcast %327 : vector<8x1xf32> to vector<8x32xf32>
    %329 = arith.mulf %328, %251 : vector<8x32xf32>
    %330 = arith.addf %325, %329 : vector<8x32xf32>
    %c4_156 = arith.constant 4 : index
    %331 = memref.load %arg0[%c4_156] : memref<8xf32, #tpu.memory_space<smem>>
    %332 = vector.extract_strided_slice %12 {offsets = [24, 0], sizes = [8, 192], strides = [1, 1]} : vector<64x192xf32> to vector<8x192xf32>
    %333 = vector.extract_strided_slice %7 {offsets = [24, 0], sizes = [8, 1], strides = [1, 1]} : vector<64x1xf32> to vector<8x1xf32>
    %c0_157 = arith.constant 0 : index
    %c0_158 = arith.constant 0 : index
    %334 = vector.load %arg6[%c0_157, %c0_158] : memref<64x32xf32, #tpu.memory_space<vmem>>, vector<32x32xf32>
    %cst_159 = arith.constant dense<0.000000e+00> : vector<8x32xf32>
    %335 = tpu.matmul %323, %334, %cst_159 {dimension_numbers = #tpu.dot_dimension_numbers<[1], [0], [0], [1], [0, 0, 1, 1], [], []>} : vector<8x32xf32>, vector<32x32xf32>, vector<8x32xf32> -> vector<8x32xf32>
    %c1_160 = arith.constant 1 : index
    %c0_161 = arith.constant 0 : index
    %336 = vector.load %arg8[%c1_160, %c0_161] : memref<8x192xf32, #tpu.memory_space<vmem>>, vector<1x32xf32>
    %337 = vector.broadcast %336 : vector<1x32xf32> to vector<8x32xf32>
    %338 = arith.addf %335, %337 : vector<8x32xf32>
    %339 = math.tanh %338 : vector<8x32xf32>
    %c32_162 = arith.constant 32 : index
    %c0_163 = arith.constant 0 : index
    %340 = vector.load %arg6[%c32_162, %c0_163] : memref<64x32xf32, #tpu.memory_space<vmem>>, vector<32x32xf32>
    %cst_164 = arith.constant dense<0.000000e+00> : vector<8x32xf32>
    %341 = tpu.matmul %339, %340, %cst_164 {dimension_numbers = #tpu.dot_dimension_numbers<[1], [0], [0], [1], [0, 0, 1, 1], [], []>} : vector<8x32xf32>, vector<32x32xf32>, vector<8x32xf32> -> vector<8x32xf32>
    %c2_165 = arith.constant 2 : index
    %c0_166 = arith.constant 0 : index
    %342 = vector.load %arg8[%c2_165, %c0_166] : memref<8x192xf32, #tpu.memory_space<vmem>>, vector<1x32xf32>
    %343 = vector.broadcast %342 : vector<1x32xf32> to vector<8x32xf32>
    %344 = arith.addf %341, %343 : vector<8x32xf32>
    %345 = vector.broadcast %331 : f32 to vector<8x32xf32>
    %346 = arith.mulf %344, %345 : vector<8x32xf32>
    %347 = arith.addf %323, %346 : vector<8x32xf32>
    %c0_167 = arith.constant 0 : index
    %c0_168 = arith.constant 0 : index
    %348 = vector.load %arg4[%c0_167, %c0_168] : memref<128x128xf32, #tpu.memory_space<vmem>>, vector<32x128xf32>
    %cst_169 = arith.constant dense<0.000000e+00> : vector<8x128xf32>
    %349 = tpu.matmul %347, %348, %cst_169 {dimension_numbers = #tpu.dot_dimension_numbers<[1], [0], [0], [1], [0, 0, 1, 1], [], []>} : vector<8x32xf32>, vector<32x128xf32>, vector<8x128xf32> -> vector<8x128xf32>
    %c32_170 = arith.constant 32 : index
    %c0_171 = arith.constant 0 : index
    %350 = vector.load %arg4[%c32_170, %c0_171] : memref<128x128xf32, #tpu.memory_space<vmem>>, vector<32x128xf32>
    %cst_172 = arith.constant dense<0.000000e+00> : vector<8x128xf32>
    %351 = tpu.matmul %330, %350, %cst_172 {dimension_numbers = #tpu.dot_dimension_numbers<[1], [0], [0], [1], [0, 0, 1, 1], [], []>} : vector<8x32xf32>, vector<32x128xf32>, vector<8x128xf32> -> vector<8x128xf32>
    %352 = arith.addf %349, %351 : vector<8x128xf32>
    %353 = vector.extract_strided_slice %332 {offsets = [0, 0], sizes = [8, 128], strides = [1, 1]} : vector<8x192xf32> to vector<8x128xf32>
    %354 = arith.addf %352, %353 : vector<8x128xf32>
    %355 = math.tanh %354 : vector<8x128xf32>
    %c64_173 = arith.constant 64 : index
    %c0_174 = arith.constant 0 : index
    %356 = vector.load %arg5[%c64_173, %c0_174] : memref<384x64xf32, #tpu.memory_space<vmem>>, vector<128x64xf32>
    %cst_175 = arith.constant dense<0.000000e+00> : vector<8x64xf32>
    %357 = tpu.matmul %355, %356, %cst_175 {dimension_numbers = #tpu.dot_dimension_numbers<[1], [0], [0], [1], [0, 0, 1, 1], [], []>} : vector<8x128xf32>, vector<128x64xf32>, vector<8x64xf32> -> vector<8x64xf32>
    %c3_176 = arith.constant 3 : index
    %c0_177 = arith.constant 0 : index
    %358 = vector.load %arg8[%c3_176, %c0_177] : memref<8x192xf32, #tpu.memory_space<vmem>>, vector<1x64xf32>
    %359 = vector.broadcast %358 : vector<1x64xf32> to vector<8x64xf32>
    %360 = arith.addf %357, %359 : vector<8x64xf32>
    %361 = arith.negf %360 : vector<8x64xf32>
    %362 = math.exp %361 : vector<8x64xf32>
    %cst_178 = arith.constant 1.000000e+00 : f32
    %363 = vector.broadcast %cst_178 : f32 to vector<8x64xf32>
    %364 = arith.addf %363, %362 : vector<8x64xf32>
    %365 = arith.divf %363, %364 : vector<8x64xf32>
    %366 = vector.extract_strided_slice %365 {offsets = [0, 0], sizes = [8, 32], strides = [1, 1]} : vector<8x64xf32> to vector<8x32xf32>
    %367 = vector.extract_strided_slice %365 {offsets = [0, 32], sizes = [8, 32], strides = [1, 1]} : vector<8x64xf32> to vector<8x32xf32>
    %368 = arith.mulf %347, %367 : vector<8x32xf32>
    %c0_179 = arith.constant 0 : index
    %c0_180 = arith.constant 0 : index
    %369 = vector.load %arg5[%c0_179, %c0_180] : memref<384x64xf32, #tpu.memory_space<vmem>>, vector<32x64xf32>
    %cst_181 = arith.constant dense<0.000000e+00> : vector<8x64xf32>
    %370 = tpu.matmul %368, %369, %cst_181 {dimension_numbers = #tpu.dot_dimension_numbers<[1], [0], [0], [1], [0, 0, 1, 1], [], []>} : vector<8x32xf32>, vector<32x64xf32>, vector<8x64xf32> -> vector<8x64xf32>
    %371 = arith.mulf %330, %367 : vector<8x32xf32>
    %c32_182 = arith.constant 32 : index
    %c0_183 = arith.constant 0 : index
    %372 = vector.load %arg5[%c32_182, %c0_183] : memref<384x64xf32, #tpu.memory_space<vmem>>, vector<32x64xf32>
    %cst_184 = arith.constant dense<0.000000e+00> : vector<8x64xf32>
    %373 = tpu.matmul %371, %372, %cst_184 {dimension_numbers = #tpu.dot_dimension_numbers<[1], [0], [0], [1], [0, 0, 1, 1], [], []>} : vector<8x32xf32>, vector<32x64xf32>, vector<8x64xf32> -> vector<8x64xf32>
    %374 = arith.addf %370, %373 : vector<8x64xf32>
    %375 = vector.extract_strided_slice %332 {offsets = [0, 128], sizes = [8, 64], strides = [1, 1]} : vector<8x192xf32> to vector<8x64xf32>
    %376 = arith.addf %374, %375 : vector<8x64xf32>
    %377 = math.tanh %376 : vector<8x64xf32>
    %c192_185 = arith.constant 192 : index
    %c0_186 = arith.constant 0 : index
    %378 = vector.load %arg5[%c192_185, %c0_186] : memref<384x64xf32, #tpu.memory_space<vmem>>, vector<64x64xf32>
    %cst_187 = arith.constant dense<0.000000e+00> : vector<8x64xf32>
    %379 = tpu.matmul %377, %378, %cst_187 {dimension_numbers = #tpu.dot_dimension_numbers<[1], [0], [0], [1], [0, 0, 1, 1], [], []>} : vector<8x64xf32>, vector<64x64xf32>, vector<8x64xf32> -> vector<8x64xf32>
    %c4_188 = arith.constant 4 : index
    %c0_189 = arith.constant 0 : index
    %380 = vector.load %arg8[%c4_188, %c0_189] : memref<8x192xf32, #tpu.memory_space<vmem>>, vector<1x64xf32>
    %381 = vector.broadcast %380 : vector<1x64xf32> to vector<8x64xf32>
    %382 = arith.addf %379, %381 : vector<8x64xf32>
    %383 = vector.extract_strided_slice %382 {offsets = [0, 0], sizes = [8, 32], strides = [1, 1]} : vector<8x64xf32> to vector<8x32xf32>
    %384 = vector.extract_strided_slice %382 {offsets = [0, 32], sizes = [8, 32], strides = [1, 1]} : vector<8x64xf32> to vector<8x32xf32>
    %385 = math.absf %384 : vector<8x32xf32>
    %cst_190 = arith.constant 1.000000e+00 : f32
    %386 = vector.broadcast %cst_190 : f32 to vector<8x32xf32>
    %387 = arith.subf %386, %366 : vector<8x32xf32>
    %388 = arith.mulf %387, %383 : vector<8x32xf32>
    %389 = arith.mulf %366, %347 : vector<8x32xf32>
    %390 = arith.addf %388, %389 : vector<8x32xf32>
    %cst_191 = arith.constant 1.000000e+00 : f32
    %391 = vector.broadcast %cst_191 : f32 to vector<8x32xf32>
    %392 = arith.subf %391, %366 : vector<8x32xf32>
    %393 = arith.mulf %392, %385 : vector<8x32xf32>
    %394 = arith.mulf %366, %330 : vector<8x32xf32>
    %395 = arith.addf %393, %394 : vector<8x32xf32>
    %396 = vector.broadcast %333 : vector<8x1xf32> to vector<8x32xf32>
    %397 = arith.mulf %396, %390 : vector<8x32xf32>
    %cst_192 = arith.constant 1.000000e+00 : f32
    %398 = vector.broadcast %cst_192 : f32 to vector<8x1xf32>
    %399 = arith.subf %398, %333 : vector<8x1xf32>
    %400 = vector.broadcast %399 : vector<8x1xf32> to vector<8x32xf32>
    %401 = arith.mulf %400, %347 : vector<8x32xf32>
    %402 = arith.addf %397, %401 : vector<8x32xf32>
    %403 = vector.broadcast %333 : vector<8x1xf32> to vector<8x32xf32>
    %404 = arith.mulf %403, %395 : vector<8x32xf32>
    %cst_193 = arith.constant 1.000000e+00 : f32
    %405 = vector.broadcast %cst_193 : f32 to vector<8x1xf32>
    %406 = arith.subf %405, %333 : vector<8x1xf32>
    %407 = vector.broadcast %406 : vector<8x1xf32> to vector<8x32xf32>
    %408 = arith.mulf %407, %330 : vector<8x32xf32>
    %409 = arith.addf %404, %408 : vector<8x32xf32>
    %c5 = arith.constant 5 : index
    %410 = memref.load %arg0[%c5] : memref<8xf32, #tpu.memory_space<smem>>
    %411 = vector.extract_strided_slice %12 {offsets = [16, 0], sizes = [8, 192], strides = [1, 1]} : vector<64x192xf32> to vector<8x192xf32>
    %412 = vector.extract_strided_slice %7 {offsets = [16, 0], sizes = [8, 1], strides = [1, 1]} : vector<64x1xf32> to vector<8x1xf32>
    %c0_194 = arith.constant 0 : index
    %c0_195 = arith.constant 0 : index
    %413 = vector.load %arg6[%c0_194, %c0_195] : memref<64x32xf32, #tpu.memory_space<vmem>>, vector<32x32xf32>
    %cst_196 = arith.constant dense<0.000000e+00> : vector<8x32xf32>
    %414 = tpu.matmul %402, %413, %cst_196 {dimension_numbers = #tpu.dot_dimension_numbers<[1], [0], [0], [1], [0, 0, 1, 1], [], []>} : vector<8x32xf32>, vector<32x32xf32>, vector<8x32xf32> -> vector<8x32xf32>
    %c1_197 = arith.constant 1 : index
    %c0_198 = arith.constant 0 : index
    %415 = vector.load %arg8[%c1_197, %c0_198] : memref<8x192xf32, #tpu.memory_space<vmem>>, vector<1x32xf32>
    %416 = vector.broadcast %415 : vector<1x32xf32> to vector<8x32xf32>
    %417 = arith.addf %414, %416 : vector<8x32xf32>
    %418 = math.tanh %417 : vector<8x32xf32>
    %c32_199 = arith.constant 32 : index
    %c0_200 = arith.constant 0 : index
    %419 = vector.load %arg6[%c32_199, %c0_200] : memref<64x32xf32, #tpu.memory_space<vmem>>, vector<32x32xf32>
    %cst_201 = arith.constant dense<0.000000e+00> : vector<8x32xf32>
    %420 = tpu.matmul %418, %419, %cst_201 {dimension_numbers = #tpu.dot_dimension_numbers<[1], [0], [0], [1], [0, 0, 1, 1], [], []>} : vector<8x32xf32>, vector<32x32xf32>, vector<8x32xf32> -> vector<8x32xf32>
    %c2_202 = arith.constant 2 : index
    %c0_203 = arith.constant 0 : index
    %421 = vector.load %arg8[%c2_202, %c0_203] : memref<8x192xf32, #tpu.memory_space<vmem>>, vector<1x32xf32>
    %422 = vector.broadcast %421 : vector<1x32xf32> to vector<8x32xf32>
    %423 = arith.addf %420, %422 : vector<8x32xf32>
    %424 = vector.broadcast %410 : f32 to vector<8x32xf32>
    %425 = arith.mulf %423, %424 : vector<8x32xf32>
    %426 = arith.addf %402, %425 : vector<8x32xf32>
    %c0_204 = arith.constant 0 : index
    %c0_205 = arith.constant 0 : index
    %427 = vector.load %arg4[%c0_204, %c0_205] : memref<128x128xf32, #tpu.memory_space<vmem>>, vector<32x128xf32>
    %cst_206 = arith.constant dense<0.000000e+00> : vector<8x128xf32>
    %428 = tpu.matmul %426, %427, %cst_206 {dimension_numbers = #tpu.dot_dimension_numbers<[1], [0], [0], [1], [0, 0, 1, 1], [], []>} : vector<8x32xf32>, vector<32x128xf32>, vector<8x128xf32> -> vector<8x128xf32>
    %c32_207 = arith.constant 32 : index
    %c0_208 = arith.constant 0 : index
    %429 = vector.load %arg4[%c32_207, %c0_208] : memref<128x128xf32, #tpu.memory_space<vmem>>, vector<32x128xf32>
    %cst_209 = arith.constant dense<0.000000e+00> : vector<8x128xf32>
    %430 = tpu.matmul %409, %429, %cst_209 {dimension_numbers = #tpu.dot_dimension_numbers<[1], [0], [0], [1], [0, 0, 1, 1], [], []>} : vector<8x32xf32>, vector<32x128xf32>, vector<8x128xf32> -> vector<8x128xf32>
    %431 = arith.addf %428, %430 : vector<8x128xf32>
    %432 = vector.extract_strided_slice %411 {offsets = [0, 0], sizes = [8, 128], strides = [1, 1]} : vector<8x192xf32> to vector<8x128xf32>
    %433 = arith.addf %431, %432 : vector<8x128xf32>
    %434 = math.tanh %433 : vector<8x128xf32>
    %c64_210 = arith.constant 64 : index
    %c0_211 = arith.constant 0 : index
    %435 = vector.load %arg5[%c64_210, %c0_211] : memref<384x64xf32, #tpu.memory_space<vmem>>, vector<128x64xf32>
    %cst_212 = arith.constant dense<0.000000e+00> : vector<8x64xf32>
    %436 = tpu.matmul %434, %435, %cst_212 {dimension_numbers = #tpu.dot_dimension_numbers<[1], [0], [0], [1], [0, 0, 1, 1], [], []>} : vector<8x128xf32>, vector<128x64xf32>, vector<8x64xf32> -> vector<8x64xf32>
    %c3_213 = arith.constant 3 : index
    %c0_214 = arith.constant 0 : index
    %437 = vector.load %arg8[%c3_213, %c0_214] : memref<8x192xf32, #tpu.memory_space<vmem>>, vector<1x64xf32>
    %438 = vector.broadcast %437 : vector<1x64xf32> to vector<8x64xf32>
    %439 = arith.addf %436, %438 : vector<8x64xf32>
    %440 = arith.negf %439 : vector<8x64xf32>
    %441 = math.exp %440 : vector<8x64xf32>
    %cst_215 = arith.constant 1.000000e+00 : f32
    %442 = vector.broadcast %cst_215 : f32 to vector<8x64xf32>
    %443 = arith.addf %442, %441 : vector<8x64xf32>
    %444 = arith.divf %442, %443 : vector<8x64xf32>
    %445 = vector.extract_strided_slice %444 {offsets = [0, 0], sizes = [8, 32], strides = [1, 1]} : vector<8x64xf32> to vector<8x32xf32>
    %446 = vector.extract_strided_slice %444 {offsets = [0, 32], sizes = [8, 32], strides = [1, 1]} : vector<8x64xf32> to vector<8x32xf32>
    %447 = arith.mulf %426, %446 : vector<8x32xf32>
    %c0_216 = arith.constant 0 : index
    %c0_217 = arith.constant 0 : index
    %448 = vector.load %arg5[%c0_216, %c0_217] : memref<384x64xf32, #tpu.memory_space<vmem>>, vector<32x64xf32>
    %cst_218 = arith.constant dense<0.000000e+00> : vector<8x64xf32>
    %449 = tpu.matmul %447, %448, %cst_218 {dimension_numbers = #tpu.dot_dimension_numbers<[1], [0], [0], [1], [0, 0, 1, 1], [], []>} : vector<8x32xf32>, vector<32x64xf32>, vector<8x64xf32> -> vector<8x64xf32>
    %450 = arith.mulf %409, %446 : vector<8x32xf32>
    %c32_219 = arith.constant 32 : index
    %c0_220 = arith.constant 0 : index
    %451 = vector.load %arg5[%c32_219, %c0_220] : memref<384x64xf32, #tpu.memory_space<vmem>>, vector<32x64xf32>
    %cst_221 = arith.constant dense<0.000000e+00> : vector<8x64xf32>
    %452 = tpu.matmul %450, %451, %cst_221 {dimension_numbers = #tpu.dot_dimension_numbers<[1], [0], [0], [1], [0, 0, 1, 1], [], []>} : vector<8x32xf32>, vector<32x64xf32>, vector<8x64xf32> -> vector<8x64xf32>
    %453 = arith.addf %449, %452 : vector<8x64xf32>
    %454 = vector.extract_strided_slice %411 {offsets = [0, 128], sizes = [8, 64], strides = [1, 1]} : vector<8x192xf32> to vector<8x64xf32>
    %455 = arith.addf %453, %454 : vector<8x64xf32>
    %456 = math.tanh %455 : vector<8x64xf32>
    %c192_222 = arith.constant 192 : index
    %c0_223 = arith.constant 0 : index
    %457 = vector.load %arg5[%c192_222, %c0_223] : memref<384x64xf32, #tpu.memory_space<vmem>>, vector<64x64xf32>
    %cst_224 = arith.constant dense<0.000000e+00> : vector<8x64xf32>
    %458 = tpu.matmul %456, %457, %cst_224 {dimension_numbers = #tpu.dot_dimension_numbers<[1], [0], [0], [1], [0, 0, 1, 1], [], []>} : vector<8x64xf32>, vector<64x64xf32>, vector<8x64xf32> -> vector<8x64xf32>
    %c4_225 = arith.constant 4 : index
    %c0_226 = arith.constant 0 : index
    %459 = vector.load %arg8[%c4_225, %c0_226] : memref<8x192xf32, #tpu.memory_space<vmem>>, vector<1x64xf32>
    %460 = vector.broadcast %459 : vector<1x64xf32> to vector<8x64xf32>
    %461 = arith.addf %458, %460 : vector<8x64xf32>
    %462 = vector.extract_strided_slice %461 {offsets = [0, 0], sizes = [8, 32], strides = [1, 1]} : vector<8x64xf32> to vector<8x32xf32>
    %463 = vector.extract_strided_slice %461 {offsets = [0, 32], sizes = [8, 32], strides = [1, 1]} : vector<8x64xf32> to vector<8x32xf32>
    %464 = math.absf %463 : vector<8x32xf32>
    %cst_227 = arith.constant 1.000000e+00 : f32
    %465 = vector.broadcast %cst_227 : f32 to vector<8x32xf32>
    %466 = arith.subf %465, %445 : vector<8x32xf32>
    %467 = arith.mulf %466, %462 : vector<8x32xf32>
    %468 = arith.mulf %445, %426 : vector<8x32xf32>
    %469 = arith.addf %467, %468 : vector<8x32xf32>
    %cst_228 = arith.constant 1.000000e+00 : f32
    %470 = vector.broadcast %cst_228 : f32 to vector<8x32xf32>
    %471 = arith.subf %470, %445 : vector<8x32xf32>
    %472 = arith.mulf %471, %464 : vector<8x32xf32>
    %473 = arith.mulf %445, %409 : vector<8x32xf32>
    %474 = arith.addf %472, %473 : vector<8x32xf32>
    %475 = vector.broadcast %412 : vector<8x1xf32> to vector<8x32xf32>
    %476 = arith.mulf %475, %469 : vector<8x32xf32>
    %cst_229 = arith.constant 1.000000e+00 : f32
    %477 = vector.broadcast %cst_229 : f32 to vector<8x1xf32>
    %478 = arith.subf %477, %412 : vector<8x1xf32>
    %479 = vector.broadcast %478 : vector<8x1xf32> to vector<8x32xf32>
    %480 = arith.mulf %479, %426 : vector<8x32xf32>
    %481 = arith.addf %476, %480 : vector<8x32xf32>
    %482 = vector.broadcast %412 : vector<8x1xf32> to vector<8x32xf32>
    %483 = arith.mulf %482, %474 : vector<8x32xf32>
    %cst_230 = arith.constant 1.000000e+00 : f32
    %484 = vector.broadcast %cst_230 : f32 to vector<8x1xf32>
    %485 = arith.subf %484, %412 : vector<8x1xf32>
    %486 = vector.broadcast %485 : vector<8x1xf32> to vector<8x32xf32>
    %487 = arith.mulf %486, %409 : vector<8x32xf32>
    %488 = arith.addf %483, %487 : vector<8x32xf32>
    %c6 = arith.constant 6 : index
    %489 = memref.load %arg0[%c6] : memref<8xf32, #tpu.memory_space<smem>>
    %490 = vector.extract_strided_slice %12 {offsets = [8, 0], sizes = [8, 192], strides = [1, 1]} : vector<64x192xf32> to vector<8x192xf32>
    %491 = vector.extract_strided_slice %7 {offsets = [8, 0], sizes = [8, 1], strides = [1, 1]} : vector<64x1xf32> to vector<8x1xf32>
    %c0_231 = arith.constant 0 : index
    %c0_232 = arith.constant 0 : index
    %492 = vector.load %arg6[%c0_231, %c0_232] : memref<64x32xf32, #tpu.memory_space<vmem>>, vector<32x32xf32>
    %cst_233 = arith.constant dense<0.000000e+00> : vector<8x32xf32>
    %493 = tpu.matmul %481, %492, %cst_233 {dimension_numbers = #tpu.dot_dimension_numbers<[1], [0], [0], [1], [0, 0, 1, 1], [], []>} : vector<8x32xf32>, vector<32x32xf32>, vector<8x32xf32> -> vector<8x32xf32>
    %c1_234 = arith.constant 1 : index
    %c0_235 = arith.constant 0 : index
    %494 = vector.load %arg8[%c1_234, %c0_235] : memref<8x192xf32, #tpu.memory_space<vmem>>, vector<1x32xf32>
    %495 = vector.broadcast %494 : vector<1x32xf32> to vector<8x32xf32>
    %496 = arith.addf %493, %495 : vector<8x32xf32>
    %497 = math.tanh %496 : vector<8x32xf32>
    %c32_236 = arith.constant 32 : index
    %c0_237 = arith.constant 0 : index
    %498 = vector.load %arg6[%c32_236, %c0_237] : memref<64x32xf32, #tpu.memory_space<vmem>>, vector<32x32xf32>
    %cst_238 = arith.constant dense<0.000000e+00> : vector<8x32xf32>
    %499 = tpu.matmul %497, %498, %cst_238 {dimension_numbers = #tpu.dot_dimension_numbers<[1], [0], [0], [1], [0, 0, 1, 1], [], []>} : vector<8x32xf32>, vector<32x32xf32>, vector<8x32xf32> -> vector<8x32xf32>
    %c2_239 = arith.constant 2 : index
    %c0_240 = arith.constant 0 : index
    %500 = vector.load %arg8[%c2_239, %c0_240] : memref<8x192xf32, #tpu.memory_space<vmem>>, vector<1x32xf32>
    %501 = vector.broadcast %500 : vector<1x32xf32> to vector<8x32xf32>
    %502 = arith.addf %499, %501 : vector<8x32xf32>
    %503 = vector.broadcast %489 : f32 to vector<8x32xf32>
    %504 = arith.mulf %502, %503 : vector<8x32xf32>
    %505 = arith.addf %481, %504 : vector<8x32xf32>
    %c0_241 = arith.constant 0 : index
    %c0_242 = arith.constant 0 : index
    %506 = vector.load %arg4[%c0_241, %c0_242] : memref<128x128xf32, #tpu.memory_space<vmem>>, vector<32x128xf32>
    %cst_243 = arith.constant dense<0.000000e+00> : vector<8x128xf32>
    %507 = tpu.matmul %505, %506, %cst_243 {dimension_numbers = #tpu.dot_dimension_numbers<[1], [0], [0], [1], [0, 0, 1, 1], [], []>} : vector<8x32xf32>, vector<32x128xf32>, vector<8x128xf32> -> vector<8x128xf32>
    %c32_244 = arith.constant 32 : index
    %c0_245 = arith.constant 0 : index
    %508 = vector.load %arg4[%c32_244, %c0_245] : memref<128x128xf32, #tpu.memory_space<vmem>>, vector<32x128xf32>
    %cst_246 = arith.constant dense<0.000000e+00> : vector<8x128xf32>
    %509 = tpu.matmul %488, %508, %cst_246 {dimension_numbers = #tpu.dot_dimension_numbers<[1], [0], [0], [1], [0, 0, 1, 1], [], []>} : vector<8x32xf32>, vector<32x128xf32>, vector<8x128xf32> -> vector<8x128xf32>
    %510 = arith.addf %507, %509 : vector<8x128xf32>
    %511 = vector.extract_strided_slice %490 {offsets = [0, 0], sizes = [8, 128], strides = [1, 1]} : vector<8x192xf32> to vector<8x128xf32>
    %512 = arith.addf %510, %511 : vector<8x128xf32>
    %513 = math.tanh %512 : vector<8x128xf32>
    %c64_247 = arith.constant 64 : index
    %c0_248 = arith.constant 0 : index
    %514 = vector.load %arg5[%c64_247, %c0_248] : memref<384x64xf32, #tpu.memory_space<vmem>>, vector<128x64xf32>
    %cst_249 = arith.constant dense<0.000000e+00> : vector<8x64xf32>
    %515 = tpu.matmul %513, %514, %cst_249 {dimension_numbers = #tpu.dot_dimension_numbers<[1], [0], [0], [1], [0, 0, 1, 1], [], []>} : vector<8x128xf32>, vector<128x64xf32>, vector<8x64xf32> -> vector<8x64xf32>
    %c3_250 = arith.constant 3 : index
    %c0_251 = arith.constant 0 : index
    %516 = vector.load %arg8[%c3_250, %c0_251] : memref<8x192xf32, #tpu.memory_space<vmem>>, vector<1x64xf32>
    %517 = vector.broadcast %516 : vector<1x64xf32> to vector<8x64xf32>
    %518 = arith.addf %515, %517 : vector<8x64xf32>
    %519 = arith.negf %518 : vector<8x64xf32>
    %520 = math.exp %519 : vector<8x64xf32>
    %cst_252 = arith.constant 1.000000e+00 : f32
    %521 = vector.broadcast %cst_252 : f32 to vector<8x64xf32>
    %522 = arith.addf %521, %520 : vector<8x64xf32>
    %523 = arith.divf %521, %522 : vector<8x64xf32>
    %524 = vector.extract_strided_slice %523 {offsets = [0, 0], sizes = [8, 32], strides = [1, 1]} : vector<8x64xf32> to vector<8x32xf32>
    %525 = vector.extract_strided_slice %523 {offsets = [0, 32], sizes = [8, 32], strides = [1, 1]} : vector<8x64xf32> to vector<8x32xf32>
    %526 = arith.mulf %505, %525 : vector<8x32xf32>
    %c0_253 = arith.constant 0 : index
    %c0_254 = arith.constant 0 : index
    %527 = vector.load %arg5[%c0_253, %c0_254] : memref<384x64xf32, #tpu.memory_space<vmem>>, vector<32x64xf32>
    %cst_255 = arith.constant dense<0.000000e+00> : vector<8x64xf32>
    %528 = tpu.matmul %526, %527, %cst_255 {dimension_numbers = #tpu.dot_dimension_numbers<[1], [0], [0], [1], [0, 0, 1, 1], [], []>} : vector<8x32xf32>, vector<32x64xf32>, vector<8x64xf32> -> vector<8x64xf32>
    %529 = arith.mulf %488, %525 : vector<8x32xf32>
    %c32_256 = arith.constant 32 : index
    %c0_257 = arith.constant 0 : index
    %530 = vector.load %arg5[%c32_256, %c0_257] : memref<384x64xf32, #tpu.memory_space<vmem>>, vector<32x64xf32>
    %cst_258 = arith.constant dense<0.000000e+00> : vector<8x64xf32>
    %531 = tpu.matmul %529, %530, %cst_258 {dimension_numbers = #tpu.dot_dimension_numbers<[1], [0], [0], [1], [0, 0, 1, 1], [], []>} : vector<8x32xf32>, vector<32x64xf32>, vector<8x64xf32> -> vector<8x64xf32>
    %532 = arith.addf %528, %531 : vector<8x64xf32>
    %533 = vector.extract_strided_slice %490 {offsets = [0, 128], sizes = [8, 64], strides = [1, 1]} : vector<8x192xf32> to vector<8x64xf32>
    %534 = arith.addf %532, %533 : vector<8x64xf32>
    %535 = math.tanh %534 : vector<8x64xf32>
    %c192_259 = arith.constant 192 : index
    %c0_260 = arith.constant 0 : index
    %536 = vector.load %arg5[%c192_259, %c0_260] : memref<384x64xf32, #tpu.memory_space<vmem>>, vector<64x64xf32>
    %cst_261 = arith.constant dense<0.000000e+00> : vector<8x64xf32>
    %537 = tpu.matmul %535, %536, %cst_261 {dimension_numbers = #tpu.dot_dimension_numbers<[1], [0], [0], [1], [0, 0, 1, 1], [], []>} : vector<8x64xf32>, vector<64x64xf32>, vector<8x64xf32> -> vector<8x64xf32>
    %c4_262 = arith.constant 4 : index
    %c0_263 = arith.constant 0 : index
    %538 = vector.load %arg8[%c4_262, %c0_263] : memref<8x192xf32, #tpu.memory_space<vmem>>, vector<1x64xf32>
    %539 = vector.broadcast %538 : vector<1x64xf32> to vector<8x64xf32>
    %540 = arith.addf %537, %539 : vector<8x64xf32>
    %541 = vector.extract_strided_slice %540 {offsets = [0, 0], sizes = [8, 32], strides = [1, 1]} : vector<8x64xf32> to vector<8x32xf32>
    %542 = vector.extract_strided_slice %540 {offsets = [0, 32], sizes = [8, 32], strides = [1, 1]} : vector<8x64xf32> to vector<8x32xf32>
    %543 = math.absf %542 : vector<8x32xf32>
    %cst_264 = arith.constant 1.000000e+00 : f32
    %544 = vector.broadcast %cst_264 : f32 to vector<8x32xf32>
    %545 = arith.subf %544, %524 : vector<8x32xf32>
    %546 = arith.mulf %545, %541 : vector<8x32xf32>
    %547 = arith.mulf %524, %505 : vector<8x32xf32>
    %548 = arith.addf %546, %547 : vector<8x32xf32>
    %cst_265 = arith.constant 1.000000e+00 : f32
    %549 = vector.broadcast %cst_265 : f32 to vector<8x32xf32>
    %550 = arith.subf %549, %524 : vector<8x32xf32>
    %551 = arith.mulf %550, %543 : vector<8x32xf32>
    %552 = arith.mulf %524, %488 : vector<8x32xf32>
    %553 = arith.addf %551, %552 : vector<8x32xf32>
    %554 = vector.broadcast %491 : vector<8x1xf32> to vector<8x32xf32>
    %555 = arith.mulf %554, %548 : vector<8x32xf32>
    %cst_266 = arith.constant 1.000000e+00 : f32
    %556 = vector.broadcast %cst_266 : f32 to vector<8x1xf32>
    %557 = arith.subf %556, %491 : vector<8x1xf32>
    %558 = vector.broadcast %557 : vector<8x1xf32> to vector<8x32xf32>
    %559 = arith.mulf %558, %505 : vector<8x32xf32>
    %560 = arith.addf %555, %559 : vector<8x32xf32>
    %561 = vector.broadcast %491 : vector<8x1xf32> to vector<8x32xf32>
    %562 = arith.mulf %561, %553 : vector<8x32xf32>
    %cst_267 = arith.constant 1.000000e+00 : f32
    %563 = vector.broadcast %cst_267 : f32 to vector<8x1xf32>
    %564 = arith.subf %563, %491 : vector<8x1xf32>
    %565 = vector.broadcast %564 : vector<8x1xf32> to vector<8x32xf32>
    %566 = arith.mulf %565, %488 : vector<8x32xf32>
    %567 = arith.addf %562, %566 : vector<8x32xf32>
    %c7 = arith.constant 7 : index
    %568 = memref.load %arg0[%c7] : memref<8xf32, #tpu.memory_space<smem>>
    %569 = vector.extract_strided_slice %12 {offsets = [0, 0], sizes = [8, 192], strides = [1, 1]} : vector<64x192xf32> to vector<8x192xf32>
    %570 = vector.extract_strided_slice %7 {offsets = [0, 0], sizes = [8, 1], strides = [1, 1]} : vector<64x1xf32> to vector<8x1xf32>
    %c0_268 = arith.constant 0 : index
    %c0_269 = arith.constant 0 : index
    %571 = vector.load %arg6[%c0_268, %c0_269] : memref<64x32xf32, #tpu.memory_space<vmem>>, vector<32x32xf32>
    %cst_270 = arith.constant dense<0.000000e+00> : vector<8x32xf32>
    %572 = tpu.matmul %560, %571, %cst_270 {dimension_numbers = #tpu.dot_dimension_numbers<[1], [0], [0], [1], [0, 0, 1, 1], [], []>} : vector<8x32xf32>, vector<32x32xf32>, vector<8x32xf32> -> vector<8x32xf32>
    %c1_271 = arith.constant 1 : index
    %c0_272 = arith.constant 0 : index
    %573 = vector.load %arg8[%c1_271, %c0_272] : memref<8x192xf32, #tpu.memory_space<vmem>>, vector<1x32xf32>
    %574 = vector.broadcast %573 : vector<1x32xf32> to vector<8x32xf32>
    %575 = arith.addf %572, %574 : vector<8x32xf32>
    %576 = math.tanh %575 : vector<8x32xf32>
    %c32_273 = arith.constant 32 : index
    %c0_274 = arith.constant 0 : index
    %577 = vector.load %arg6[%c32_273, %c0_274] : memref<64x32xf32, #tpu.memory_space<vmem>>, vector<32x32xf32>
    %cst_275 = arith.constant dense<0.000000e+00> : vector<8x32xf32>
    %578 = tpu.matmul %576, %577, %cst_275 {dimension_numbers = #tpu.dot_dimension_numbers<[1], [0], [0], [1], [0, 0, 1, 1], [], []>} : vector<8x32xf32>, vector<32x32xf32>, vector<8x32xf32> -> vector<8x32xf32>
    %c2_276 = arith.constant 2 : index
    %c0_277 = arith.constant 0 : index
    %579 = vector.load %arg8[%c2_276, %c0_277] : memref<8x192xf32, #tpu.memory_space<vmem>>, vector<1x32xf32>
    %580 = vector.broadcast %579 : vector<1x32xf32> to vector<8x32xf32>
    %581 = arith.addf %578, %580 : vector<8x32xf32>
    %582 = vector.broadcast %568 : f32 to vector<8x32xf32>
    %583 = arith.mulf %581, %582 : vector<8x32xf32>
    %584 = arith.addf %560, %583 : vector<8x32xf32>
    %c0_278 = arith.constant 0 : index
    %c0_279 = arith.constant 0 : index
    %585 = vector.load %arg4[%c0_278, %c0_279] : memref<128x128xf32, #tpu.memory_space<vmem>>, vector<32x128xf32>
    %cst_280 = arith.constant dense<0.000000e+00> : vector<8x128xf32>
    %586 = tpu.matmul %584, %585, %cst_280 {dimension_numbers = #tpu.dot_dimension_numbers<[1], [0], [0], [1], [0, 0, 1, 1], [], []>} : vector<8x32xf32>, vector<32x128xf32>, vector<8x128xf32> -> vector<8x128xf32>
    %c32_281 = arith.constant 32 : index
    %c0_282 = arith.constant 0 : index
    %587 = vector.load %arg4[%c32_281, %c0_282] : memref<128x128xf32, #tpu.memory_space<vmem>>, vector<32x128xf32>
    %cst_283 = arith.constant dense<0.000000e+00> : vector<8x128xf32>
    %588 = tpu.matmul %567, %587, %cst_283 {dimension_numbers = #tpu.dot_dimension_numbers<[1], [0], [0], [1], [0, 0, 1, 1], [], []>} : vector<8x32xf32>, vector<32x128xf32>, vector<8x128xf32> -> vector<8x128xf32>
    %589 = arith.addf %586, %588 : vector<8x128xf32>
    %590 = vector.extract_strided_slice %569 {offsets = [0, 0], sizes = [8, 128], strides = [1, 1]} : vector<8x192xf32> to vector<8x128xf32>
    %591 = arith.addf %589, %590 : vector<8x128xf32>
    %592 = math.tanh %591 : vector<8x128xf32>
    %c64_284 = arith.constant 64 : index
    %c0_285 = arith.constant 0 : index
    %593 = vector.load %arg5[%c64_284, %c0_285] : memref<384x64xf32, #tpu.memory_space<vmem>>, vector<128x64xf32>
    %cst_286 = arith.constant dense<0.000000e+00> : vector<8x64xf32>
    %594 = tpu.matmul %592, %593, %cst_286 {dimension_numbers = #tpu.dot_dimension_numbers<[1], [0], [0], [1], [0, 0, 1, 1], [], []>} : vector<8x128xf32>, vector<128x64xf32>, vector<8x64xf32> -> vector<8x64xf32>
    %c3_287 = arith.constant 3 : index
    %c0_288 = arith.constant 0 : index
    %595 = vector.load %arg8[%c3_287, %c0_288] : memref<8x192xf32, #tpu.memory_space<vmem>>, vector<1x64xf32>
    %596 = vector.broadcast %595 : vector<1x64xf32> to vector<8x64xf32>
    %597 = arith.addf %594, %596 : vector<8x64xf32>
    %598 = arith.negf %597 : vector<8x64xf32>
    %599 = math.exp %598 : vector<8x64xf32>
    %cst_289 = arith.constant 1.000000e+00 : f32
    %600 = vector.broadcast %cst_289 : f32 to vector<8x64xf32>
    %601 = arith.addf %600, %599 : vector<8x64xf32>
    %602 = arith.divf %600, %601 : vector<8x64xf32>
    %603 = vector.extract_strided_slice %602 {offsets = [0, 0], sizes = [8, 32], strides = [1, 1]} : vector<8x64xf32> to vector<8x32xf32>
    %604 = vector.extract_strided_slice %602 {offsets = [0, 32], sizes = [8, 32], strides = [1, 1]} : vector<8x64xf32> to vector<8x32xf32>
    %605 = arith.mulf %584, %604 : vector<8x32xf32>
    %c0_290 = arith.constant 0 : index
    %c0_291 = arith.constant 0 : index
    %606 = vector.load %arg5[%c0_290, %c0_291] : memref<384x64xf32, #tpu.memory_space<vmem>>, vector<32x64xf32>
    %cst_292 = arith.constant dense<0.000000e+00> : vector<8x64xf32>
    %607 = tpu.matmul %605, %606, %cst_292 {dimension_numbers = #tpu.dot_dimension_numbers<[1], [0], [0], [1], [0, 0, 1, 1], [], []>} : vector<8x32xf32>, vector<32x64xf32>, vector<8x64xf32> -> vector<8x64xf32>
    %608 = arith.mulf %567, %604 : vector<8x32xf32>
    %c32_293 = arith.constant 32 : index
    %c0_294 = arith.constant 0 : index
    %609 = vector.load %arg5[%c32_293, %c0_294] : memref<384x64xf32, #tpu.memory_space<vmem>>, vector<32x64xf32>
    %cst_295 = arith.constant dense<0.000000e+00> : vector<8x64xf32>
    %610 = tpu.matmul %608, %609, %cst_295 {dimension_numbers = #tpu.dot_dimension_numbers<[1], [0], [0], [1], [0, 0, 1, 1], [], []>} : vector<8x32xf32>, vector<32x64xf32>, vector<8x64xf32> -> vector<8x64xf32>
    %611 = arith.addf %607, %610 : vector<8x64xf32>
    %612 = vector.extract_strided_slice %569 {offsets = [0, 128], sizes = [8, 64], strides = [1, 1]} : vector<8x192xf32> to vector<8x64xf32>
    %613 = arith.addf %611, %612 : vector<8x64xf32>
    %614 = math.tanh %613 : vector<8x64xf32>
    %c192_296 = arith.constant 192 : index
    %c0_297 = arith.constant 0 : index
    %615 = vector.load %arg5[%c192_296, %c0_297] : memref<384x64xf32, #tpu.memory_space<vmem>>, vector<64x64xf32>
    %cst_298 = arith.constant dense<0.000000e+00> : vector<8x64xf32>
    %616 = tpu.matmul %614, %615, %cst_298 {dimension_numbers = #tpu.dot_dimension_numbers<[1], [0], [0], [1], [0, 0, 1, 1], [], []>} : vector<8x64xf32>, vector<64x64xf32>, vector<8x64xf32> -> vector<8x64xf32>
    %c4_299 = arith.constant 4 : index
    %c0_300 = arith.constant 0 : index
    %617 = vector.load %arg8[%c4_299, %c0_300] : memref<8x192xf32, #tpu.memory_space<vmem>>, vector<1x64xf32>
    %618 = vector.broadcast %617 : vector<1x64xf32> to vector<8x64xf32>
    %619 = arith.addf %616, %618 : vector<8x64xf32>
    %620 = vector.extract_strided_slice %619 {offsets = [0, 0], sizes = [8, 32], strides = [1, 1]} : vector<8x64xf32> to vector<8x32xf32>
    %621 = vector.extract_strided_slice %619 {offsets = [0, 32], sizes = [8, 32], strides = [1, 1]} : vector<8x64xf32> to vector<8x32xf32>
    %622 = math.absf %621 : vector<8x32xf32>
    %cst_301 = arith.constant 1.000000e+00 : f32
    %623 = vector.broadcast %cst_301 : f32 to vector<8x32xf32>
    %624 = arith.subf %623, %603 : vector<8x32xf32>
    %625 = arith.mulf %624, %620 : vector<8x32xf32>
    %626 = arith.mulf %603, %584 : vector<8x32xf32>
    %627 = arith.addf %625, %626 : vector<8x32xf32>
    %cst_302 = arith.constant 1.000000e+00 : f32
    %628 = vector.broadcast %cst_302 : f32 to vector<8x32xf32>
    %629 = arith.subf %628, %603 : vector<8x32xf32>
    %630 = arith.mulf %629, %622 : vector<8x32xf32>
    %631 = arith.mulf %603, %567 : vector<8x32xf32>
    %632 = arith.addf %630, %631 : vector<8x32xf32>
    %633 = vector.broadcast %570 : vector<8x1xf32> to vector<8x32xf32>
    %634 = arith.mulf %633, %627 : vector<8x32xf32>
    %cst_303 = arith.constant 1.000000e+00 : f32
    %635 = vector.broadcast %cst_303 : f32 to vector<8x1xf32>
    %636 = arith.subf %635, %570 : vector<8x1xf32>
    %637 = vector.broadcast %636 : vector<8x1xf32> to vector<8x32xf32>
    %638 = arith.mulf %637, %584 : vector<8x32xf32>
    %639 = arith.addf %634, %638 : vector<8x32xf32>
    %640 = vector.broadcast %570 : vector<8x1xf32> to vector<8x32xf32>
    %641 = arith.mulf %640, %632 : vector<8x32xf32>
    %cst_304 = arith.constant 1.000000e+00 : f32
    %642 = vector.broadcast %cst_304 : f32 to vector<8x1xf32>
    %643 = arith.subf %642, %570 : vector<8x1xf32>
    %644 = vector.broadcast %643 : vector<8x1xf32> to vector<8x32xf32>
    %645 = arith.mulf %644, %567 : vector<8x32xf32>
    %646 = arith.addf %641, %645 : vector<8x32xf32>
    %c64_305 = arith.constant 64 : index
    %c0_306 = arith.constant 0 : index
    %647 = vector.load %arg4[%c64_305, %c0_306] : memref<128x128xf32, #tpu.memory_space<vmem>>, vector<32x128xf32>
    %cst_307 = arith.constant dense<0.000000e+00> : vector<8x128xf32>
    %648 = tpu.matmul %639, %647, %cst_307 {dimension_numbers = #tpu.dot_dimension_numbers<[1], [0], [0], [1], [0, 0, 1, 1], [], []>} : vector<8x32xf32>, vector<32x128xf32>, vector<8x128xf32> -> vector<8x128xf32>
    %c96 = arith.constant 96 : index
    %c0_308 = arith.constant 0 : index
    %649 = vector.load %arg4[%c96, %c0_308] : memref<128x128xf32, #tpu.memory_space<vmem>>, vector<32x128xf32>
    %cst_309 = arith.constant dense<0.000000e+00> : vector<8x128xf32>
    %650 = tpu.matmul %646, %649, %cst_309 {dimension_numbers = #tpu.dot_dimension_numbers<[1], [0], [0], [1], [0, 0, 1, 1], [], []>} : vector<8x32xf32>, vector<32x128xf32>, vector<8x128xf32> -> vector<8x128xf32>
    %651 = arith.addf %648, %650 : vector<8x128xf32>
    %c5_310 = arith.constant 5 : index
    %c0_311 = arith.constant 0 : index
    %652 = vector.load %arg8[%c5_310, %c0_311] : memref<8x192xf32, #tpu.memory_space<vmem>>, vector<1x128xf32>
    %653 = vector.broadcast %652 : vector<1x128xf32> to vector<8x128xf32>
    %654 = arith.addf %651, %653 : vector<8x128xf32>
    %655 = math.tanh %654 : vector<8x128xf32>
    %c256 = arith.constant 256 : index
    %c0_312 = arith.constant 0 : index
    %656 = vector.load %arg5[%c256, %c0_312] : memref<384x64xf32, #tpu.memory_space<vmem>>, vector<128x64xf32>
    %cst_313 = arith.constant dense<0.000000e+00> : vector<8x64xf32>
    %657 = tpu.matmul %655, %656, %cst_313 {dimension_numbers = #tpu.dot_dimension_numbers<[1], [0], [0], [1], [0, 0, 1, 1], [], []>} : vector<8x128xf32>, vector<128x64xf32>, vector<8x64xf32> -> vector<8x64xf32>
    %c6_314 = arith.constant 6 : index
    %c0_315 = arith.constant 0 : index
    %658 = vector.load %arg8[%c6_314, %c0_315] : memref<8x192xf32, #tpu.memory_space<vmem>>, vector<1x64xf32>
    %659 = vector.broadcast %658 : vector<1x64xf32> to vector<8x64xf32>
    %660 = arith.addf %657, %659 : vector<8x64xf32>
    %661 = vector.extract_strided_slice %660 {offsets = [0, 0], sizes = [8, 32], strides = [1, 1]} : vector<8x64xf32> to vector<8x32xf32>
    %c0_316 = arith.constant 0 : index
    %c0_317 = arith.constant 0 : index
    %662 = vector.load %arg9[%c0_316, %c0_317] : memref<8x32xf32, #tpu.memory_space<vmem>>, vector<8x32xf32>
    tpu.vector_store %arg9[%c0_316, %c0_317], %661 {strides = array<i32>} : memref<8x32xf32, #tpu.memory_space<vmem>>, vector<8x32xf32>,
    %663 = vector.extract_strided_slice %660 {offsets = [0, 32], sizes = [8, 32], strides = [1, 1]} : vector<8x64xf32> to vector<8x32xf32>
    %664 = math.absf %663 : vector<8x32xf32>
    %c0_318 = arith.constant 0 : index
    %c0_319 = arith.constant 0 : index
    %665 = vector.load %arg10[%c0_318, %c0_319] : memref<8x32xf32, #tpu.memory_space<vmem>>, vector<8x32xf32>
    tpu.vector_store %arg10[%c0_318, %c0_319], %664 {strides = array<i32>} : memref<8x32xf32, #tpu.memory_space<vmem>>, vector<8x32xf32>,
    return
  }
}

</mosaic_0001>

<bundles_post_ra>
// kernel: reverse
= control target key start
LH: loop header
LB: loop body
LE: loop exit
PB: predicated region body
PF: predicated region fallthrough
CT: control target
= control target key end

     0   :  { %v2_v0 = vlaneseq  ;;  %s123_s0 = inlined_call_operand.vmem [shape: f32[7], index: 0, kind: input, shape index: {}]   ;;  %s124_s1 = inlined_call_operand.vmem [shape: f32[7], index: 1, kind: output, shape index: {}]  }
   0x2   :  { %v3_v1 = vsub.s32 6, %v2_v0 }
   0x4   :  { %4 = vset.pattern.permute.xlu0 %v3_v1 }
   0x5   :  { %v43_v2 = vld [vmem:[#allocation1] sm:$0x1]  ;;  %v21_v3 = vld [vmem:[%s123_s0] sm:$0x1]  ;;  %v58_v10 = vshrl.u32 %v2_v0, 7 }
   0x6   :  { %44 = vst [vmem:[#allocation0] sm:$0x1] %v43_v2  ;;  %22 = vst [vmem:[#allocation1 + $0x1] sm:$0x1] %v21_v3 }
   0x7   :  { %vm59_vm0 = vcmp.lt.s32.totalorder %v58_v10, 1 }
   0xd   :  { %v46_v4 = vld [vmem:[#allocation0 + $0x7] ss:$-1 sm:$0xff]  ;;  %v40_v5 = vld [vmem:[#allocation1 + $0x1] sm:$0x1] }
   0xe   :  { %v47_v6 = vrot.slane %v46_v4, 7  ;;  %42 = vst [vmem:[#allocation0 + $0x8] sm:$0x1] %v40_v5 }
  0x10   :  { %48 = vperm.xlu0 %4, %v47_v6  }
  0x15   :  { %v53_v7 = vld [vmem:[#allocation0 + $0xf] ss:$-1 sm:$0xff] }
  0x16   :  { %v54_v8 = vrot.slane %v53_v7, 7 }
  0x18   :  { %55 = vperm.xlu0 %4, %v54_v8  }
  0x8f   :  { %v49_v9 = vpop.permute.xlu0 %48 }
  0x90   :  { %50 = vst [vmem:[#allocation2] sm:$0xff] %v49_v9 }
  0x97   :  { %v56_v11 = vpop.permute.xlu0 %55 }
  0x98   :  { %60 = vst.msk [vmem:[#allocation2] sm:$0xff] %vm59_vm0, %v56_v11 }
  0x9f   :  { %v64_v12 = vld [vmem:[#allocation2] sm:$0x1] }
  0xa0   :  { %66 = vst [vmem:[#allocation3] sm:$0x1] %v64_v12 }
  0xa7   :  { %v82_v13 = vld [vmem:[#allocation3] sm:$0x1] }
  0xa8   :  { %83 = vst [vmem:[%s124_s1] sm:$0x1] %v82_v13 }

// kernel: encoder_forward.1
= control target key start
LH: loop header
LB: loop body
LE: loop exit
PB: predicated region body
PF: predicated region fallthrough
CT: control target
= control target key end

     0   :  { %16 = vsyncpa [#allocation4], 0  ;;  %s9320_s0 = inlined_call_operand.vmem [shape: f32[8], index: 0, kind: input, shape index: {}]   ;;  %s9321_s1 = inlined_call_operand.vmem [shape: f32[64,16], index: 1, kind: input, shape index: {}]   ;;  %s9322_s2 = inlined_call_operand.vmem [shape: f32[8,32], index: 2, kind: input, shape index: {}]   ;;  %s9323_s3 = inlined_call_operand.vmem [shape: f32[8,32], index: 3, kind: input, shape index: {}]   ;;  %s9324_s4 = inlined_call_operand.vmem [shape: f32[128,128], index: 4, kind: input, shape index: {}]   ;;  %s9325_s5 = inlined_call_operand.vmem [shape: f32[384,64], index: 5, kind: input, shape index: {}]   ;;  %s9326_s6 = inlined_call_operand.vmem [shape: f32[64,32], index: 6, kind: input, shape index: {}]   ;;  %s9327_s7 = inlined_call_operand.vmem [shape: f32[16,192], index: 7, kind: input, shape index: {}]   ;;  %s9328_s8 = inlined_call_operand.vmem [shape: f32[8,192], index: 8, kind: input, shape index: {}]   ;;  %s9329_s9 = inlined_call_operand.hbm [shape: f32[8,32], index: 9, kind: output, shape index: {0}]   ;;  %s9330_s10 = inlined_call_operand.hbm [shape: f32[8,32], index: 10, kind: output, shape index: {1}]  }
   0x1   :  { %17 = vsyncpa [#allocation3], 0 }
   0x2   :  { %18 = vsyncpa [#allocation7], 0  ;;  %s25_s15 = sshll.u32 %s9320_s0, 4  ;;  %s26_s15 = int_to_ptr.vmem [resolvable:$true] %s25_s15 }
   0x3   :  { %s7915_s16 = scalar_lea.vmem %s26_s15, 16  ;;  %p7920_p1 = scmp.lt.s32.totalorder %s26_s15, %s26_s15 }
   0x4   :  { %p7916_p0 = scmp.ne.s32.totalorder %s26_s15, %s7915_s16  ;;  %p7921_p2 = scmp.lt.s32.totalorder %s7915_s16, %s7915_s16 }
   0x6   :  { %p7922_p3 = por %p7921_p2, %p7920_p1 }
   0x8   :  { %p7923_p4 = pnand %p7922_p3, %p7916_p0 }
   0xa   :  { %7926 = shalt.err (!%p7923_p4)
}
   0xb   :  { %s7977_s17 = smov [#allocation2]  }
   0xc   :  { %28 = dma.vmem_to_smem %s26_s15, 16, %s7977_s17, [#allocation4]  }
   0xd   :  { %7971 = dma.done.wait [#allocation4], 16  }
   0xe   :  { %7972 = vsyncadd [#allocation4], 4294967280 }
   0xf   :  { %48 = sfence }
  0x10   :  { %v287_v0 = vld [vmem:[%s9326_s6] sm:$0xff]  ;;  %v288_v1 = vld [vmem:[%s9326_s6 + $0x8] sm:$0xff]  ;;  %v289_v2 = vld [vmem:[%s9326_s6 + $0x10] sm:$0xff]  ;;  %v9331_v3 = vmov 0.0|0.0   ;;  %vm7979_vm0 = vmmov 0   ;;  %v7980_v6 = vmov 0.0   ;;  %v144_v47 = vlaneseq }
  0x11   :  { %7173 = vmatprep.subr.bf16.mxu1 %v9331_v3  ;;  %v8053_v4 = vpack.c.bf16 %v288_v1, %v287_v0  ;;  %v290_v5 = vld [vmem:[%s9326_s6 + $0x18] sm:$0xff]  ;;  %6160 = vmatprep.mubr.msk.f32.mxu1 %vm7979_vm0, %v7980_v6  ;;  %v8069_v8 = vld [vmem:[%s9322_s2] sm:$0xff]  ;;  %vm292_vm1 = vcmask 261120   ;;  %v368_v10 = vld [vmem:[%s9326_s6 + $0x28] sm:$0xff]  ;;  %vm154_vm2 = vcmask 130048   ;;  %s286_s27 = sld [smem:[#allocation2]] }
  0x12   :  { %235 = vmatprep.mubr.f32.mxu0 %v7980_v6  ;;  %v8062_v7 = vpack.c.bf16 %v290_v5, %v289_v2  ;;  %v367_v9 = vld [vmem:[%s9326_s6 + $0x20] sm:$0xff]  ;;  %v369_v11 = vld [vmem:[%s9326_s6 + $0x30] sm:$0xff]  ;;  %v370_v13 = vld [vmem:[%s9326_s6 + $0x38] sm:$0xff]  ;;  %v8238_v55 = vshrl.u32 %v144_v47, 7  ;;  %s7982_s28 = smov 120   ;;  %vm89_vm3 = vcmask 64512  }
  0x13   :  { %7175 = vmatpush3.bf16.msra.mxu1 %v8053_v4  ;;  %v8085_v12 = vpack.c.bf16 %v368_v10, %v367_v9  ;;  %v8091_v14 = vpack.c.bf16 %v370_v13, %v369_v11  ;;  %v139_v15 = vld [vmem:[%s9327_s7 + $0x8] sm:$0xff]  ;;  %v141_v16 = vld [vmem:[%s9327_s7 + $0x18] sm:$0xff]  ;;  %v138_v17 = vld [vmem:[%s9327_s7] sm:$0xff]  ;;  %vm868_vm4 = vcmask 523264   ;;  %s5612_s2 = sld [smem:[#allocation2 + $0x1]]  ;;  %s5621_s12 = sld [smem:[#allocation2 + $0x2]] }
  0x14   :  { %7176 = vmatprep.subr.bf16.mxu1 %v9331_v3  ;;  %v7169_v18 = vpack.c.bf16 %v141_v16, %v139_v15  ;;  %v140_v19 = vld [vmem:[%s9327_s7 + $0x10] sm:$0xff]  ;;  %v49_v21 = vld [vmem:[%s9321_s1] sm:$0xff]  ;;  %v50_v22 = vld [vmem:[%s9321_s1 + $0x8] sm:$0xff]  ;;  %v150_v58 = vsub.s32 1, %v8238_v55  ;;  %s5630_s13 = sld [smem:[#allocation2 + $0x3]]  ;;  %s5639_s16 = sld [smem:[#allocation2 + $0x4]] }
  0x15   :  { %v7171_v20 = vpack.c.bf16 %v140_v19, %v138_v17  ;;  %v51_v23 = vld [vmem:[%s9321_s1 + $0x10] sm:$0xff]  ;;  %v52_v24 = vld [vmem:[%s9321_s1 + $0x18] sm:$0xff]  ;;  %v8132_v25 = vld [vmem:[%s9321_s1 + $0x20] sm:$0xff]  ;;  %s5648_s23 = sld [smem:[#allocation2 + $0x5]]  ;;  %s5657_s25 = sld [smem:[#allocation2 + $0x6]] }
  0x16   :  { %7170 = vmatprep.subr.bf16.mxu0 %v7169_v18  ;;  %v8140_v26 = vld [vmem:[%s9321_s1 + $0x28] sm:$0xff]  ;;  %v8148_v27 = vld [vmem:[%s9321_s1 + $0x30] sm:$0xff]  ;;  %v8156_v28 = vld [vmem:[%s9328_s8 + $0x1] ss:$0 sm:$0xff]  ;;  %s5666_s29 = sld [smem:[#allocation2 + $0x7]] }
  0x17   :  { %7178 = vmatpush3.bf16.msra.mxu1 %v8062_v7  ;;  %7172 = vmatpush1.bf16.msra.mxu0 %v7171_v20  ;;  %v452_v32 = vld [vmem:[%s9324_s4 + $0x20] sm:$0xff]  ;;  %v453_v33 = vld [vmem:[%s9324_s4 + $0x28] sm:$0xff]  ;;  %v454_v35 = vld [vmem:[%s9324_s4 + $0x30] sm:$0xff] }
  0x18   :  { %7179 = vmatprep.subr.bf16.mxu1 %v9331_v3  ;;  %7197 = vmatprep.subr.bf16.mxu0 %v9331_v3  ;;  %v8165_v34 = vpack.c.bf16 %v453_v33, %v452_v32  ;;  %v455_v36 = vld [vmem:[%s9324_s4 + $0x38] sm:$0xff]  ;;  %v448_v39 = vld [vmem:[%s9324_s4] sm:$0xff]  ;;  %v449_v40 = vld [vmem:[%s9324_s4 + $0x8] sm:$0xff] }
  0x19   :  { %v8175_v38 = vpack.c.bf16 %v455_v36, %v454_v35  ;;  %v8190_v41 = vld [vmem:[%s9323_s3] sm:$0xff]  ;;  %v8192_v42 = vpack.c.bf16 %v449_v40, %v448_v39  ;;  %v450_v43 = vld [vmem:[%s9324_s4 + $0x10] sm:$0xff]  ;;  %v451_v44 = vld [vmem:[%s9324_s4 + $0x18] sm:$0xff] }
  0x1a   :  { %6161 = vmatmul.mubr.msk.f32.vlgmr.msra.gmra.mrb[0].mxu1 %vm292_vm1, %v8069_v8  ;;  %5596 = vmatmul.mubr.msk.f32.vlgmr.msra.gmra.mrb[0].mxu0 %vm154_vm2, %v49_v21  ;;  %v8207_v45 = vpack.c.bf16 %v451_v44, %v450_v43  ;;  %v8212_v46 = vld [vmem:[%s9321_s1 + $0x38] sm:$0xff]  ;;  %v604_v49 = vld [vmem:[%s9325_s5 + $0x40] sm:$0xff]  ;;  %v605_v50 = vld [vmem:[%s9325_s5 + $0x48] sm:$0xff] }
  0x1b   :  { %6171 = vmatprep.mubr.msk.f32.mxu1 %vm7979_vm0, %v7980_v6  ;;  %7181 = vmatpush3.bf16.msra.mxu1 %v8085_v12  ;;  %v8230_v52 = vpack.c.bf16 %v605_v50, %v604_v49  ;;  %v606_v53 = vld [vmem:[%s9325_s5 + $0x50] sm:$0xff]  ;;  %v607_v54 = vld [vmem:[%s9325_s5 + $0x58] sm:$0xff]  ;;  %v8243_v56 = vld [vmem:[%s9328_s8] ss:$8 sm:$0x3] }
  0x1c   :  { %7182 = vmatprep.subr.bf16.mxu1 %v9331_v3  ;;  %241 = vmatprep.mubr.f32.mxu0 %v7980_v6  ;;  %v8246_v57 = vpack.c.bf16 %v607_v54, %v606_v53  ;;  %v608_v60 = vld [vmem:[%s9325_s5 + $0x60] sm:$0xff]  ;;  %v609_v61 = vld [vmem:[%s9325_s5 + $0x68] sm:$0xff]  ;;  %v8261_v63 = vrot.slane %v8243_v56, %v150_v58  ;;  %v610_v2 = vld [vmem:[%s9325_s5 + $0x70] sm:$0xff]  ;;  %v146_v54 = vsub.s32 0, %v8238_v55 }
  0x1d   :  { %7199 = vmatpush3.bf16.msra.mxu0 %v8230_v52  ;;  %v8264_v0 = vpack.c.bf16 %v609_v61, %v608_v60  ;;  %v611_v5 = vld [vmem:[%s9325_s5 + $0x78] sm:$0xff]  ;;  %v612_v21 = vld [vmem:[%s9325_s5 + $0x80] sm:$0xff]  ;;  %v614_v39 = vld [vmem:[%s9325_s5 + $0x90] sm:$0xff] }
  0x1e   :  { %5597 = vmatmul.mubr.msk.f32.gmra.mrb[2].mxu0 %vm154_vm2, %v50_v22  ;;  %7200 = vmatprep.subr.bf16.mxu0 %v9331_v3  ;;  %v8278_v10 = vpack.c.bf16 %v611_v5, %v610_v2  ;;  %v613_v22 = vld [vmem:[%s9325_s5 + $0x88] sm:$0xff]  ;;  %v615_v40 = vld [vmem:[%s9325_s5 + $0x98] sm:$0xff]  ;;  %v618_v49 = vld [vmem:[%s9325_s5 + $0xb0] sm:$0xff]  ;;  %v8356_v58 = vrot.slane %v8243_v56, %v146_v54 }
  0x1f   :  { %7184 = vmatpush3.bf16.msra.mxu1 %v8091_v14  ;;  %247 = vmatprep.mubr.f32.mxu0 %v7980_v6  ;;  %v8330_v43 = vpack.c.bf16 %v615_v40, %v614_v39  ;;  %v617_v44 = vld [vmem:[%s9325_s5 + $0xa8] sm:$0xff]  ;;  %v619_v50 = vld [vmem:[%s9325_s5 + $0xb8] sm:$0xff]  ;;  %v709_v56 = vld [vmem:[%s9325_s5 + $0x30] sm:$0xff] }
  0x20   :  { %7185 = vmatprep.subr.bf16.mxu1 %v9331_v3  ;;  %v8349_v53 = vpack.c.bf16 %v619_v50, %v618_v49  ;;  %v708_v55 = vld [vmem:[%s9325_s5 + $0x28] sm:$0xff]  ;;  %v702_v50 = vld [vmem:[%s9325_s5] sm:$0xff] }
  0x21   :  { %7202 = vmatpush3.bf16.msra.mxu0 %v8246_v57  ;;  %v703_v54 = vld [vmem:[%s9325_s5 + $0x8] sm:$0xff] }
  0x22   :  { %5598 = vmatmul.mubr.msk.f32.gmra.mrb[4].mxu0 %vm154_vm2, %v51_v23  ;;  %7203 = vmatprep.subr.bf16.mxu0 %v9331_v3  ;;  %v8305_v23 = vpack.c.bf16 %v613_v22, %v612_v21  ;;  %v707_v22 = vld [vmem:[%s9325_s5 + $0x20] sm:$0xff] }
  0x23   :  { %253 = vmatprep.mubr.f32.mxu0 %v7980_v6 }
  0x25   :  { %7205 = vmatpush3.bf16.msra.mxu0 %v8264_v0 }
  0x26   :  { %5599 = vmatmul.mubr.msk.f32.gmra.mrb[6].mxu0 %vm154_vm2, %v52_v24  ;;  %7206 = vmatprep.subr.bf16.mxu0 %v9331_v3  ;;  %v8312_v24 = vld [vmem:[%s9328_s8 + $0x2] ss:$0 sm:$0xff] }
  0x27   :  { %259 = vmatprep.mubr.f32.mxu0 %v7980_v6 }
  0x29   :  { %7208 = vmatpush3.bf16.msra.mxu0 %v8278_v10 }
  0x2a   :  { %5600 = vmatmul.mubr.msk.f32.gmra.mrb[8].mxu0 %vm154_vm2, %v8132_v25  ;;  %7209 = vmatprep.subr.bf16.mxu0 %v9331_v3 }
  0x2b   :  { %265 = vmatprep.mubr.f32.mxu0 %v7980_v6 }
  0x2d   :  { %7211 = vmatpush3.bf16.msra.mxu0 %v8305_v23 }
  0x2e   :  { %5601 = vmatmul.mubr.msk.f32.gmra.mrb[10].mxu0 %vm154_vm2, %v8140_v26  ;;  %7212 = vmatprep.subr.bf16.mxu0 %v9331_v3 }
  0x2f   :  { %271 = vmatprep.mubr.f32.mxu0 %v7980_v6 }
  0x31   :  { %7214 = vmatpush3.bf16.msra.mxu0 %v8330_v43 }
  0x32   :  { %5602 = vmatmul.mubr.msk.f32.gmra.mrb[12].mxu0 %vm154_vm2, %v8148_v27  ;;  %7215 = vmatprep.subr.bf16.mxu0 %v9331_v3 }
  0x33   :  { %277 = vmatprep.mubr.f32.mxu0 %v7980_v6 }
  0x36   :  { %5603 = vmatmul.mubr.msk.f32.gmra.mrb[14].mxu0 %vm154_vm2, %v8212_v46 }
  0x37   :  { %6228 = vmatprep.mubr.msk.f32.mxu0 %vm7979_vm0, %v7980_v6 }
  0xed   :  { %v362_v29 = vpop.f32.mrb[0].mxu1  ;;  %v8220_v48 = vpop.f32.mrb[0].mxu0 }
  0xee   :  { %v363_v30 = vadd.f32 %v362_v29, %v8156_v28  ;;  %v6162_v31 = vpop.f32.mrb[1].mxu1  ;;  %v8228_v51 = vpop.f32.mrb[1].mxu0 }
  0xf0   :  { %7825 = vtanh.f32 %v363_v30  ;;  %v445_v30 = vstv %s286_s27  ;;  %s7981_s27 = smov 96  }
  0xf1   :  { %v8249_v59 = vpop.f32.mrb[2].mxu0 }
  0xf2   :  { %v8258_v62 = vpop.f32.mrb[3].mxu0 }
  0xf5   :  { %v8266_v1 = vpop.f32.mrb[4].mxu0 }
  0xf6   :  { %v8275_v9 = vpop.f32.mrb[5].mxu0 }
  0xf9   :  { %v8280_v11 = vpop.f32.mrb[6].mxu0 }
  0xfa   :  { %v7826_v37 = vpop.eup %7825  ;;  %v8283_v13 = vpop.f32.mrb[7].mxu0 }
  0xfb   :  { %6172 = vmatmul.mubr.msk.f32.vlgmr.msra.gmra.mrb[2].mxu1 %vm292_vm1, %v7826_v37 }
  0xfc   :  { %7187 = vmatpush3.bf16.msra.mxu1 %v8165_v34  ;;  %6182 = vmatprep.mubr.msk.f32.mxu1 %vm7979_vm0, %v7980_v6 }
  0xfd   :  { %7188 = vmatprep.subr.bf16.mxu1 %v9331_v3  ;;  %v8286_v15 = vpop.f32.mrb[8].mxu0 }
  0xfe   :  { %v8289_v16 = vpop.f32.mrb[9].mxu0 }
 0x100   :  { %7190 = vmatpush3.bf16.msra.mxu1 %v8175_v38 }
 0x101   :  { %7191 = vmatprep.subr.bf16.mxu1 %v9331_v3  ;;  %v8291_v17 = vpop.f32.mrb[10].mxu0 }
 0x102   :  { %v8293_v18 = vpop.f32.mrb[11].mxu0 }
 0x103   :  { %6183 = vmatmul.mubr.msk.f32.vlgmr.msra.gmra.mrb[4].mxu1 %vm292_vm1, %v8190_v41 }
 0x104   :  { %7193 = vmatpush3.bf16.msra.mxu1 %v8192_v42  ;;  %6193 = vmatprep.mubr.msk.f32.mxu1 %vm7979_vm0, %v7980_v6 }
 0x105   :  { %7194 = vmatprep.subr.bf16.mxu1 %v9331_v3  ;;  %v8295_v19 = vpop.f32.mrb[12].mxu0 }
 0x106   :  { %v8297_v20 = vpop.f32.mrb[13].mxu0 }
 0x108   :  { %7196 = vmatpush3.bf16.msra.mxu1 %v8207_v45 }
 0x109   :  { %7221 = vmatprep.subr.bf16.mxu1 %v9331_v3  ;;  %v279_v36 = vpop.f32.mrb[14].mxu0 }
 0x10a   :  { %v8322_v37 = vpop.f32.mrb[15].mxu0  ;;  %v280_v60 = vadd.f32 %v279_v36, %v8356_v58 }
 0x1ce   :  { %v441_v29 = vpop.f32.mrb[2].mxu1 }
 0x1cf   :  { %v442_v31 = vadd.f32 %v441_v29, %v8312_v24  ;;  %v6173_v32 = vpop.f32.mrb[3].mxu1  ;;  %v8370_v29 = vpack.c.bf16 %v708_v55, %v707_v22 }
 0x1d0   :  { %v8384_v32 = vld [vmem:[%s9328_s8 + $0x3] ss:$0 sm:$0xff] }
 0x1d1   :  { %v446_v33 = vmul.f32 %v445_v30, %v442_v31  ;;  %v710_v30 = vld [vmem:[%s9325_s5 + $0x38] sm:$0xff] }
 0x1d2   :  { %v8376_v31 = vpack.c.bf16 %v710_v30, %v709_v56  ;;  %v859_v30 = vld [vmem:[%s9325_s5 + $0xc0] sm:$0xff] }
 0x1d3   :  { %v8316_v35 = vadd.f32 %v446_v33, %v8069_v8  ;;  %v616_v8 = vld [vmem:[%s9325_s5 + $0xa0] sm:$0xff] }
 0x1d4   :  { %v8340_v47 = vpack.c.bf16 %v617_v44, %v616_v8 }
 0x1d5   :  { %6194 = vmatmul.mubr.msk.f32.vlgmr.msra.gmra.mrb[4].mxu1 %vm292_vm1, %v8316_v35 }
 0x1d6   :  { %6239 = vmatprep.mubr.msk.f32.mxu1 %vm7979_vm0, %v7980_v6  ;;  %7217 = vmatpush3.bf16.msra.mxu0 %v8340_v47 }
 0x1d7   :  { %7218 = vmatprep.subr.bf16.mxu0 %v9331_v3  ;;  %7223 = vmatpush3.bf16.msra.mxu1 %v8370_v29 }
 0x1d8   :  { %7224 = vmatprep.subr.bf16.mxu1 %v9331_v3 }
 0x1da   :  { %7220 = vmatpush3.bf16.msra.mxu0 %v8349_v53 }
 0x1db   :  { %7233 = vmatprep.subr.bf16.mxu0 %v9331_v3  ;;  %7226 = vmatpush3.bf16.msra.mxu1 %v8376_v31 }
 0x1dc   :  { %7227 = vmatprep.subr.bf16.mxu1 %v9331_v3 }
 0x2a8   :  { %v598_v61 = vpop.f32.mrb[4].mxu1 }
 0x2a9   :  { %v602_v2 = vadd.f32 %v598_v61, %v280_v60  ;;  %v6195_v5 = vpop.f32.mrb[5].mxu1  ;;  %v8399_v61 = vpack.c.bf16 %v703_v54, %v702_v50  ;;  %v864_v50 = vld [vmem:[%s9325_s5 + $0xe8] sm:$0xff] }
 0x2aa   :  { %v704_v5 = vld [vmem:[%s9325_s5 + $0x10] sm:$0xff] }
 0x2ab   :  { %7827 = vtanh.f32 %v602_v2 }
 0x2b5   :  { %v7828_v21 = vpop.eup %7827 }
 0x2b6   :  { %6229 = vmatmul.mubr.f32.vlgmr.msra.gmra.mrb[16].mxu0 %v7828_v21 }
 0x2b7   :  { %6269 = vmatprep.mubr.msk.f32.mxu0 %vm7979_vm0, %v7980_v6 }
 0x389   :  { %v687_v33 = vpop.f32.mrb[16].mxu0 }
 0x38a   :  { %v688_v36 = vadd.f32 %v687_v33, %v8384_v32  ;;  %v6230_v39 = vpop.f32.mrb[17].mxu0  ;;  %v860_v33 = vld [vmem:[%s9325_s5 + $0xc8] sm:$0xff] }
 0x38b   :  { %v861_v39 = vld [vmem:[%s9325_s5 + $0xd0] sm:$0xff] }
 0x38c   :  { %v5608_v40 = vmul.f32 -1.442695, %v688_v36  ;;  %v8432_v36 = vpack.c.bf16 %v860_v33, %v859_v30  ;;  %v8478_v33 = vld [vmem:[%s9328_s8 + $0x4] ss:$0 sm:$0xff] }
 0x38e   :  { %7829 = vpow2.f32 %v5608_v40  ;;  %7235 = vmatpush3.bf16.msra.mxu0 %v8432_v36  ;;  %v862_v40 = vld [vmem:[%s9325_s5 + $0xd8] sm:$0xff] }
 0x38f   :  { %7236 = vmatprep.subr.bf16.mxu0 %v9331_v3 }
 0x398   :  { %v7830_v8 = vpop.eup %7829 }
 0x399   :  { %v694_v44 = vadd.f32 1.0, %v7830_v8  ;;  %v8442_v8 = vpack.c.bf16 %v862_v40, %v861_v39 }
 0x39b   :  { %7831 = vrcp.f32 %v694_v44  ;;  %7238 = vmatpush3.bf16.msra.mxu0 %v8442_v8  ;;  %v863_v44 = vld [vmem:[%s9325_s5 + $0xe0] sm:$0xff] }
 0x39c   :  { %7239 = vmatprep.subr.bf16.mxu0 %v9331_v3  ;;  %v8452_v54 = vpack.c.bf16 %v864_v50, %v863_v44 }
 0x39f   :  { %7241 = vmatpush3.bf16.msra.mxu0 %v8452_v54 }
 0x3a0   :  { %7242 = vmatprep.subr.bf16.mxu0 %v9331_v3 }
 0x3a5   :  { %v8387_v49 = vpop.eup %7831 }
 0x3a6   :  { %698 = vrot.lane.b32.xlu0 %v8387_v49, %s7981_s27  ;;  %v943_v50 = vsub.f32 1.0, %v8387_v49 }
 0x3aa   :  { %79 = vrot.lane.b32.xlu0 %v8212_v46, %s7982_s28  ;;  %v705_v46 = vld [vmem:[%s9325_s5 + $0x18] sm:$0xff] }
 0x3ab   :  { %v8410_v22 = vpack.c.bf16 %v705_v46, %v704_v5  ;;  %v282_v46 = vadd.f32 %v8322_v37, %v8261_v63 }
 0x418   :  { %v699_v60 = vpop.permute.xlu0 %698 }
 0x419   :  { %v706_v2 = vmul.f32 %v699_v60, %v8190_v41  ;;  %v701_v56 = vmul.f32 %v699_v60, %v8316_v35  ;;  %v865_v60 = vld [vmem:[%s9325_s5 + $0xf0] sm:$0xff] }
 0x41b   :  { %6240 = vmatmul.mubr.msk.f32.vlgmr.msra.gmra.mrb[6].mxu1 %vm292_vm1, %v706_v2  ;;  %v866_v2 = vld [vmem:[%s9325_s5 + $0xf8] sm:$0xff] }
 0x41c   :  { %7229 = vmatpush3.bf16.msra.mxu1 %v8399_v61  ;;  %v80_v21 = vpop.permute.xlu0 %79  ;;  %6250 = vmatprep.mubr.msk.f32.mxu1 %vm7979_vm0, %v7980_v6  ;;  %v8461_v5 = vpack.c.bf16 %v866_v2, %v865_v60 }
 0x41d   :  { %7230 = vmatprep.subr.bf16.mxu1 %v9331_v3  ;;  %v111_v55 = vsel %vm89_vm3, %v80_v21, 0.0 }
 0x41e   :  { %112 = vadd.xlane.f32.xlu1 %v111_v55  ;;  %7244 = vmatpush3.bf16.msra.mxu0 %v8461_v5 }
 0x41f   :  { %7251 = vmatprep.subr.bf16.mxu0 %v9331_v3 }
 0x420   :  { %7232 = vmatpush3.bf16.msra.mxu1 %v8410_v22 }
 0x421   :  { %7245 = vmatprep.subr.bf16.mxu1 %v9331_v3 }
 0x423   :  { %6251 = vmatmul.mubr.msk.f32.vlgmr.msra.gmra.mrb[6].mxu1 %vm292_vm1, %v701_v56 }
 0x424   :  { %7247 = vmatpush3.bf16.msra.mxu1 %v8053_v4  ;;  %6280 = vmatprep.mubr.msk.f32.mxu1 %vm7979_vm0, %v7980_v6 }
 0x425   :  { %7248 = vmatprep.subr.bf16.mxu1 %v9331_v3 }
 0x428   :  { %7250 = vmatpush3.bf16.msra.mxu1 %v8062_v7 }
 0x429   :  { %7257 = vmatprep.subr.bf16.mxu1 %v9331_v3 }
 0x4ab   :  { %v113_v37 = vpop.xlane.xlu1 %112 }
 0x4ac   :  { %vm121_vm5 = vcmp.gt.f32.partialorder %v113_v37, 0.0 }
 0x4ad   :  { %v5595_v39 = vsel %vm121_vm5, 1.0, %v7980_v6 }
 0x4ae   :  { %v955_v2 = vsub.f32 1.0, %v5595_v39 }
 0x4f6   :  { %v853_v21 = vpop.f32.mrb[6].mxu1 }
 0x4f7   :  { %v857_v55 = vadd.f32 %v853_v21, %v282_v46  ;;  %v6252_v56 = vpop.f32.mrb[7].mxu1 }
 0x4f9   :  { %7833 = vtanh.f32 %v857_v55  ;;  %v945_v55 = vmul.f32 %v8387_v49, %v8316_v35 }
 0x503   :  { %v7834_v30 = vpop.eup %7833 }
 0x504   :  { %6270 = vmatmul.mubr.msk.f32.vlgmr.msra.gmra.mrb[18].mxu0 %vm868_vm4, %v7834_v30  ;;  %v956_v30 = vmul.f32 %v955_v2, %v8316_v35 }
 0x505   :  { %7253 = vmatpush3.bf16.msra.mxu0 %v8085_v12  ;;  %6291 = vmatprep.mubr.msk.f32.mxu0 %vm7979_vm0, %v7980_v6 }
 0x506   :  { %7254 = vmatprep.subr.bf16.mxu0 %v9331_v3 }
 0x509   :  { %7256 = vmatpush3.bf16.msra.mxu0 %v8091_v14 }
 0x50a   :  { %7269 = vmatprep.subr.bf16.mxu0 %v9331_v3 }
 0x5d7   :  { %v938_v40 = vpop.f32.mrb[18].mxu0 }
 0x5d8   :  { %v939_v44 = vadd.f32 %v938_v40, %v8478_v33  ;;  %v6271_v60 = vpop.f32.mrb[19].mxu0  ;;  %v9333_v40 = vmov 0.0|0.0  }
 0x5d9   :  { %v952_v60 = vmul.f32 %v8387_v49, %v8190_v41 }
 0x5da   :  { %v942_v46 = vand.u32 2147483647, %v939_v44  ;;  %v944_v21 = vmul.f32 %v943_v50, %v939_v44 }
 0x5dc   :  { %v946_v56 = vadd.f32 %v945_v55, %v944_v21  ;;  %948 = vrot.lane.b32.xlu1 %v942_v46, %s7981_s27  ;;  %v959_v21 = vmul.f32 %v955_v2, %v8190_v41 }
 0x5de   :  { %v954_v37 = vmul.f32 %v5595_v39, %v946_v56 }
 0x5e0   :  { %v957_v3 = vadd.f32 %v956_v30, %v954_v37  ;;  %v1109_v30 = vstv %s5612_s2 }
 0x5e2   :  { %6281 = vmatmul.mubr.msk.f32.vlgmr.msra.gmra.mrb[8].mxu1 %vm292_vm1, %v957_v3 }
 0x5e3   :  { %7259 = vmatpush3.bf16.msra.mxu1 %v8165_v34  ;;  %6302 = vmatprep.mubr.msk.f32.mxu1 %vm7979_vm0, %v7980_v6 }
 0x5e4   :  { %7260 = vmatprep.subr.bf16.mxu1 %v9333_v40 }
 0x5e7   :  { %7262 = vmatpush3.bf16.msra.mxu1 %v8175_v38 }
 0x5e8   :  { %7263 = vmatprep.subr.bf16.mxu1 %v9333_v40 }
 0x64e   :  { %v949_v44 = vpop.permute.xlu1 %948 }
 0x64f   :  { %v951_v35 = vmul.f32 %v949_v44, %v943_v50 }
 0x651   :  { %v953_v46 = vadd.f32 %v952_v60, %v951_v35 }
 0x653   :  { %v958_v55 = vmul.f32 %v5595_v39, %v953_v46  ;;  %v274_v46 = vadd.f32 %v8295_v19, %v8356_v58 }
 0x655   :  { %v8497_v56 = vadd.f32 %v959_v21, %v958_v55 }
 0x657   :  { %6303 = vmatmul.mubr.msk.f32.vlgmr.msra.gmra.mrb[10].mxu1 %vm292_vm1, %v8497_v56 }
 0x658   :  { %7265 = vmatpush3.bf16.msra.mxu1 %v8192_v42  ;;  %6313 = vmatprep.mubr.msk.f32.mxu1 %vm7979_vm0, %v7980_v6 }
 0x659   :  { %7266 = vmatprep.subr.bf16.mxu1 %v9333_v40 }
 0x65c   :  { %7268 = vmatpush3.bf16.msra.mxu1 %v8207_v45 }
 0x65d   :  { %7293 = vmatprep.subr.bf16.mxu1 %v9333_v40 }
 0x6b5   :  { %v1031_v49 = vpop.f32.mrb[8].mxu1 }
 0x6b6   :  { %v1032_v41 = vadd.f32 %v1031_v49, %v8156_v28  ;;  %v6282_v39 = vpop.f32.mrb[9].mxu1 }
 0x6b8   :  { %7835 = vtanh.f32 %v1032_v41 }
 0x6c2   :  { %v7836_v50 = vpop.eup %7835 }
 0x6c3   :  { %6292 = vmatmul.mubr.msk.f32.vlgmr.msra.gmra.mrb[20].mxu0 %vm292_vm1, %v7836_v50 }
 0x6c4   :  { %7271 = vmatpush3.bf16.msra.mxu0 %v8230_v52  ;;  %6348 = vmatprep.mubr.msk.f32.mxu0 %vm7979_vm0, %v7980_v6 }
 0x6c5   :  { %7272 = vmatprep.subr.bf16.mxu0 %v9333_v40 }
 0x6c8   :  { %7274 = vmatpush3.bf16.msra.mxu0 %v8246_v57 }
 0x6c9   :  { %7275 = vmatprep.subr.bf16.mxu0 %v9333_v40 }
 0x6cc   :  { %7277 = vmatpush3.bf16.msra.mxu0 %v8264_v0 }
 0x6cd   :  { %7278 = vmatprep.subr.bf16.mxu0 %v9333_v40 }
 0x6d0   :  { %7280 = vmatpush3.bf16.msra.mxu0 %v8278_v10 }
 0x6d1   :  { %7281 = vmatprep.subr.bf16.mxu0 %v9333_v40 }
 0x6d4   :  { %7283 = vmatpush3.bf16.msra.mxu0 %v8305_v23 }
 0x6d5   :  { %7284 = vmatprep.subr.bf16.mxu0 %v9333_v40 }
 0x6d8   :  { %7286 = vmatpush3.bf16.msra.mxu0 %v8330_v43 }
 0x6d9   :  { %7287 = vmatprep.subr.bf16.mxu0 %v9333_v40 }
 0x6dc   :  { %7289 = vmatpush3.bf16.msra.mxu0 %v8340_v47 }
 0x6dd   :  { %7290 = vmatprep.subr.bf16.mxu0 %v9333_v40 }
 0x6e0   :  { %7292 = vmatpush3.bf16.msra.mxu0 %v8349_v53 }
 0x6e1   :  { %7305 = vmatprep.subr.bf16.mxu0 %v9333_v40 }
 0x796   :  { %v1105_v2 = vpop.f32.mrb[20].mxu0 }
 0x797   :  { %v1106_v37 = vadd.f32 %v1105_v2, %v8312_v24  ;;  %v6293_v44 = vpop.f32.mrb[21].mxu0 }
 0x799   :  { %v1110_v60 = vmul.f32 %v1109_v30, %v1106_v37 }
 0x79b   :  { %v8528_v35 = vadd.f32 %v1110_v60, %v957_v3 }
 0x79d   :  { %6314 = vmatmul.mubr.msk.f32.vlgmr.msra.gmra.mrb[10].mxu1 %vm292_vm1, %v8528_v35 }
 0x79e   :  { %7295 = vmatpush3.bf16.msra.mxu1 %v8370_v29  ;;  %6359 = vmatprep.mubr.msk.f32.mxu1 %vm7979_vm0, %v7980_v6 }
 0x79f   :  { %7296 = vmatprep.subr.bf16.mxu1 %v9333_v40 }
 0x7a2   :  { %7298 = vmatpush3.bf16.msra.mxu1 %v8376_v31 }
 0x7a3   :  { %7299 = vmatprep.subr.bf16.mxu1 %v9333_v40 }
 0x870   :  { %v1254_v21 = vpop.f32.mrb[10].mxu1 }
 0x871   :  { %v1258_v3 = vadd.f32 %v1254_v21, %v274_v46  ;;  %v6315_v55 = vpop.f32.mrb[11].mxu1 }
 0x873   :  { %7837 = vtanh.f32 %v1258_v3  ;;  %v276_v3 = vadd.f32 %v8297_v20, %v8261_v63 }
 0x87d   :  { %v7838_v49 = vpop.eup %7837 }
 0x87e   :  { %6349 = vmatmul.mubr.f32.vlgmr.msra.gmra.mrb[22].mxu0 %v7838_v49 }
 0x87f   :  { %7307 = vmatpush3.bf16.msra.mxu0 %v8432_v36  ;;  %6389 = vmatprep.mubr.msk.f32.mxu0 %vm7979_vm0, %v7980_v6 }
 0x880   :  { %7308 = vmatprep.subr.bf16.mxu0 %v9333_v40 }
 0x883   :  { %7310 = vmatpush3.bf16.msra.mxu0 %v8442_v8 }
 0x884   :  { %7311 = vmatprep.subr.bf16.mxu0 %v9333_v40 }
 0x887   :  { %7313 = vmatpush3.bf16.msra.mxu0 %v8452_v54 }
 0x888   :  { %7314 = vmatprep.subr.bf16.mxu0 %v9333_v40 }
 0x88b   :  { %7316 = vmatpush3.bf16.msra.mxu0 %v8461_v5 }
 0x88c   :  { %7317 = vmatprep.subr.bf16.mxu0 %v9333_v40 }
 0x951   :  { %v1326_v19 = vpop.f32.mrb[22].mxu0 }
 0x952   :  { %v1327_v41 = vadd.f32 %v1326_v19, %v8384_v32  ;;  %v6350_v39 = vpop.f32.mrb[23].mxu0 }
 0x954   :  { %v5617_v50 = vmul.f32 -1.442695, %v1327_v41 }
 0x956   :  { %7839 = vpow2.f32 %v5617_v50 }
 0x960   :  { %v7840_v2 = vpop.eup %7839 }
 0x961   :  { %v1333_v30 = vadd.f32 1.0, %v7840_v2 }
 0x963   :  { %7841 = vrcp.f32 %v1333_v30 }
 0x96d   :  { %v7842_v37 = vpop.eup %7841 }
 0x96e   :  { %1337 = vrot.lane.b32.xlu0 %v7842_v37, %s7981_s27  ;;  %v1564_v30 = vsub.f32 1.0, %v7842_v37 }
 0x972   :  { %77 = vrot.lane.b32.xlu0 %v8148_v27, %s7982_s28 }
 0x9e0   :  { %v1338_v44 = vpop.permute.xlu0 %1337 }
 0x9e1   :  { %v1341_v60 = vmul.f32 %v1338_v44, %v8497_v56  ;;  %v1340_v27 = vmul.f32 %v1338_v44, %v8528_v35 }
 0x9e3   :  { %6360 = vmatmul.mubr.msk.f32.vlgmr.msra.gmra.mrb[12].mxu1 %vm292_vm1, %v1341_v60 }
 0x9e4   :  { %7301 = vmatpush3.bf16.msra.mxu1 %v8399_v61  ;;  %v78_v46 = vpop.permute.xlu0 %77  ;;  %6370 = vmatprep.mubr.msk.f32.mxu1 %vm7979_vm0, %v7980_v6 }
 0x9e5   :  { %7302 = vmatprep.subr.bf16.mxu1 %v9333_v40  ;;  %v108_v21 = vsel %vm89_vm3, %v78_v46, 0.0 }
 0x9e6   :  { %109 = vadd.xlane.f32.xlu0 %v108_v21 }
 0x9e8   :  { %7304 = vmatpush3.bf16.msra.mxu1 %v8410_v22 }
 0x9e9   :  { %7329 = vmatprep.subr.bf16.mxu1 %v9333_v40 }
 0x9eb   :  { %6371 = vmatmul.mubr.msk.f32.vlgmr.msra.gmra.mrb[12].mxu1 %vm292_vm1, %v1340_v27  ;;  %v1566_v27 = vmul.f32 %v7842_v37, %v8528_v35 }
 0x9ec   :  { %7331 = vmatpush3.bf16.msra.mxu1 %v8165_v34  ;;  %6422 = vmatprep.mubr.msk.f32.mxu1 %vm7979_vm0, %v7980_v6 }
 0x9ed   :  { %7332 = vmatprep.subr.bf16.mxu1 %v9333_v40 }
 0x9f0   :  { %7334 = vmatpush3.bf16.msra.mxu1 %v8175_v38 }
 0x9f1   :  { %7335 = vmatprep.subr.bf16.mxu1 %v9333_v40 }
 0xa73   :  { %v110_v39 = vpop.xlane.xlu0 %109 }
 0xa74   :  { %vm120_vm6 = vcmp.gt.f32.partialorder %v110_v39, 0.0  ;;  %v1573_v39 = vmul.f32 %v7842_v37, %v8497_v56 }
 0xa75   :  { %v5594_v20 = vsel %vm120_vm6, 1.0, %v7980_v6 }
 0xa76   :  { %v1576_v60 = vsub.f32 1.0, %v5594_v20 }
 0xabe   :  { %v1484_v55 = vpop.f32.mrb[12].mxu1 }
 0xabf   :  { %v1488_v49 = vadd.f32 %v1484_v55, %v276_v3  ;;  %v6372_v19 = vpop.f32.mrb[13].mxu1  ;;  %v1577_v55 = vmul.f32 %v1576_v60, %v8528_v35 }
 0xac1   :  { %7843 = vtanh.f32 %v1488_v49 }
 0xacb   :  { %v7844_v41 = vpop.eup %7843 }
 0xacc   :  { %6390 = vmatmul.mubr.msk.f32.vlgmr.msra.gmra.mrb[24].mxu0 %vm868_vm4, %v7844_v41 }
 0xacd   :  { %7319 = vmatpush3.bf16.msra.mxu0 %v8053_v4  ;;  %6400 = vmatprep.mubr.msk.f32.mxu0 %vm7979_vm0, %v7980_v6 }
 0xace   :  { %7320 = vmatprep.subr.bf16.mxu0 %v9333_v40 }
 0xad1   :  { %7322 = vmatpush3.bf16.msra.mxu0 %v8062_v7 }
 0xad2   :  { %7323 = vmatprep.subr.bf16.mxu0 %v9333_v40 }
 0xb9f   :  { %v1559_v50 = vpop.f32.mrb[24].mxu0 }
 0xba0   :  { %v1560_v2 = vadd.f32 %v1559_v50, %v8478_v33  ;;  %v6391_v44 = vpop.f32.mrb[25].mxu0 }
 0xba2   :  { %v1563_v46 = vand.u32 2147483647, %v1560_v2  ;;  %v1565_v21 = vmul.f32 %v1564_v30, %v1560_v2  ;;  %v1580_v2 = vmul.f32 %v1576_v60, %v8497_v56 }
 0xba4   :  { %v1567_v3 = vadd.f32 %v1566_v27, %v1565_v21  ;;  %1569 = vrot.lane.b32.xlu1 %v1563_v46, %s7981_s27  ;;  %v1730_v21 = vstv %s5621_s12 }
 0xba6   :  { %v1575_v49 = vmul.f32 %v5594_v20, %v1567_v3 }
 0xba8   :  { %v1578_v19 = vadd.f32 %v1577_v55, %v1575_v49 }
 0xbaa   :  { %6401 = vmatmul.mubr.msk.f32.vlgmr.msra.gmra.mrb[26].mxu0 %vm292_vm1, %v1578_v19 }
 0xbab   :  { %7325 = vmatpush3.bf16.msra.mxu0 %v8085_v12  ;;  %6411 = vmatprep.mubr.msk.f32.mxu0 %vm7979_vm0, %v7980_v6 }
 0xbac   :  { %7326 = vmatprep.subr.bf16.mxu0 %v9333_v40 }
 0xbaf   :  { %7328 = vmatpush3.bf16.msra.mxu0 %v8091_v14 }
 0xbb0   :  { %7341 = vmatprep.subr.bf16.mxu0 %v9333_v40 }
 0xc16   :  { %v1570_v41 = vpop.permute.xlu1 %1569 }
 0xc17   :  { %v1572_v50 = vmul.f32 %v1570_v41, %v1564_v30  ;;  %v268_v41 = vadd.f32 %v8291_v17, %v8356_v58 }
 0xc19   :  { %v1574_v35 = vadd.f32 %v1573_v39, %v1572_v50 }
 0xc1b   :  { %v1579_v44 = vmul.f32 %v5594_v20, %v1574_v35 }
 0xc1d   :  { %v8594_v46 = vadd.f32 %v1580_v2, %v1579_v44 }
 0xc1f   :  { %6423 = vmatmul.mubr.msk.f32.vlgmr.msra.gmra.mrb[14].mxu1 %vm292_vm1, %v8594_v46 }
 0xc20   :  { %7337 = vmatpush3.bf16.msra.mxu1 %v8192_v42  ;;  %6433 = vmatprep.mubr.msk.f32.mxu1 %vm7979_vm0, %v7980_v6 }
 0xc21   :  { %7338 = vmatprep.subr.bf16.mxu1 %v9333_v40 }
 0xc24   :  { %7340 = vmatpush3.bf16.msra.mxu1 %v8207_v45 }
 0xc25   :  { %7365 = vmatprep.subr.bf16.mxu1 %v9333_v40 }
 0xc7d   :  { %v1652_v37 = vpop.f32.mrb[26].mxu0 }
 0xc7e   :  { %v1653_v56 = vadd.f32 %v1652_v37, %v8156_v28  ;;  %v6402_v20 = vpop.f32.mrb[27].mxu0 }
 0xc80   :  { %7845 = vtanh.f32 %v1653_v56 }
 0xc8a   :  { %v7846_v30 = vpop.eup %7845 }
 0xc8b   :  { %6412 = vmatmul.mubr.msk.f32.vlgmr.msra.gmra.mrb[28].mxu0 %vm292_vm1, %v7846_v30 }
 0xc8c   :  { %7343 = vmatpush3.bf16.msra.mxu0 %v8230_v52  ;;  %6468 = vmatprep.mubr.msk.f32.mxu0 %vm7979_vm0, %v7980_v6 }
 0xc8d   :  { %7344 = vmatprep.subr.bf16.mxu0 %v9333_v40 }
 0xc90   :  { %7346 = vmatpush3.bf16.msra.mxu0 %v8246_v57 }
 0xc91   :  { %7347 = vmatprep.subr.bf16.mxu0 %v9333_v40 }
 0xc94   :  { %7349 = vmatpush3.bf16.msra.mxu0 %v8264_v0 }
 0xc95   :  { %7350 = vmatprep.subr.bf16.mxu0 %v9333_v40 }
 0xc98   :  { %7352 = vmatpush3.bf16.msra.mxu0 %v8278_v10 }
 0xc99   :  { %7353 = vmatprep.subr.bf16.mxu0 %v9333_v40 }
 0xc9c   :  { %7355 = vmatpush3.bf16.msra.mxu0 %v8305_v23 }
 0xc9d   :  { %7356 = vmatprep.subr.bf16.mxu0 %v9333_v40 }
 0xca0   :  { %7358 = vmatpush3.bf16.msra.mxu0 %v8330_v43 }
 0xca1   :  { %7359 = vmatprep.subr.bf16.mxu0 %v9333_v40 }
 0xca4   :  { %7361 = vmatpush3.bf16.msra.mxu0 %v8340_v47 }
 0xca5   :  { %7362 = vmatprep.subr.bf16.mxu0 %v9333_v40 }
 0xca8   :  { %7364 = vmatpush3.bf16.msra.mxu0 %v8349_v53 }
 0xca9   :  { %7389 = vmatprep.subr.bf16.mxu0 %v9333_v40 }
 0xd5e   :  { %v1726_v60 = vpop.f32.mrb[28].mxu0 }
 0xd5f   :  { %v1727_v27 = vadd.f32 %v1726_v60, %v8312_v24  ;;  %v6413_v3 = vpop.f32.mrb[29].mxu0 }
 0xd61   :  { %v1731_v55 = vmul.f32 %v1730_v21, %v1727_v27 }
 0xd63   :  { %v8625_v49 = vadd.f32 %v1731_v55, %v1578_v19  ;;  %v270_v55 = vadd.f32 %v8293_v18, %v8261_v63 }
 0xd65   :  { %6434 = vmatmul.mubr.msk.f32.vlgmr.msra.gmra.mrb[14].mxu1 %vm292_vm1, %v8625_v49 }
 0xd66   :  { %7367 = vmatpush3.bf16.msra.mxu1 %v8370_v29  ;;  %6479 = vmatprep.mubr.msk.f32.mxu1 %vm7979_vm0, %v7980_v6 }
 0xd67   :  { %7368 = vmatprep.subr.bf16.mxu1 %v9333_v40 }
 0xd6a   :  { %7370 = vmatpush3.bf16.msra.mxu1 %v8376_v31 }
 0xd6b   :  { %7371 = vmatprep.subr.bf16.mxu1 %v9333_v40 }
 0xe38   :  { %v1875_v39 = vpop.f32.mrb[14].mxu1 }
 0xe39   :  { %v1879_v19 = vadd.f32 %v1875_v39, %v268_v41  ;;  %v6435_v50 = vpop.f32.mrb[15].mxu1 }
 0xe3b   :  { %7847 = vtanh.f32 %v1879_v19 }
 0xe45   :  { %v7848_v35 = vpop.eup %7847 }
 0xe46   :  { %6469 = vmatmul.mubr.f32.vlgmr.msra.gmra.mrb[30].mxu0 %v7848_v35 }
 0xe47   :  { %7391 = vmatpush3.bf16.msra.mxu0 %v8053_v4  ;;  %6520 = vmatprep.mubr.msk.f32.mxu0 %vm7979_vm0, %v7980_v6 }
 0xe48   :  { %7392 = vmatprep.subr.bf16.mxu0 %v9333_v40 }
 0xe4b   :  { %7394 = vmatpush3.bf16.msra.mxu0 %v8062_v7 }
 0xe4c   :  { %7395 = vmatprep.subr.bf16.mxu0 %v9333_v40 }
 0xf19   :  { %v1947_v2 = vpop.f32.mrb[30].mxu0 }
 0xf1a   :  { %v1948_v17 = vadd.f32 %v1947_v2, %v8384_v32  ;;  %v6470_v44 = vpop.f32.mrb[31].mxu0 }
 0xf1c   :  { %v5626_v37 = vmul.f32 -1.442695, %v1948_v17 }
 0xf1e   :  { %7849 = vpow2.f32 %v5626_v37 }
 0xf28   :  { %v7850_v56 = vpop.eup %7849 }
 0xf29   :  { %v1954_v20 = vadd.f32 1.0, %v7850_v56 }
 0xf2b   :  { %7851 = vrcp.f32 %v1954_v20 }
 0xf35   :  { %v7852_v30 = vpop.eup %7851 }
 0xf36   :  { %1958 = vrot.lane.b32.xlu1 %v7852_v30, %s7981_s27  ;;  %v2185_v17 = vsub.f32 1.0, %v7852_v30 }
 0xf3a   :  { %75 = vrot.lane.b32.xlu1 %v8140_v26, %s7982_s28 }
 0xfa8   :  { %v1959_v60 = vpop.permute.xlu1 %1958 }
 0xfa9   :  { %v1962_v21 = vmul.f32 %v1959_v60, %v8594_v46  ;;  %v1961_v26 = vmul.f32 %v1959_v60, %v8625_v49  ;;  %v2187_v60 = vmul.f32 %v7852_v30, %v8625_v49 }
 0xfab   :  { %6480 = vmatmul.mubr.msk.f32.vlgmr.msra.gmra.mrb[16].mxu1 %vm292_vm1, %v1962_v21 }
 0xfac   :  { %7373 = vmatpush3.bf16.msra.mxu1 %v8399_v61  ;;  %v76_v27 = vpop.permute.xlu1 %75  ;;  %6490 = vmatprep.mubr.msk.f32.mxu1 %vm7979_vm0, %v7980_v6 }
 0xfad   :  { %7374 = vmatprep.subr.bf16.mxu1 %v9333_v40  ;;  %v105_v3 = vsel %vm89_vm3, %v76_v27, 0.0 }
 0xfae   :  { %106 = vadd.xlane.f32.xlu1 %v105_v3 }
 0xfb0   :  { %7376 = vmatpush3.bf16.msra.mxu1 %v8410_v22 }
 0xfb1   :  { %7377 = vmatprep.subr.bf16.mxu1 %v9333_v40 }
 0xfb3   :  { %6491 = vmatmul.mubr.msk.f32.vlgmr.msra.gmra.mrb[16].mxu1 %vm292_vm1, %v1961_v26 }
 0xfb4   :  { %7379 = vmatpush3.bf16.msra.mxu1 %v8432_v36  ;;  %6509 = vmatprep.mubr.msk.f32.mxu1 %vm7979_vm0, %v7980_v6 }
 0xfb5   :  { %7380 = vmatprep.subr.bf16.mxu1 %v9333_v40 }
 0xfb8   :  { %7382 = vmatpush3.bf16.msra.mxu1 %v8442_v8 }
 0xfb9   :  { %7383 = vmatprep.subr.bf16.mxu1 %v9333_v40 }
 0xfbc   :  { %7385 = vmatpush3.bf16.msra.mxu1 %v8452_v54 }
 0xfbd   :  { %7386 = vmatprep.subr.bf16.mxu1 %v9333_v40 }
 0xfbf   :  { %73 = vrot.lane.b32.xlu1 %v8132_v25, %s7982_s28 }
 0xfc0   :  { %7388 = vmatpush3.bf16.msra.mxu1 %v8461_v5 }
 0xfc1   :  { %7401 = vmatprep.subr.bf16.mxu1 %v9333_v40 }
0x103b   :  { %v107_v25 = vpop.xlane.xlu1 %106 }
0x103c   :  { %vm119_vm7 = vcmp.gt.f32.partialorder %v107_v25, 0.0 }
0x103d   :  { %v5593_v18 = vsel %vm119_vm7, 1.0, %v7980_v6 }
0x103e   :  { %v2197_v37 = vsub.f32 1.0, %v5593_v18 }
0x1040   :  { %v2198_v27 = vmul.f32 %v2197_v37, %v8625_v49 }
0x1086   :  { %v2105_v41 = vpop.f32.mrb[16].mxu1 }
0x1087   :  { %v2109_v39 = vadd.f32 %v2105_v41, %v270_v55  ;;  %v6492_v19 = vpop.f32.mrb[17].mxu1 }
0x1088   :  { %v2201_v19 = vmul.f32 %v2197_v37, %v8594_v46 }
0x1089   :  { %7853 = vtanh.f32 %v2109_v39  ;;  %v2194_v39 = vmul.f32 %v7852_v30, %v8594_v46 }
0x1093   :  { %v7854_v50 = vpop.eup %7853 }
0x1094   :  { %6510 = vmatmul.mubr.msk.f32.vlgmr.msra.gmra.mrb[18].mxu1 %vm868_vm4, %v7854_v50 }
0x1095   :  { %7403 = vmatpush3.bf16.msra.mxu1 %v8165_v34  ;;  %6542 = vmatprep.mubr.msk.f32.mxu1 %vm7979_vm0, %v7980_v6 }
0x1096   :  { %7404 = vmatprep.subr.bf16.mxu1 %v9333_v40 }
0x1099   :  { %7406 = vmatpush3.bf16.msra.mxu1 %v8175_v38 }
0x109a   :  { %7407 = vmatprep.subr.bf16.mxu1 %v9333_v40 }
0x1167   :  { %v2180_v35 = vpop.f32.mrb[18].mxu1 }
0x1168   :  { %v2181_v2 = vadd.f32 %v2180_v35, %v8478_v33  ;;  %v6511_v44 = vpop.f32.mrb[19].mxu1 }
0x116a   :  { %v2184_v56 = vand.u32 2147483647, %v2181_v2  ;;  %v2186_v20 = vmul.f32 %v2185_v17, %v2181_v2  ;;  %v2351_v2 = vstv %s5630_s13 }
0x116c   :  { %v2188_v21 = vadd.f32 %v2187_v60, %v2186_v20  ;;  %2190 = vrot.lane.b32.xlu0 %v2184_v56, %s7981_s27 }
0x116e   :  { %v2196_v3 = vmul.f32 %v5593_v18, %v2188_v21 }
0x1170   :  { %v2199_v26 = vadd.f32 %v2198_v27, %v2196_v3 }
0x1172   :  { %6521 = vmatmul.mubr.msk.f32.vlgmr.msra.gmra.mrb[32].mxu0 %vm292_vm1, %v2199_v26 }
0x1173   :  { %7397 = vmatpush3.bf16.msra.mxu0 %v8085_v12  ;;  %6531 = vmatprep.mubr.msk.f32.mxu0 %vm7979_vm0, %v7980_v6 }
0x1174   :  { %7398 = vmatprep.subr.bf16.mxu0 %v9333_v40 }
0x1177   :  { %7400 = vmatpush3.bf16.msra.mxu0 %v8091_v14 }
0x1178   :  { %7413 = vmatprep.subr.bf16.mxu0 %v9333_v40 }
0x11de   :  { %v2191_v55 = vpop.permute.xlu0 %2190 }
0x11df   :  { %v2193_v41 = vmul.f32 %v2191_v55, %v2185_v17 }
0x11e1   :  { %v2195_v49 = vadd.f32 %v2194_v39, %v2193_v41 }
0x11e3   :  { %v2200_v50 = vmul.f32 %v5593_v18, %v2195_v49 }
0x11e5   :  { %v8693_v25 = vadd.f32 %v2201_v19, %v2200_v50  ;;  %v74_v19 = vpop.permute.xlu1 %73 }
0x11e6   :  { %v102_v50 = vsel %vm89_vm3, %v74_v19, 0.0 }
0x11e7   :  { %6543 = vmatmul.mubr.msk.f32.vlgmr.msra.gmra.mrb[20].mxu1 %vm292_vm1, %v8693_v25 }
0x11e8   :  { %7409 = vmatpush3.bf16.msra.mxu1 %v8192_v42  ;;  %6553 = vmatprep.mubr.msk.f32.mxu1 %vm7979_vm0, %v7980_v6 }
0x11e9   :  { %7410 = vmatprep.subr.bf16.mxu1 %v9333_v40 }
0x11ec   :  { %7412 = vmatpush3.bf16.msra.mxu1 %v8207_v45 }
0x11ed   :  { %7437 = vmatprep.subr.bf16.mxu1 %v9333_v40 }
0x1245   :  { %v2273_v30 = vpop.f32.mrb[32].mxu0 }
0x1246   :  { %v2274_v46 = vadd.f32 %v2273_v30, %v8156_v28  ;;  %v6522_v18 = vpop.f32.mrb[33].mxu0 }
0x1247   :  { %v264_v18 = vadd.f32 %v8289_v16, %v8261_v63 }
0x1248   :  { %7855 = vtanh.f32 %v2274_v46 }
0x1252   :  { %v7856_v35 = vpop.eup %7855 }
0x1253   :  { %6532 = vmatmul.mubr.msk.f32.vlgmr.msra.gmra.mrb[34].mxu0 %vm292_vm1, %v7856_v35 }
0x1254   :  { %7415 = vmatpush3.bf16.msra.mxu0 %v8230_v52  ;;  %6588 = vmatprep.mubr.msk.f32.mxu0 %vm7979_vm0, %v7980_v6 }
0x1255   :  { %7416 = vmatprep.subr.bf16.mxu0 %v9333_v40 }
0x1258   :  { %7418 = vmatpush3.bf16.msra.mxu0 %v8246_v57 }
0x1259   :  { %7419 = vmatprep.subr.bf16.mxu0 %v9333_v40 }
0x125c   :  { %7421 = vmatpush3.bf16.msra.mxu0 %v8264_v0 }
0x125d   :  { %7422 = vmatprep.subr.bf16.mxu0 %v9333_v40 }
0x1260   :  { %7424 = vmatpush3.bf16.msra.mxu0 %v8278_v10 }
0x1261   :  { %7425 = vmatprep.subr.bf16.mxu0 %v9333_v40 }
0x1264   :  { %7427 = vmatpush3.bf16.msra.mxu0 %v8305_v23 }
0x1265   :  { %7428 = vmatprep.subr.bf16.mxu0 %v9333_v40 }
0x1268   :  { %7430 = vmatpush3.bf16.msra.mxu0 %v8330_v43 }
0x1269   :  { %7431 = vmatprep.subr.bf16.mxu0 %v9333_v40 }
0x126c   :  { %7433 = vmatpush3.bf16.msra.mxu0 %v8340_v47 }
0x126d   :  { %7434 = vmatprep.subr.bf16.mxu0 %v9333_v40 }
0x1270   :  { %7436 = vmatpush3.bf16.msra.mxu0 %v8349_v53 }
0x1271   :  { %7461 = vmatprep.subr.bf16.mxu0 %v9333_v40 }
0x1326   :  { %v2347_v28 = vpop.f32.mrb[34].mxu0 }
0x1327   :  { %v2348_v17 = vadd.f32 %v2347_v28, %v8312_v24  ;;  %v6533_v44 = vpop.f32.mrb[35].mxu0  ;;  %v262_v24 = vadd.f32 %v8286_v15, %v8356_v58 }
0x1329   :  { %v2352_v37 = vmul.f32 %v2351_v2, %v2348_v17 }
0x132b   :  { %v8724_v56 = vadd.f32 %v2352_v37, %v2199_v26 }
0x132d   :  { %6554 = vmatmul.mubr.msk.f32.vlgmr.msra.gmra.mrb[20].mxu1 %vm292_vm1, %v8724_v56 }
0x132e   :  { %7439 = vmatpush3.bf16.msra.mxu1 %v8370_v29  ;;  %6599 = vmatprep.mubr.msk.f32.mxu1 %vm7979_vm0, %v7980_v6 }
0x132f   :  { %7440 = vmatprep.subr.bf16.mxu1 %v9333_v40 }
0x1332   :  { %7442 = vmatpush3.bf16.msra.mxu1 %v8376_v31 }
0x1333   :  { %7443 = vmatprep.subr.bf16.mxu1 %v9333_v40 }
0x1400   :  { %v2496_v20 = vpop.f32.mrb[20].mxu1 }
0x1401   :  { %v2500_v60 = vadd.f32 %v2496_v20, %v262_v24  ;;  %v6555_v21 = vpop.f32.mrb[21].mxu1 }
0x1403   :  { %7857 = vtanh.f32 %v2500_v60 }
0x140d   :  { %v7858_v27 = vpop.eup %7857 }
0x140e   :  { %6589 = vmatmul.mubr.f32.vlgmr.msra.gmra.mrb[36].mxu0 %v7858_v27 }
0x140f   :  { %7463 = vmatpush3.bf16.msra.mxu0 %v8053_v4  ;;  %6640 = vmatprep.mubr.msk.f32.mxu0 %vm7979_vm0, %v7980_v6 }
0x1410   :  { %7464 = vmatprep.subr.bf16.mxu0 %v9333_v40 }
0x1413   :  { %7466 = vmatpush3.bf16.msra.mxu0 %v8062_v7 }
0x1414   :  { %7467 = vmatprep.subr.bf16.mxu0 %v9333_v40 }
0x14e1   :  { %v2568_v3 = vpop.f32.mrb[36].mxu0 }
0x14e2   :  { %v2569_v15 = vadd.f32 %v2568_v3, %v8384_v32  ;;  %v6590_v26 = vpop.f32.mrb[37].mxu0 }
0x14e4   :  { %v5635_v55 = vmul.f32 -1.442695, %v2569_v15 }
0x14e6   :  { %7859 = vpow2.f32 %v5635_v55 }
0x14f0   :  { %v7860_v41 = vpop.eup %7859 }
0x14f1   :  { %v2575_v39 = vadd.f32 1.0, %v7860_v41 }
0x14f3   :  { %7861 = vrcp.f32 %v2575_v39 }
0x14fd   :  { %v7862_v49 = vpop.eup %7861 }
0x14fe   :  { %2579 = vrot.lane.b32.xlu0 %v7862_v49, %s7981_s27  ;;  %v2806_v20 = vsub.f32 1.0, %v7862_v49  ;;  %v2808_v15 = vmul.f32 %v7862_v49, %v8724_v56 }
0x151d   :  { %103 = vadd.xlane.f32.xlu0 %v102_v50  ;;  %v2815_v50 = vmul.f32 %v7862_v49, %v8693_v25 }
0x1570   :  { %v2580_v30 = vpop.permute.xlu0 %2579 }
0x1571   :  { %v2583_v46 = vmul.f32 %v2580_v30, %v8693_v25  ;;  %v2582_v32 = vmul.f32 %v2580_v30, %v8724_v56 }
0x1573   :  { %6600 = vmatmul.mubr.msk.f32.vlgmr.msra.gmra.mrb[22].mxu1 %vm292_vm1, %v2583_v46 }
0x1574   :  { %7445 = vmatpush3.bf16.msra.mxu1 %v8399_v61  ;;  %6610 = vmatprep.mubr.msk.f32.mxu1 %vm7979_vm0, %v7980_v6 }
0x1575   :  { %7446 = vmatprep.subr.bf16.mxu1 %v9333_v40 }
0x1578   :  { %7448 = vmatpush3.bf16.msra.mxu1 %v8410_v22 }
0x1579   :  { %7449 = vmatprep.subr.bf16.mxu1 %v9333_v40 }
0x157b   :  { %6611 = vmatmul.mubr.msk.f32.vlgmr.msra.gmra.mrb[22].mxu1 %vm292_vm1, %v2582_v32 }
0x157c   :  { %7451 = vmatpush3.bf16.msra.mxu1 %v8432_v36  ;;  %6629 = vmatprep.mubr.msk.f32.mxu1 %vm7979_vm0, %v7980_v6 }
0x157d   :  { %7452 = vmatprep.subr.bf16.mxu1 %v9333_v40 }
0x1580   :  { %7454 = vmatpush3.bf16.msra.mxu1 %v8442_v8 }
0x1581   :  { %7455 = vmatprep.subr.bf16.mxu1 %v9333_v40 }
0x1584   :  { %7457 = vmatpush3.bf16.msra.mxu1 %v8452_v54 }
0x1585   :  { %7458 = vmatprep.subr.bf16.mxu1 %v9333_v40 }
0x1588   :  { %7460 = vmatpush3.bf16.msra.mxu1 %v8461_v5 }
0x1589   :  { %7473 = vmatprep.subr.bf16.mxu1 %v9333_v40 }
0x15aa   :  { %v104_v44 = vpop.xlane.xlu0 %103 }
0x15ab   :  { %vm118_vm8 = vcmp.gt.f32.partialorder %v104_v44, 0.0  ;;  %v8826_v44 = vld [vmem:[%s9328_s8 + $0x2] ss:$0 sm:$0xff] }
0x15ac   :  { %v5592_v16 = vsel %vm118_vm8, 1.0, %v7980_v6 }
0x15ad   :  { %v2818_v21 = vsub.f32 1.0, %v5592_v16 }
0x15af   :  { %v2819_v55 = vmul.f32 %v2818_v21, %v8724_v56  ;;  %v2822_v30 = vmul.f32 %v2818_v21, %v8693_v25  ;;  %v8801_v25 = vld [vmem:[%s9328_s8 + $0x1] ss:$0 sm:$0xff] }
0x164e   :  { %v2726_v35 = vpop.f32.mrb[22].mxu1 }
0x164f   :  { %v2730_v28 = vadd.f32 %v2726_v35, %v264_v18  ;;  %v6612_v2 = vpop.f32.mrb[23].mxu1 }
0x1651   :  { %7863 = vtanh.f32 %v2730_v28 }
0x165b   :  { %v7864_v17 = vpop.eup %7863 }
0x165c   :  { %6630 = vmatmul.mubr.msk.f32.vlgmr.msra.gmra.mrb[24].mxu1 %vm868_vm4, %v7864_v17  ;;  %v2972_v17 = vstv %s5639_s16 }
0x165d   :  { %7475 = vmatpush3.bf16.msra.mxu1 %v8165_v34  ;;  %6662 = vmatprep.mubr.msk.f32.mxu1 %vm7979_vm0, %v7980_v6 }
0x165e   :  { %7476 = vmatprep.subr.bf16.mxu1 %v9333_v40 }
0x1661   :  { %7478 = vmatpush3.bf16.msra.mxu1 %v8175_v38 }
0x1662   :  { %7479 = vmatprep.subr.bf16.mxu1 %v9333_v40 }
0x172f   :  { %v2801_v37 = vpop.f32.mrb[24].mxu1 }
0x1730   :  { %v2802_v24 = vadd.f32 %v2801_v37, %v8478_v33  ;;  %v6631_v60 = vpop.f32.mrb[25].mxu1 }
0x1731   :  { %v256_v60 = vadd.f32 %v8280_v11, %v8356_v58  ;;  %v8850_v11 = vld [vmem:[%s9328_s8 + $0x3] ss:$0 sm:$0xff] }
0x1732   :  { %v2805_v27 = vand.u32 2147483647, %v2802_v24  ;;  %v2807_v3 = vmul.f32 %v2806_v20, %v2802_v24 }
0x1734   :  { %v2809_v26 = vadd.f32 %v2808_v15, %v2807_v3  ;;  %2811 = vrot.lane.b32.xlu1 %v2805_v27, %s7981_s27 }
0x1736   :  { %v2817_v41 = vmul.f32 %v5592_v16, %v2809_v26 }
0x1738   :  { %v2820_v39 = vadd.f32 %v2819_v55, %v2817_v41 }
0x173a   :  { %6641 = vmatmul.mubr.msk.f32.vlgmr.msra.gmra.mrb[38].mxu0 %vm292_vm1, %v2820_v39 }
0x173b   :  { %7469 = vmatpush3.bf16.msra.mxu0 %v8085_v12  ;;  %6651 = vmatprep.mubr.msk.f32.mxu0 %vm7979_vm0, %v7980_v6 }
0x173c   :  { %7470 = vmatprep.subr.bf16.mxu0 %v9333_v40 }
0x173f   :  { %7472 = vmatpush3.bf16.msra.mxu0 %v8091_v14 }
0x1740   :  { %7485 = vmatprep.subr.bf16.mxu0 %v9333_v40 }
0x17a6   :  { %v2812_v33 = vpop.permute.xlu1 %2811 }
0x17a7   :  { %v2814_v19 = vmul.f32 %v2812_v33, %v2806_v20 }
0x17a9   :  { %v2816_v56 = vadd.f32 %v2815_v50, %v2814_v19 }
0x17ab   :  { %v2821_v46 = vmul.f32 %v5592_v16, %v2816_v56  ;;  %v7910_v56 = vld [vmem:[%s9321_s1 + $0x18] sm:$0xff] }
0x17ad   :  { %v8788_v32 = vadd.f32 %v2822_v30, %v2821_v46 }
0x17af   :  { %6663 = vmatmul.mubr.msk.f32.vlgmr.msra.gmra.mrb[26].mxu1 %vm292_vm1, %v8788_v32 }
0x17b0   :  { %7481 = vmatpush3.bf16.msra.mxu1 %v8192_v42  ;;  %6673 = vmatprep.mubr.msk.f32.mxu1 %vm7979_vm0, %v7980_v6 }
0x17b1   :  { %7482 = vmatprep.subr.bf16.mxu1 %v9333_v40 }
0x17b4   :  { %7484 = vmatpush3.bf16.msra.mxu1 %v8207_v45 }
0x17b5   :  { %7509 = vmatprep.subr.bf16.mxu1 %v9333_v40 }
0x180d   :  { %v2894_v49 = vpop.f32.mrb[38].mxu0 }
0x180e   :  { %v2895_v18 = vadd.f32 %v8801_v25, %v2894_v49  ;;  %v6642_v35 = vpop.f32.mrb[39].mxu0 }
0x1810   :  { %7865 = vtanh.f32 %v2895_v18 }
0x181a   :  { %v7866_v28 = vpop.eup %7865 }
0x181b   :  { %6652 = vmatmul.mubr.msk.f32.vlgmr.msra.gmra.mrb[40].mxu0 %vm292_vm1, %v7866_v28  ;;  %v258_v28 = vadd.f32 %v8283_v13, %v8261_v63 }
0x181c   :  { %7487 = vmatpush3.bf16.msra.mxu0 %v8230_v52  ;;  %6708 = vmatprep.mubr.msk.f32.mxu0 %vm7979_vm0, %v7980_v6 }
0x181d   :  { %7488 = vmatprep.subr.bf16.mxu0 %v9333_v40 }
0x1820   :  { %7490 = vmatpush3.bf16.msra.mxu0 %v8246_v57 }
0x1821   :  { %7491 = vmatprep.subr.bf16.mxu0 %v9333_v40 }
0x1824   :  { %7493 = vmatpush3.bf16.msra.mxu0 %v8264_v0 }
0x1825   :  { %7494 = vmatprep.subr.bf16.mxu0 %v9333_v40 }
0x1828   :  { %7496 = vmatpush3.bf16.msra.mxu0 %v8278_v10 }
0x1829   :  { %7497 = vmatprep.subr.bf16.mxu0 %v9333_v40 }
0x182c   :  { %7499 = vmatpush3.bf16.msra.mxu0 %v8305_v23 }
0x182d   :  { %7500 = vmatprep.subr.bf16.mxu0 %v9333_v40 }
0x1830   :  { %7502 = vmatpush3.bf16.msra.mxu0 %v8330_v43 }
0x1831   :  { %7503 = vmatprep.subr.bf16.mxu0 %v9333_v40 }
0x1834   :  { %7505 = vmatpush3.bf16.msra.mxu0 %v8340_v47 }
0x1835   :  { %7506 = vmatprep.subr.bf16.mxu0 %v9333_v40 }
0x1838   :  { %7508 = vmatpush3.bf16.msra.mxu0 %v8349_v53 }
0x1839   :  { %7533 = vmatprep.subr.bf16.mxu0 %v9333_v40 }
0x18ee   :  { %v2968_v2 = vpop.f32.mrb[40].mxu0 }
0x18ef   :  { %v2969_v16 = vadd.f32 %v8826_v44, %v2968_v2  ;;  %v6653_v37 = vpop.f32.mrb[41].mxu0 }
0x18f1   :  { %v2973_v24 = vmul.f32 %v2972_v17, %v2969_v16 }
0x18f3   :  { %v8829_v20 = vadd.f32 %v2973_v24, %v2820_v39 }
0x18f5   :  { %6674 = vmatmul.mubr.msk.f32.vlgmr.msra.gmra.mrb[26].mxu1 %vm292_vm1, %v8829_v20 }
0x18f6   :  { %7511 = vmatpush3.bf16.msra.mxu1 %v8370_v29  ;;  %6719 = vmatprep.mubr.msk.f32.mxu1 %vm7979_vm0, %v7980_v6 }
0x18f7   :  { %7512 = vmatprep.subr.bf16.mxu1 %v9333_v40 }
0x18fa   :  { %7514 = vmatpush3.bf16.msra.mxu1 %v8376_v31 }
0x18fb   :  { %7515 = vmatprep.subr.bf16.mxu1 %v9333_v40 }
0x19c8   :  { %v3117_v21 = vpop.f32.mrb[26].mxu1 }
0x19c9   :  { %v3121_v27 = vadd.f32 %v3117_v21, %v256_v60  ;;  %v6675_v3 = vpop.f32.mrb[27].mxu1  ;;  %v8895_v21 = vld [vmem:[%s9328_s8 + $0x4] ss:$0 sm:$0xff] }
0x19cb   :  { %7867 = vtanh.f32 %v3121_v27 }
0x19d5   :  { %v7868_v15 = vpop.eup %7867 }
0x19d6   :  { %6709 = vmatmul.mubr.f32.vlgmr.msra.gmra.mrb[42].mxu0 %v7868_v15 }
0x19d7   :  { %7535 = vmatpush3.bf16.msra.mxu0 %v8053_v4  ;;  %6760 = vmatprep.mubr.msk.f32.mxu0 %vm7979_vm0, %v7980_v6 }
0x19d8   :  { %7536 = vmatprep.subr.bf16.mxu0 %v9333_v40 }
0x19db   :  { %7538 = vmatpush3.bf16.msra.mxu0 %v8062_v7 }
0x19dc   :  { %7539 = vmatprep.subr.bf16.mxu0 %v9333_v40 }
0x1aa9   :  { %v3189_v26 = vpop.f32.mrb[42].mxu0 }
0x1aaa   :  { %v3190_v55 = vadd.f32 %v8850_v11, %v3189_v26  ;;  %v6710_v41 = vpop.f32.mrb[43].mxu0 }
0x1aac   :  { %v5644_v39 = vmul.f32 -1.442695, %v3190_v55 }
0x1aae   :  { %7869 = vpow2.f32 %v5644_v39 }
0x1ab8   :  { %v7870_v33 = vpop.eup %7869 }
0x1ab9   :  { %v3196_v19 = vadd.f32 1.0, %v7870_v33 }
0x1abb   :  { %7871 = vrcp.f32 %v3196_v19 }
0x1ac5   :  { %v8853_v50 = vpop.eup %7871 }
0x1ac6   :  { %3200 = vrot.lane.b32.xlu1 %v8853_v50, %s7981_s27  ;;  %v3427_v3 = vsub.f32 1.0, %v8853_v50  ;;  %v3429_v39 = vmul.f32 %v8853_v50, %v8829_v20 }
0x1aca   :  { %71 = vrot.lane.b32.xlu1 %v7910_v56, %s7982_s28 }
0x1b38   :  { %v3201_v30 = vpop.permute.xlu1 %3200 }
0x1b39   :  { %v3204_v46 = vmul.f32 %v3201_v30, %v8788_v32  ;;  %v3203_v35 = vmul.f32 %v3201_v30, %v8829_v20 }
0x1b3b   :  { %6720 = vmatmul.mubr.msk.f32.vlgmr.msra.gmra.mrb[28].mxu1 %vm292_vm1, %v3204_v46 }
0x1b3c   :  { %7517 = vmatpush3.bf16.msra.mxu1 %v8399_v61  ;;  %v72_v49 = vpop.permute.xlu1 %71  ;;  %6730 = vmatprep.mubr.msk.f32.mxu1 %vm7979_vm0, %v7980_v6 }
0x1b3d   :  { %7518 = vmatprep.subr.bf16.mxu1 %v9333_v40  ;;  %v99_v18 = vsel %vm89_vm3, %v72_v49, 0.0 }
0x1b3e   :  { %100 = vadd.xlane.f32.xlu1 %v99_v18 }
0x1b40   :  { %7520 = vmatpush3.bf16.msra.mxu1 %v8410_v22 }
0x1b41   :  { %7521 = vmatprep.subr.bf16.mxu1 %v9333_v40 }
0x1b43   :  { %6731 = vmatmul.mubr.msk.f32.vlgmr.msra.gmra.mrb[28].mxu1 %vm292_vm1, %v3203_v35 }
0x1b44   :  { %7523 = vmatpush3.bf16.msra.mxu1 %v8432_v36  ;;  %6749 = vmatprep.mubr.msk.f32.mxu1 %vm7979_vm0, %v7980_v6 }
0x1b45   :  { %7524 = vmatprep.subr.bf16.mxu1 %v9333_v40 }
0x1b48   :  { %7526 = vmatpush3.bf16.msra.mxu1 %v8442_v8 }
0x1b49   :  { %7527 = vmatprep.subr.bf16.mxu1 %v9333_v40 }
0x1b4c   :  { %7529 = vmatpush3.bf16.msra.mxu1 %v8452_v54 }
0x1b4d   :  { %7530 = vmatprep.subr.bf16.mxu1 %v9333_v40 }
0x1b50   :  { %7532 = vmatpush3.bf16.msra.mxu1 %v8461_v5 }
0x1b51   :  { %7545 = vmatprep.subr.bf16.mxu1 %v9333_v40 }
0x1bcb   :  { %v101_v24 = vpop.xlane.xlu1 %100 }
0x1bcc   :  { %vm117_vm9 = vcmp.gt.f32.partialorder %v101_v24, 0.0  ;;  %v3593_v24 = vstv %s5648_s23 }
0x1bcd   :  { %v5591_v13 = vsel %vm117_vm9, 1.0, %v7980_v6 }
0x1bce   :  { %v3439_v26 = vsub.f32 1.0, %v5591_v13 }
0x1bd0   :  { %v3440_v19 = vmul.f32 %v3439_v26, %v8829_v20  ;;  %v3436_v20 = vmul.f32 %v8853_v50, %v8788_v32  ;;  %v3443_v35 = vmul.f32 %v3439_v26, %v8788_v32 }
0x1c16   :  { %v3347_v2 = vpop.f32.mrb[28].mxu1 }
0x1c17   :  { %v3351_v17 = vadd.f32 %v3347_v2, %v258_v28  ;;  %v6732_v16 = vpop.f32.mrb[29].mxu1 }
0x1c19   :  { %7873 = vtanh.f32 %v3351_v17 }
0x1c23   :  { %v7874_v37 = vpop.eup %7873 }
0x1c24   :  { %6750 = vmatmul.mubr.msk.f32.vlgmr.msra.gmra.mrb[30].mxu1 %vm868_vm4, %v7874_v37 }
0x1c25   :  { %7547 = vmatpush3.bf16.msra.mxu1 %v8165_v34  ;;  %6782 = vmatprep.mubr.msk.f32.mxu1 %vm7979_vm0, %v7980_v6 }
0x1c26   :  { %7548 = vmatprep.subr.bf16.mxu1 %v9333_v40 }
0x1c29   :  { %7550 = vmatpush3.bf16.msra.mxu1 %v8175_v38 }
0x1c2a   :  { %7551 = vmatprep.subr.bf16.mxu1 %v9333_v40 }
0x1cf7   :  { %v3422_v60 = vpop.f32.mrb[30].mxu1 }
0x1cf8   :  { %v3423_v27 = vadd.f32 %v8895_v21, %v3422_v60  ;;  %v6751_v15 = vpop.f32.mrb[31].mxu1 }
0x1cf9   :  { %v250_v15 = vadd.f32 %v8266_v1, %v8356_v58 }
0x1cfa   :  { %v3426_v55 = vand.u32 2147483647, %v3423_v27  ;;  %v3428_v41 = vmul.f32 %v3427_v3, %v3423_v27 }
0x1cfc   :  { %v3430_v33 = vadd.f32 %v3429_v39, %v3428_v41  ;;  %3432 = vrot.lane.b32.xlu0 %v3426_v55, %s7981_s27 }
0x1cfe   :  { %v3438_v56 = vmul.f32 %v5591_v13, %v3430_v33 }
0x1d00   :  { %v3441_v30 = vadd.f32 %v3440_v19, %v3438_v56 }
0x1d02   :  { %6761 = vmatmul.mubr.msk.f32.vlgmr.msra.gmra.mrb[44].mxu0 %vm292_vm1, %v3441_v30 }
0x1d03   :  { %7541 = vmatpush3.bf16.msra.mxu0 %v8085_v12  ;;  %6771 = vmatprep.mubr.msk.f32.mxu0 %vm7979_vm0, %v7980_v6 }
0x1d04   :  { %7542 = vmatprep.subr.bf16.mxu0 %v9333_v40 }
0x1d07   :  { %7544 = vmatpush3.bf16.msra.mxu0 %v8091_v14 }
0x1d08   :  { %7557 = vmatprep.subr.bf16.mxu0 %v9333_v40 }
0x1d6e   :  { %v3433_v46 = vpop.permute.xlu0 %3432 }
0x1d6f   :  { %v3435_v49 = vmul.f32 %v3433_v46, %v3427_v3 }
0x1d71   :  { %v3437_v18 = vadd.f32 %v3436_v20, %v3435_v49  ;;  %v7912_v20 = vld [vmem:[%s9321_s1 + $0x10] sm:$0xff] }
0x1d73   :  { %v3442_v28 = vmul.f32 %v5591_v13, %v3437_v18 }
0x1d75   :  { %v8913_v2 = vadd.f32 %v3443_v35, %v3442_v28 }
0x1d77   :  { %6783 = vmatmul.mubr.msk.f32.vlgmr.msra.gmra.mrb[32].mxu1 %vm292_vm1, %v8913_v2 }
0x1d78   :  { %7553 = vmatpush3.bf16.msra.mxu1 %v8192_v42  ;;  %6793 = vmatprep.mubr.msk.f32.mxu1 %vm7979_vm0, %v7980_v6 }
0x1d79   :  { %7554 = vmatprep.subr.bf16.mxu1 %v9333_v40 }
0x1d7c   :  { %7556 = vmatpush3.bf16.msra.mxu1 %v8207_v45 }
0x1d7d   :  { %7581 = vmatprep.subr.bf16.mxu1 %v9333_v40 }
0x1dd5   :  { %v3515_v50 = vpop.f32.mrb[44].mxu0 }
0x1dd6   :  { %v3516_v32 = vadd.f32 %v8801_v25, %v3515_v50  ;;  %v6762_v17 = vpop.f32.mrb[45].mxu0 }
0x1dd7   :  { %v252_v17 = vadd.f32 %v8275_v9, %v8261_v63 }
0x1dd8   :  { %7875 = vtanh.f32 %v3516_v32 }
0x1de2   :  { %v7876_v16 = vpop.eup %7875 }
0x1de3   :  { %6772 = vmatmul.mubr.msk.f32.vlgmr.msra.gmra.mrb[46].mxu0 %vm292_vm1, %v7876_v16 }
0x1de4   :  { %7559 = vmatpush3.bf16.msra.mxu0 %v8230_v52  ;;  %6828 = vmatprep.mubr.msk.f32.mxu0 %vm7979_vm0, %v7980_v6 }
0x1de5   :  { %7560 = vmatprep.subr.bf16.mxu0 %v9333_v40 }
0x1de8   :  { %7562 = vmatpush3.bf16.msra.mxu0 %v8246_v57 }
0x1de9   :  { %7563 = vmatprep.subr.bf16.mxu0 %v9333_v40 }
0x1dec   :  { %7565 = vmatpush3.bf16.msra.mxu0 %v8264_v0 }
0x1ded   :  { %7566 = vmatprep.subr.bf16.mxu0 %v9333_v40 }
0x1df0   :  { %7568 = vmatpush3.bf16.msra.mxu0 %v8278_v10 }
0x1df1   :  { %7569 = vmatprep.subr.bf16.mxu0 %v9333_v40 }
0x1df4   :  { %7571 = vmatpush3.bf16.msra.mxu0 %v8305_v23 }
0x1df5   :  { %7572 = vmatprep.subr.bf16.mxu0 %v9333_v40 }
0x1df8   :  { %7574 = vmatpush3.bf16.msra.mxu0 %v8330_v43 }
0x1df9   :  { %7575 = vmatprep.subr.bf16.mxu0 %v9333_v40 }
0x1dfc   :  { %7577 = vmatpush3.bf16.msra.mxu0 %v8340_v47 }
0x1dfd   :  { %7578 = vmatprep.subr.bf16.mxu0 %v9333_v40 }
0x1e00   :  { %7580 = vmatpush3.bf16.msra.mxu0 %v8349_v53 }
0x1e01   :  { %7605 = vmatprep.subr.bf16.mxu0 %v9333_v40 }
0x1eb6   :  { %v3589_v37 = vpop.f32.mrb[46].mxu0 }
0x1eb7   :  { %v3590_v13 = vadd.f32 %v8826_v44, %v3589_v37  ;;  %v6773_v60 = vpop.f32.mrb[47].mxu0 }
0x1eb9   :  { %v3594_v27 = vmul.f32 %v3593_v24, %v3590_v13 }
0x1ebb   :  { %v8944_v3 = vadd.f32 %v3594_v27, %v3441_v30 }
0x1ebd   :  { %6794 = vmatmul.mubr.msk.f32.vlgmr.msra.gmra.mrb[32].mxu1 %vm292_vm1, %v8944_v3 }
0x1ebe   :  { %7583 = vmatpush3.bf16.msra.mxu1 %v8370_v29  ;;  %6839 = vmatprep.mubr.msk.f32.mxu1 %vm7979_vm0, %v7980_v6 }
0x1ebf   :  { %7584 = vmatprep.subr.bf16.mxu1 %v9333_v40 }
0x1ec2   :  { %7586 = vmatpush3.bf16.msra.mxu1 %v8376_v31 }
0x1ec3   :  { %7587 = vmatprep.subr.bf16.mxu1 %v9333_v40 }
0x1f90   :  { %v3738_v26 = vpop.f32.mrb[32].mxu1 }
0x1f91   :  { %v3742_v55 = vadd.f32 %v3738_v26, %v250_v15  ;;  %v6795_v41 = vpop.f32.mrb[33].mxu1 }
0x1f93   :  { %7877 = vtanh.f32 %v3742_v55 }
0x1f9d   :  { %v7878_v39 = vpop.eup %7877 }
0x1f9e   :  { %6829 = vmatmul.mubr.f32.vlgmr.msra.gmra.mrb[48].mxu0 %v7878_v39 }
0x1f9f   :  { %7607 = vmatpush3.bf16.msra.mxu0 %v8053_v4  ;;  %6880 = vmatprep.mubr.msk.f32.mxu0 %vm7979_vm0, %v7980_v6 }
0x1fa0   :  { %7608 = vmatprep.subr.bf16.mxu0 %v9333_v40 }
0x1fa3   :  { %7610 = vmatpush3.bf16.msra.mxu0 %v8062_v7 }
0x1fa4   :  { %7611 = vmatprep.subr.bf16.mxu0 %v9333_v40 }
0x2071   :  { %v3810_v33 = vpop.f32.mrb[48].mxu0 }
0x2072   :  { %v3811_v1 = vadd.f32 %v8850_v11, %v3810_v33  ;;  %v6830_v19 = vpop.f32.mrb[49].mxu0 }
0x2074   :  { %v5653_v56 = vmul.f32 -1.442695, %v3811_v1 }
0x2076   :  { %7879 = vpow2.f32 %v5653_v56 }
0x2080   :  { %v7880_v30 = vpop.eup %7879 }
0x2081   :  { %v3817_v46 = vadd.f32 1.0, %v7880_v30 }
0x2083   :  { %7881 = vrcp.f32 %v3817_v46 }
0x208d   :  { %v7882_v49 = vpop.eup %7881 }
0x208e   :  { %3821 = vrot.lane.b32.xlu0 %v7882_v49, %s7981_s27  ;;  %v4048_v26 = vsub.f32 1.0, %v7882_v49  ;;  %v4050_v1 = vmul.f32 %v7882_v49, %v8944_v3 }
0x2092   :  { %69 = vrot.lane.b32.xlu0 %v7912_v20, %s7982_s28 }
0x2100   :  { %v3822_v18 = vpop.permute.xlu0 %3821 }
0x2101   :  { %v3825_v35 = vmul.f32 %v3822_v18, %v8913_v2  ;;  %v3824_v32 = vmul.f32 %v3822_v18, %v8944_v3 }
0x2103   :  { %6840 = vmatmul.mubr.msk.f32.vlgmr.msra.gmra.mrb[34].mxu1 %vm292_vm1, %v3825_v35  ;;  %v4057_v35 = vmul.f32 %v7882_v49, %v8913_v2 }
0x2104   :  { %7589 = vmatpush3.bf16.msra.mxu1 %v8399_v61  ;;  %v70_v28 = vpop.permute.xlu0 %69  ;;  %6850 = vmatprep.mubr.msk.f32.mxu1 %vm7979_vm0, %v7980_v6 }
0x2105   :  { %7590 = vmatprep.subr.bf16.mxu1 %v9333_v40  ;;  %v96_v50 = vsel %vm89_vm3, %v70_v28, 0.0 }
0x2106   :  { %97 = vadd.xlane.f32.xlu0 %v96_v50 }
0x2108   :  { %7592 = vmatpush3.bf16.msra.mxu1 %v8410_v22 }
0x2109   :  { %7593 = vmatprep.subr.bf16.mxu1 %v9333_v40 }
0x210b   :  { %6851 = vmatmul.mubr.msk.f32.vlgmr.msra.gmra.mrb[34].mxu1 %vm292_vm1, %v3824_v32 }
0x210c   :  { %7595 = vmatpush3.bf16.msra.mxu1 %v8432_v36  ;;  %6869 = vmatprep.mubr.msk.f32.mxu1 %vm7979_vm0, %v7980_v6 }
0x210d   :  { %7596 = vmatprep.subr.bf16.mxu1 %v9333_v40 }
0x2110   :  { %7598 = vmatpush3.bf16.msra.mxu1 %v8442_v8 }
0x2111   :  { %7599 = vmatprep.subr.bf16.mxu1 %v9333_v40 }
0x2114   :  { %7601 = vmatpush3.bf16.msra.mxu1 %v8452_v54 }
0x2115   :  { %7602 = vmatprep.subr.bf16.mxu1 %v9333_v40 }
0x2118   :  { %7604 = vmatpush3.bf16.msra.mxu1 %v8461_v5 }
0x2119   :  { %7617 = vmatprep.subr.bf16.mxu1 %v9333_v40 }
0x2193   :  { %v98_v60 = vpop.xlane.xlu0 %97 }
0x2194   :  { %vm116_vm10 = vcmp.gt.f32.partialorder %v98_v60, 0.0 }
0x2195   :  { %v5590_v9 = vsel %vm116_vm10, 1.0, %v7980_v6 }
0x2196   :  { %v4060_v41 = vsub.f32 1.0, %v5590_v9 }
0x2198   :  { %v4061_v56 = vmul.f32 %v4060_v41, %v8944_v3  ;;  %v4064_v28 = vmul.f32 %v4060_v41, %v8913_v2 }
0x21de   :  { %v3968_v16 = vpop.f32.mrb[34].mxu1 }
0x21df   :  { %v3972_v37 = vadd.f32 %v3968_v16, %v252_v17  ;;  %v6852_v24 = vpop.f32.mrb[35].mxu1 }
0x21e0   :  { %v4214_v24 = vstv %s5657_s25 }
0x21e1   :  { %7883 = vtanh.f32 %v3972_v37 }
0x21eb   :  { %v7884_v13 = vpop.eup %7883 }
0x21ec   :  { %6870 = vmatmul.mubr.msk.f32.vlgmr.msra.gmra.mrb[36].mxu1 %vm868_vm4, %v7884_v13 }
0x21ed   :  { %7619 = vmatpush3.bf16.msra.mxu1 %v8165_v34  ;;  %6902 = vmatprep.mubr.msk.f32.mxu1 %vm7979_vm0, %v7980_v6 }
0x21ee   :  { %7620 = vmatprep.subr.bf16.mxu1 %v9333_v40 }
0x21f1   :  { %7622 = vmatpush3.bf16.msra.mxu1 %v8175_v38 }
0x21f2   :  { %7623 = vmatprep.subr.bf16.mxu1 %v9333_v40 }
0x22bf   :  { %v4043_v27 = vpop.f32.mrb[36].mxu1 }
0x22c0   :  { %v4044_v15 = vadd.f32 %v8895_v21, %v4043_v27  ;;  %v6871_v55 = vpop.f32.mrb[37].mxu1 }
0x22c2   :  { %v4047_v39 = vand.u32 2147483647, %v4044_v15  ;;  %v4049_v33 = vmul.f32 %v4048_v26, %v4044_v15  ;;  %v244_v15 = vadd.f32 %v8249_v59, %v8356_v58 }
0x22c4   :  { %v4051_v19 = vadd.f32 %v4050_v1, %v4049_v33  ;;  %4053 = vrot.lane.b32.xlu1 %v4047_v39, %s7981_s27 }
0x22c6   :  { %v4059_v30 = vmul.f32 %v5590_v9, %v4051_v19 }
0x22c8   :  { %v4062_v46 = vadd.f32 %v4061_v56, %v4059_v30 }
0x22ca   :  { %6881 = vmatmul.mubr.msk.f32.vlgmr.msra.gmra.mrb[50].mxu0 %vm292_vm1, %v4062_v46 }
0x22cb   :  { %7613 = vmatpush3.bf16.msra.mxu0 %v8085_v12  ;;  %6891 = vmatprep.mubr.msk.f32.mxu0 %vm7979_vm0, %v7980_v6 }
0x22cc   :  { %7614 = vmatprep.subr.bf16.mxu0 %v9333_v40 }
0x22cf   :  { %7616 = vmatpush3.bf16.msra.mxu0 %v8091_v14 }
0x22d0   :  { %7629 = vmatprep.subr.bf16.mxu0 %v9333_v40 }
0x2336   :  { %v4054_v20 = vpop.permute.xlu1 %4053 }
0x2337   :  { %v4056_v18 = vmul.f32 %v4054_v20, %v4048_v26 }
0x2339   :  { %v4058_v3 = vadd.f32 %v4057_v35, %v4056_v18 }
0x233b   :  { %v4063_v50 = vmul.f32 %v5590_v9, %v4058_v3 }
0x233d   :  { %v9012_v32 = vadd.f32 %v4064_v28, %v4063_v50  ;;  %v246_v28 = vadd.f32 %v8258_v62, %v8261_v63 }
0x233f   :  { %6903 = vmatmul.mubr.msk.f32.vlgmr.msra.gmra.mrb[38].mxu1 %vm292_vm1, %v9012_v32 }
0x2340   :  { %7625 = vmatpush3.bf16.msra.mxu1 %v8192_v42  ;;  %6913 = vmatprep.mubr.msk.f32.mxu1 %vm7979_vm0, %v7980_v6 }
0x2341   :  { %7626 = vmatprep.subr.bf16.mxu1 %v9333_v40 }
0x2344   :  { %7628 = vmatpush3.bf16.msra.mxu1 %v8207_v45 }
0x2345   :  { %7653 = vmatprep.subr.bf16.mxu1 %v9333_v40 }
0x239d   :  { %v4136_v49 = vpop.f32.mrb[50].mxu0 }
0x239e   :  { %v4137_v2 = vadd.f32 %v8801_v25, %v4136_v49  ;;  %v6882_v17 = vpop.f32.mrb[51].mxu0 }
0x23a0   :  { %7885 = vtanh.f32 %v4137_v2 }
0x23aa   :  { %v7886_v16 = vpop.eup %7885 }
0x23ab   :  { %6892 = vmatmul.mubr.msk.f32.vlgmr.msra.gmra.mrb[52].mxu0 %vm292_vm1, %v7886_v16 }
0x23ac   :  { %7631 = vmatpush3.bf16.msra.mxu0 %v8230_v52  ;;  %6948 = vmatprep.mubr.msk.f32.mxu0 %vm7979_vm0, %v7980_v6 }
0x23ad   :  { %7632 = vmatprep.subr.bf16.mxu0 %v9333_v40 }
0x23b0   :  { %7634 = vmatpush3.bf16.msra.mxu0 %v8246_v57 }
0x23b1   :  { %7635 = vmatprep.subr.bf16.mxu0 %v9333_v40 }
0x23b4   :  { %7637 = vmatpush3.bf16.msra.mxu0 %v8264_v0 }
0x23b5   :  { %7638 = vmatprep.subr.bf16.mxu0 %v9333_v40 }
0x23b8   :  { %7640 = vmatpush3.bf16.msra.mxu0 %v8278_v10 }
0x23b9   :  { %7641 = vmatprep.subr.bf16.mxu0 %v9333_v40 }
0x23bc   :  { %7643 = vmatpush3.bf16.msra.mxu0 %v8305_v23 }
0x23bd   :  { %7644 = vmatprep.subr.bf16.mxu0 %v9333_v40 }
0x23c0   :  { %7646 = vmatpush3.bf16.msra.mxu0 %v8330_v43 }
0x23c1   :  { %7647 = vmatprep.subr.bf16.mxu0 %v9333_v40 }
0x23c4   :  { %7649 = vmatpush3.bf16.msra.mxu0 %v8340_v47 }
0x23c5   :  { %7650 = vmatprep.subr.bf16.mxu0 %v9333_v40 }
0x23c8   :  { %7652 = vmatpush3.bf16.msra.mxu0 %v8349_v53 }
0x23c9   :  { %7677 = vmatprep.subr.bf16.mxu0 %v9333_v40 }
0x247e   :  { %v4210_v37 = vpop.f32.mrb[52].mxu0 }
0x247f   :  { %v4211_v13 = vadd.f32 %v8826_v44, %v4210_v37  ;;  %v6893_v60 = vpop.f32.mrb[53].mxu0 }
0x2481   :  { %v4215_v9 = vmul.f32 %v4214_v24, %v4211_v13 }
0x2483   :  { %v9043_v27 = vadd.f32 %v4215_v9, %v4062_v46 }
0x2485   :  { %6914 = vmatmul.mubr.msk.f32.vlgmr.msra.gmra.mrb[38].mxu1 %vm292_vm1, %v9043_v27 }
0x2486   :  { %7655 = vmatpush3.bf16.msra.mxu1 %v8370_v29  ;;  %6959 = vmatprep.mubr.msk.f32.mxu1 %vm7979_vm0, %v7980_v6 }
0x2487   :  { %7656 = vmatprep.subr.bf16.mxu1 %v9333_v40 }
0x248a   :  { %7658 = vmatpush3.bf16.msra.mxu1 %v8376_v31 }
0x248b   :  { %7659 = vmatprep.subr.bf16.mxu1 %v9333_v40 }
0x2558   :  { %v4359_v26 = vpop.f32.mrb[38].mxu1 }
0x2559   :  { %v4363_v55 = vadd.f32 %v4359_v26, %v244_v15  ;;  %v6915_v41 = vpop.f32.mrb[39].mxu1 }
0x255b   :  { %7887 = vtanh.f32 %v4363_v55 }
0x2565   :  { %v7888_v39 = vpop.eup %7887 }
0x2566   :  { %6949 = vmatmul.mubr.f32.vlgmr.msra.gmra.mrb[54].mxu0 %v7888_v39 }
0x2567   :  { %7679 = vmatpush3.bf16.msra.mxu0 %v8053_v4  ;;  %7000 = vmatprep.mubr.msk.f32.mxu0 %vm7979_vm0, %v7980_v6  ;;  %v7913_v4 = vld [vmem:[%s9321_s1 + $0x8] sm:$0xff] }
0x2568   :  { %7680 = vmatprep.subr.bf16.mxu0 %v9333_v40 }
0x256b   :  { %7682 = vmatpush3.bf16.msra.mxu0 %v8062_v7 }
0x256c   :  { %7683 = vmatprep.subr.bf16.mxu0 %v9333_v40 }
0x2639   :  { %v4431_v33 = vpop.f32.mrb[54].mxu0 }
0x263a   :  { %v4432_v59 = vadd.f32 %v8850_v11, %v4431_v33  ;;  %v6950_v1 = vpop.f32.mrb[55].mxu0 }
0x263c   :  { %v5662_v19 = vmul.f32 -1.442695, %v4432_v59 }
0x263e   :  { %7889 = vpow2.f32 %v5662_v19 }
0x2648   :  { %v7890_v56 = vpop.eup %7889 }
0x2649   :  { %v4438_v30 = vadd.f32 1.0, %v7890_v56 }
0x264b   :  { %7891 = vrcp.f32 %v4438_v30 }
0x2655   :  { %v7892_v46 = vpop.eup %7891 }
0x2656   :  { %4442 = vrot.lane.b32.xlu1 %v7892_v46, %s7981_s27  ;;  %v4669_v13 = vsub.f32 1.0, %v7892_v46  ;;  %v4671_v26 = vmul.f32 %v7892_v46, %v9043_v27  ;;  %v4678_v1 = vmul.f32 %v7892_v46, %v9012_v32 }
0x265a   :  { %67 = vrot.lane.b32.xlu1 %v7913_v4, %s7982_s28 }
0x26c8   :  { %v4443_v7 = vpop.permute.xlu1 %4442 }
0x26c9   :  { %v4446_v20 = vmul.f32 %v4443_v7, %v9012_v32  ;;  %v4445_v3 = vmul.f32 %v4443_v7, %v9043_v27 }
0x26cb   :  { %6960 = vmatmul.mubr.msk.f32.vlgmr.msra.gmra.mrb[40].mxu1 %vm292_vm1, %v4446_v20 }
0x26cc   :  { %7661 = vmatpush3.bf16.msra.mxu1 %v8399_v61  ;;  %v68_v18 = vpop.permute.xlu1 %67  ;;  %6970 = vmatprep.mubr.msk.f32.mxu1 %vm7979_vm0, %v7980_v6 }
0x26cd   :  { %7662 = vmatprep.subr.bf16.mxu1 %v9333_v40  ;;  %v93_v35 = vsel %vm89_vm3, %v68_v18, 0.0 }
0x26ce   :  { %94 = vadd.xlane.f32.xlu1 %v93_v35 }
0x26d0   :  { %7664 = vmatpush3.bf16.msra.mxu1 %v8410_v22 }
0x26d1   :  { %7665 = vmatprep.subr.bf16.mxu1 %v9333_v40 }
0x26d3   :  { %6971 = vmatmul.mubr.msk.f32.vlgmr.msra.gmra.mrb[40].mxu1 %vm292_vm1, %v4445_v3 }
0x26d4   :  { %7667 = vmatpush3.bf16.msra.mxu1 %v8432_v36  ;;  %6989 = vmatprep.mubr.msk.f32.mxu1 %vm7979_vm0, %v7980_v6 }
0x26d5   :  { %7668 = vmatprep.subr.bf16.mxu1 %v9333_v40 }
0x26d8   :  { %7670 = vmatpush3.bf16.msra.mxu1 %v8442_v8 }
0x26d9   :  { %7671 = vmatprep.subr.bf16.mxu1 %v9333_v40 }
0x26dc   :  { %7673 = vmatpush3.bf16.msra.mxu1 %v8452_v54 }
0x26dd   :  { %7674 = vmatprep.subr.bf16.mxu1 %v9333_v40 }
0x26e0   :  { %7676 = vmatpush3.bf16.msra.mxu1 %v8461_v5 }
0x26e1   :  { %7689 = vmatprep.subr.bf16.mxu1 %v9333_v40 }
0x275b   :  { %v95_v16 = vpop.xlane.xlu1 %94 }
0x275c   :  { %vm115_vm11 = vcmp.gt.f32.partialorder %v95_v16, 0.0 }
0x275d   :  { %v5589_v62 = vsel %vm115_vm11, 1.0, %v7980_v6 }
0x275e   :  { %v4681_v9 = vsub.f32 1.0, %v5589_v62 }
0x2760   :  { %v4685_v19 = vmul.f32 %v4681_v9, %v9012_v32 }
0x27a6   :  { %v4589_v50 = vpop.f32.mrb[40].mxu1 }
0x27a7   :  { %v4593_v49 = vadd.f32 %v4589_v50, %v246_v28  ;;  %v6972_v2 = vpop.f32.mrb[41].mxu1 }
0x27a9   :  { %7893 = vtanh.f32 %v4593_v49 }
0x27b3   :  { %v7894_v17 = vpop.eup %7893 }
0x27b4   :  { %6990 = vmatmul.mubr.msk.f32.vlgmr.msra.gmra.mrb[42].mxu1 %vm868_vm4, %v7894_v17 }
0x27b5   :  { %7691 = vmatpush3.bf16.msra.mxu1 %v8165_v34  ;;  %7022 = vmatprep.mubr.msk.f32.mxu1 %vm7979_vm0, %v7980_v6 }
0x27b6   :  { %7692 = vmatprep.subr.bf16.mxu1 %v9333_v40 }
0x27b9   :  { %7694 = vmatpush3.bf16.msra.mxu1 %v8175_v38  ;;  %v4682_v38 = vmul.f32 %v4681_v9, %v9043_v27 }
0x27ba   :  { %7695 = vmatprep.subr.bf16.mxu1 %v9333_v40 }
0x2887   :  { %v4664_v37 = vpop.f32.mrb[42].mxu1 }
0x2888   :  { %v4665_v24 = vadd.f32 %v8895_v21, %v4664_v37  ;;  %v6991_v60 = vpop.f32.mrb[43].mxu1 }
0x288a   :  { %v4668_v34 = vand.u32 2147483647, %v4665_v24  ;;  %v4670_v15 = vmul.f32 %v4669_v13, %v4665_v24 }
0x288c   :  { %v4672_v55 = vadd.f32 %v4671_v26, %v4670_v15  ;;  %4674 = vrot.lane.b32.xlu0 %v4668_v34, %s7981_s27  ;;  %v5465_v34 = vld [vmem:[%s9325_s5 + $0x100] sm:$0xff]  ;;  %v5466_v15 = vld [vmem:[%s9325_s5 + $0x108] sm:$0xff] }
0x288d   :  { %v7762_v26 = vpack.c.bf16 %v5466_v15, %v5465_v34 }
0x288e   :  { %v4680_v41 = vmul.f32 %v5589_v62, %v4672_v55  ;;  %v5468_v55 = vld [vmem:[%s9325_s5 + $0x118] sm:$0xff] }
0x2890   :  { %v4683_v39 = vadd.f32 %v4682_v38, %v4680_v41 }
0x2892   :  { %7001 = vmatmul.mubr.msk.f32.vlgmr.msra.gmra.mrb[56].mxu0 %vm292_vm1, %v4683_v39 }
0x2893   :  { %7685 = vmatpush3.bf16.msra.mxu0 %v8085_v12  ;;  %7011 = vmatprep.mubr.msk.f32.mxu0 %vm7979_vm0, %v7980_v6 }
0x2894   :  { %7686 = vmatprep.subr.bf16.mxu0 %v9333_v40 }
0x2897   :  { %7688 = vmatpush3.bf16.msra.mxu0 %v8091_v14 }
0x2898   :  { %7701 = vmatprep.subr.bf16.mxu0 %v9333_v40 }
0x28fe   :  { %v4675_v33 = vpop.permute.xlu0 %4674 }
0x28ff   :  { %v4677_v59 = vmul.f32 %v4675_v33, %v4669_v13 }
0x2901   :  { %v4679_v27 = vadd.f32 %v4678_v1, %v4677_v59 }
0x2903   :  { %v4684_v56 = vmul.f32 %v5589_v62, %v4679_v27 }
0x2905   :  { %v9111_v30 = vadd.f32 %v4685_v19, %v4684_v56  ;;  %v5308_v56 = vld [vmem:[%s9324_s4 + $0x40] sm:$0xff] }
0x2907   :  { %7023 = vmatmul.mubr.msk.f32.vlgmr.msra.gmra.mrb[44].mxu1 %vm292_vm1, %v9111_v30 }
0x2908   :  { %7697 = vmatpush3.bf16.msra.mxu1 %v8192_v42  ;;  %7033 = vmatprep.mubr.msk.f32.mxu1 %vm7979_vm0, %v7980_v6 }
0x2909   :  { %7698 = vmatprep.subr.bf16.mxu1 %v9333_v40 }
0x290c   :  { %7700 = vmatpush3.bf16.msra.mxu1 %v8207_v45  ;;  %v4835_v45 = vstv %s5666_s29 }
0x290d   :  { %7725 = vmatprep.subr.bf16.mxu1 %v9333_v40 }
0x2965   :  { %v4757_v12 = vpop.f32.mrb[56].mxu0 }
0x2966   :  { %v4758_v14 = vadd.f32 %v8801_v25, %v4757_v12  ;;  %v7002_v32 = vpop.f32.mrb[57].mxu0  ;;  %v5309_v12 = vld [vmem:[%s9324_s4 + $0x48] sm:$0xff] }
0x2968   :  { %7895 = vtanh.f32 %v4758_v14 }
0x2972   :  { %v7896_v46 = vpop.eup %7895 }
0x2973   :  { %7012 = vmatmul.mubr.msk.f32.vlgmr.msra.gmra.mrb[58].mxu0 %vm292_vm1, %v7896_v46  ;;  %v7756_v46 = vpack.c.bf16 %v5309_v12, %v5308_v56 }
0x2974   :  { %7703 = vmatpush3.bf16.msra.mxu0 %v8230_v52  ;;  %7068 = vmatprep.mubr.msk.f32.mxu0 %vm7979_vm0, %v7980_v6 }
0x2975   :  { %7704 = vmatprep.subr.bf16.mxu0 %v9333_v40 }
0x2978   :  { %7706 = vmatpush3.bf16.msra.mxu0 %v8246_v57 }
0x2979   :  { %7707 = vmatprep.subr.bf16.mxu0 %v9333_v40 }
0x297c   :  { %7709 = vmatpush3.bf16.msra.mxu0 %v8264_v0 }
0x297d   :  { %7710 = vmatprep.subr.bf16.mxu0 %v9333_v40 }
0x2980   :  { %7712 = vmatpush3.bf16.msra.mxu0 %v8278_v10 }
0x2981   :  { %7713 = vmatprep.subr.bf16.mxu0 %v9333_v40 }
0x2984   :  { %7715 = vmatpush3.bf16.msra.mxu0 %v8305_v23  ;;  %v238_v23 = vadd.f32 %v8220_v48, %v8356_v58  ;;  %v7914_v48 = vld [vmem:[%s9321_s1] sm:$0xff]  ;;  %s7983_s1 = smov [#allocation5]  }
0x2985   :  { %7716 = vmatprep.subr.bf16.mxu0 %v9333_v40 }
0x2988   :  { %7718 = vmatpush3.bf16.msra.mxu0 %v8330_v43 }
0x2989   :  { %7719 = vmatprep.subr.bf16.mxu0 %v9333_v40 }
0x298c   :  { %7721 = vmatpush3.bf16.msra.mxu0 %v8340_v47 }
0x298d   :  { %7722 = vmatprep.subr.bf16.mxu0 %v9333_v40 }
0x2990   :  { %7724 = vmatpush3.bf16.msra.mxu0 %v8349_v53 }
0x2991   :  { %7749 = vmatprep.subr.bf16.mxu0 %v9333_v40 }
0x2a46   :  { %v4831_v42 = vpop.f32.mrb[58].mxu0 }
0x2a47   :  { %v4832_v52 = vadd.f32 %v8826_v44, %v4831_v42  ;;  %v7013_v57 = vpop.f32.mrb[59].mxu0 }
0x2a49   :  { %v4836_v0 = vmul.f32 %v4835_v45, %v4832_v52  ;;  %v5310_v45 = vld [vmem:[%s9324_s4 + $0x50] sm:$0xff]  ;;  %v5311_v52 = vld [vmem:[%s9324_s4 + $0x58] sm:$0xff] }
0x2a4a   :  { %v7759_v57 = vpack.c.bf16 %v5311_v52, %v5310_v45 }
0x2a4b   :  { %v9142_v10 = vadd.f32 %v4836_v0, %v4683_v39 }
0x2a4d   :  { %7034 = vmatmul.mubr.msk.f32.vlgmr.msra.gmra.mrb[44].mxu1 %vm292_vm1, %v9142_v10 }
0x2a4e   :  { %7727 = vmatpush3.bf16.msra.mxu1 %v8370_v29  ;;  %7079 = vmatprep.mubr.msk.f32.mxu1 %vm7979_vm0, %v7980_v6 }
0x2a4f   :  { %7728 = vmatprep.subr.bf16.mxu1 %v9333_v40 }
0x2a52   :  { %7730 = vmatpush3.bf16.msra.mxu1 %v8376_v31 }
0x2a53   :  { %7731 = vmatprep.subr.bf16.mxu1 %v9333_v40 }
0x2b20   :  { %v4980_v43 = vpop.f32.mrb[44].mxu1 }
0x2b21   :  { %v4984_v47 = vadd.f32 %v4980_v43, %v238_v23  ;;  %v7035_v53 = vpop.f32.mrb[45].mxu1  ;;  %v5469_v43 = vld [vmem:[%s9325_s5 + $0x120] sm:$0xff] }
0x2b23   :  { %7897 = vtanh.f32 %v4984_v47  ;;  %v5470_v47 = vld [vmem:[%s9325_s5 + $0x128] sm:$0xff] }
0x2b24   :  { %v7768_v53 = vpack.c.bf16 %v5470_v47, %v5469_v43 }
0x2b2d   :  { %v7898_v25 = vpop.eup %7897 }
0x2b2e   :  { %7069 = vmatmul.mubr.f32.vlgmr.msra.gmra.mrb[60].mxu0 %v7898_v25 }
0x2b2f   :  { %7120 = vmatprep.mubr.msk.f32.mxu0 %vm7979_vm0, %v7980_v6 }
0x2c01   :  { %v5052_v29 = vpop.f32.mrb[60].mxu0 }
0x2c02   :  { %v5053_v44 = vadd.f32 %v8850_v11, %v5052_v29  ;;  %v7070_v4 = vpop.f32.mrb[61].mxu0  ;;  %v5473_v29 = vld [vmem:[%s9325_s5 + $0x140] sm:$0xff] }
0x2c04   :  { %v5671_v7 = vmul.f32 -1.442695, %v5053_v44  ;;  %v5474_v44 = vld [vmem:[%s9325_s5 + $0x148] sm:$0xff] }
0x2c05   :  { %v7774_v4 = vpack.c.bf16 %v5474_v44, %v5473_v29 }
0x2c06   :  { %7899 = vpow2.f32 %v5671_v7  ;;  %v5475_v7 = vld [vmem:[%s9325_s5 + $0x150] sm:$0xff] }
0x2c10   :  { %v7900_v31 = vpop.eup %7899 }
0x2c11   :  { %v5059_v20 = vadd.f32 1.0, %v7900_v31  ;;  %v5476_v31 = vld [vmem:[%s9325_s5 + $0x158] sm:$0xff] }
0x2c13   :  { %7901 = vrcp.f32 %v5059_v20  ;;  %v7777_v20 = vpack.c.bf16 %v5476_v31, %v5475_v7 }
0x2c1d   :  { %v9157_v18 = vpop.eup %7901 }
0x2c1e   :  { %5063 = vrot.lane.b32.xlu0 %v9157_v18, %s7981_s27  ;;  %v5290_v62 = vsub.f32 1.0, %v9157_v18  ;;  %v5292_v60 = vmul.f32 %v9157_v18, %v9142_v10  ;;  %v5299_v27 = vmul.f32 %v9157_v18, %v9111_v30  ;;  %v5477_v18 = vld [vmem:[%s9325_s5 + $0x160] sm:$0xff] }
0x2c22   :  { %65 = vrot.lane.b32.xlu0 %v7914_v48, %s7982_s28  ;;  %v5478_v48 = vld [vmem:[%s9325_s5 + $0x168] sm:$0xff] }
0x2c90   :  { %v5064_v58 = vpop.permute.xlu0 %5063 }
0x2c91   :  { %v5067_v11 = vmul.f32 %v5064_v58, %v9111_v30  ;;  %v5066_v28 = vmul.f32 %v5064_v58, %v9142_v10  ;;  %v7780_v58 = vpack.c.bf16 %v5478_v48, %v5477_v18 }
0x2c93   :  { %7080 = vmatmul.mubr.msk.f32.vlgmr.msra.gmra.mrb[46].mxu1 %vm292_vm1, %v5067_v11  ;;  %v5479_v11 = vld [vmem:[%s9325_s5 + $0x170] sm:$0xff] }
0x2c94   :  { %7733 = vmatpush3.bf16.msra.mxu1 %v8399_v61  ;;  %v66_v35 = vpop.permute.xlu0 %65  ;;  %7090 = vmatprep.mubr.msk.f32.mxu1 %vm7979_vm0, %v7980_v6  ;;  %v240_v61 = vadd.f32 %v8228_v51, %v8261_v63  ;;  %v5314_v51 = vld [vmem:[%s9324_s4 + $0x70] sm:$0xff]  ;;  %v5315_v63 = vld [vmem:[%s9324_s4 + $0x78] sm:$0xff] }
0x2c95   :  { %7734 = vmatprep.subr.bf16.mxu1 %v9333_v40  ;;  %v90_v3 = vsel %vm89_vm3, %v66_v35, 0.0  ;;  %v7753_v2 = vpack.c.bf16 %v5315_v63, %v5314_v51  ;;  %v5480_v35 = vld [vmem:[%s9325_s5 + $0x178] sm:$0xff] }
0x2c96   :  { %91 = vadd.xlane.f32.xlu0 %v90_v3  ;;  %v7783_v3 = vpack.c.bf16 %v5480_v35, %v5479_v11 }
0x2c98   :  { %7736 = vmatpush3.bf16.msra.mxu1 %v8410_v22 }
0x2c99   :  { %7737 = vmatprep.subr.bf16.mxu1 %v9333_v40 }
0x2c9b   :  { %7091 = vmatmul.mubr.msk.f32.vlgmr.msra.gmra.mrb[46].mxu1 %vm292_vm1, %v5066_v28 }
0x2c9c   :  { %7739 = vmatpush3.bf16.msra.mxu1 %v8432_v36  ;;  %7109 = vmatprep.mubr.msk.f32.mxu1 %vm7979_vm0, %v7980_v6 }
0x2c9d   :  { %7740 = vmatprep.subr.bf16.mxu1 %v9333_v40 }
0x2ca0   :  { %7742 = vmatpush3.bf16.msra.mxu1 %v8442_v8  ;;  %v5312_v8 = vld [vmem:[%s9324_s4 + $0x60] sm:$0xff] }
0x2ca1   :  { %7743 = vmatprep.subr.bf16.mxu1 %v9333_v40 }
0x2ca4   :  { %7745 = vmatpush3.bf16.msra.mxu1 %v8452_v54  ;;  %v5313_v54 = vld [vmem:[%s9324_s4 + $0x68] sm:$0xff]  ;;  %s5565_s4 = sshll.u32 %s7983_s1, 4  ;;  %s5566_s4 = int_to_ptr.vmem [resolvable:$true] %s5565_s4 }
0x2ca5   :  { %7746 = vmatprep.subr.bf16.mxu1 %v9333_v40  ;;  %s7927_s28 = scalar_lea.vmem %s5566_s4, 128  ;;  %p7932_p6 = scmp.lt.s32.totalorder %s5566_s4, %s5566_s4 }
0x2ca6   :  { %p7928_p5 = scmp.ne.s32.totalorder %s5566_s4, %s7927_s28  ;;  %p7933_p7 = scmp.lt.s32.totalorder %s7927_s28, %s7927_s28 }
0x2ca8   :  { %7748 = vmatpush3.bf16.msra.mxu1 %v8461_v5  ;;  %v7750_v5 = vpack.c.bf16 %v5313_v54, %v5312_v8  ;;  %p7934_p8 = por %p7933_p7, %p7932_p6 }
0x2ca9   :  { %7761 = vmatprep.subr.bf16.mxu1 %v9333_v40 }
0x2caa   :  { %7751 = vmatpush3.bf16.msra.mxu0 %v7750_v5  ;;  %v5481_v5 = vld [vmem:[%s9328_s8 + $0x6] ss:$0 sm:$0xff]  ;;  %p7935_p9 = pnand %p7934_p8, %p7928_p5 }
0x2cab   :  { %7752 = vmatprep.subr.bf16.mxu0 %v9333_v40 }
0x2cae   :  { %7754 = vmatpush3.bf16.msra.mxu0 %v7753_v2 }
0x2caf   :  { %7755 = vmatprep.subr.bf16.mxu0 %v9333_v40 }
0x2d23   :  { %v92_v41 = vpop.xlane.xlu0 %91 }
0x2d24   :  { %vm114_vm12 = vcmp.gt.f32.partialorder %v92_v41, 0.0 }
0x2d25   :  { %v5588_v39 = vsel %vm114_vm12, 1.0, %v7980_v6 }
0x2d26   :  { %v5302_v59 = vsub.f32 1.0, %v5588_v39 }
0x2d28   :  { %v5306_v14 = vmul.f32 %v5302_v59, %v9111_v30  ;;  %v5303_v30 = vmul.f32 %v5302_v59, %v9142_v10  ;;  %v5472_v10 = vld [vmem:[%s9325_s5 + $0x138] sm:$0xff] }
0x2d6e   :  { %v5210_v22 = vpop.f32.mrb[46].mxu1 }
0x2d6f   :  { %v5214_v36 = vadd.f32 %v5210_v22, %v240_v61  ;;  %v7092_v50 = vpop.f32.mrb[47].mxu1 }
0x2d71   :  { %7903 = vtanh.f32 %v5214_v36  ;;  %v5462_v36 = vld [vmem:[%s9328_s8 + $0x5] ss:$0 sm:$0xff] }
0x2d7b   :  { %v7904_v49 = vpop.eup %7903 }
0x2d7c   :  { %7110 = vmatmul.mubr.msk.f32.vlgmr.msra.gmra.mrb[48].mxu1 %vm868_vm4, %v7904_v49 }
0x2d7d   :  { %7166 = vmatprep.mubr.msk.f32.mxu1 %vm7979_vm0, %v7980_v6  ;;  %7763 = vmatpush3.bf16.msra.mxu1 %v7762_v26 }
0x2d7e   :  { %7764 = vmatprep.subr.bf16.mxu1 %v9333_v40 }
0x2e4f   :  { %v5285_v17 = vpop.f32.mrb[48].mxu1 }
0x2e50   :  { %v5286_v16 = vadd.f32 %v8895_v21, %v5285_v17  ;;  %v7111_v37 = vpop.f32.mrb[49].mxu1  ;;  %v5467_v21 = vld [vmem:[%s9325_s5 + $0x110] sm:$0xff] }
0x2e51   :  { %v7765_v38 = vpack.c.bf16 %v5468_v55, %v5467_v21 }
0x2e52   :  { %v5289_v24 = vand.u32 2147483647, %v5286_v16  ;;  %v5291_v13 = vmul.f32 %v5290_v62, %v5286_v16 }
0x2e53   :  { %7766 = vmatpush3.bf16.msra.mxu1 %v7765_v38 }
0x2e54   :  { %v5293_v9 = vadd.f32 %v5292_v60, %v5291_v13  ;;  %5295 = vrot.lane.b32.xlu1 %v5289_v24, %s7981_s27  ;;  %7767 = vmatprep.subr.bf16.mxu1 %v9333_v40 }
0x2e56   :  { %v5301_v0 = vmul.f32 %v5588_v39, %v5293_v9 }
0x2e57   :  { %7769 = vmatpush3.bf16.msra.mxu1 %v7768_v53 }
0x2e58   :  { %v5304_v23 = vadd.f32 %v5303_v30, %v5301_v0  ;;  %7770 = vmatprep.subr.bf16.mxu1 %v9333_v40 }
0x2ec6   :  { %v5296_v33 = vpop.permute.xlu1 %5295 }
0x2ec7   :  { %v5298_v1 = vmul.f32 %v5296_v33, %v5290_v62 }
0x2ec9   :  { %v5300_v19 = vadd.f32 %v5299_v27, %v5298_v1 }
0x2ecb   :  { %v5305_v32 = vmul.f32 %v5588_v39, %v5300_v19 }
0x2ecd   :  { %v5307_v42 = vadd.f32 %v5306_v14, %v5305_v32 }
0x2ecf   :  { %7121 = vmatmul.mubr.msk.f32.vlgmr.msra.gmra.mrb[62].mxu0 %vm292_vm1, %v5307_v42 }
0x2ed0   :  { %7757 = vmatpush3.bf16.msra.mxu0 %v7756_v46  ;;  %7131 = vmatprep.mubr.msk.f32.mxu0 %vm7979_vm0, %v7980_v6  ;;  %v5471_v6 = vld [vmem:[%s9325_s5 + $0x130] sm:$0xff] }
0x2ed1   :  { %7758 = vmatprep.subr.bf16.mxu0 %v9333_v40  ;;  %v7771_v25 = vpack.c.bf16 %v5472_v10, %v5471_v6 }
0x2ed3   :  { %7772 = vmatpush3.bf16.msra.mxu1 %v7771_v25 }
0x2ed4   :  { %7760 = vmatpush3.bf16.msra.mxu0 %v7759_v57  ;;  %7773 = vmatprep.subr.bf16.mxu1 %v9333_v40 }
0x2ed7   :  { %7132 = vmatmul.mubr.msk.f32.vlgmr.msra.gmra.mrb[64].mxu0 %vm292_vm1, %v5304_v23  ;;  %7775 = vmatpush3.bf16.msra.mxu1 %v7774_v4 }
0x2ed8   :  { %7776 = vmatprep.subr.bf16.mxu1 %v9333_v40 }
0x2edb   :  { %7778 = vmatpush3.bf16.msra.mxu1 %v7777_v20 }
0x2edc   :  { %7779 = vmatprep.subr.bf16.mxu1 %v9333_v40 }
0x2edf   :  { %7781 = vmatpush3.bf16.msra.mxu1 %v7780_v58 }
0x2ee0   :  { %7782 = vmatprep.subr.bf16.mxu1 %v9333_v40 }
0x2ee3   :  { %7784 = vmatpush3.bf16.msra.mxu1 %v7783_v3 }
0x2fa2   :  { %v5385_v28 = vpop.f32.mrb[62].mxu0 }
0x2fa3   :  { %v7122_v61 = vpop.f32.mrb[63].mxu0 }
0x2faa   :  { %v5458_v22 = vpop.f32.mrb[64].mxu0 }
0x2fab   :  { %v5459_v50 = vadd.f32 %v5458_v22, %v5385_v28  ;;  %v7133_v49 = vpop.f32.mrb[65].mxu0 }
0x2fad   :  { %v5463_v8 = vadd.f32 %v5462_v36, %v5459_v50 }
0x2faf   :  { %7905 = vtanh.f32 %v5463_v8 }
0x2fb9   :  { %v7906_v54 = vpop.eup %7905 }
0x2fba   :  { %7167 = vmatmul.mubr.f32.vlgmr.msra.gmra.mrb[50].mxu1 %v7906_v54 }
0x308d   :  { %v5548_v40 = vpop.f32.mrb[50].mxu1 }
0x308e   :  { %v5549_v51 = vadd.f32 %v5548_v40, %v5481_v5  ;;  %v7168_v63 = vpop.f32.mrb[51].mxu1 }
0x3090   :  { %v5553_v2 = vand.u32 2147483647, %v5549_v51  ;;  %5552 = vst.msk [vmem:[#allocation5] sm:$0xff] %vm292_vm1, %v5549_v51 }
0x3091   :  { %7938 = shalt.err (!%p7935_p9)
}
0x3092   :  { %s7939_s8 = scalar_lea.hbm %s9329_s9, 128 }
0x3093   :  { %p7940_p10 = scmp.ne.s32.totalorder %s9329_s9, %s7939_s8  ;;  %p7943_p11 = scmp.lt.u32.totalorder %s7939_s8, %s9329_s9 }
0x3095   :  { %p7945_p12 = pnand %p7943_p11, %p7940_p10 }
0x3097   :  { %7948 = shalt.err (!%p7945_p12)
}
0x3098   :  { %5568 = dma.vmem_to_hbm [thread:$0]  %s5566_s4, 128, %s9329_s9, [#allocation3]   ;;  %5555 = vrot.lane.b32.xlu1 %v5553_v2, %s7981_s27 }
0x3099   :  { %s7984_s6 = smov [#allocation6]  }
0x309a   :  { %s5575_s19 = sshll.u32 %s7984_s6, 4  ;;  %s5576_s19 = int_to_ptr.vmem [resolvable:$true] %s5575_s19 }
0x309b   :  { %s7949_s20 = scalar_lea.vmem %s5576_s19, 128  ;;  %p7954_p0 = scmp.lt.s32.totalorder %s5576_s19, %s5576_s19 }
0x309c   :  { %p7950_p13 = scmp.ne.s32.totalorder %s5576_s19, %s7949_s20  ;;  %p7955_p1 = scmp.lt.s32.totalorder %s7949_s20, %s7949_s20 }
0x309e   :  { %p7956_p2 = por %p7955_p1, %p7954_p0 }
0x30a0   :  { %p7957_p3 = pnand %p7956_p2, %p7950_p13 }
0x310a   :  { %v5556_v17 = vpop.permute.xlu1 %5555 }
0x310b   :  { %5558 = vst.msk [vmem:[#allocation6] sm:$0xff] %vm292_vm1, %v5556_v17 }
0x310c   :  { %7960 = shalt.err (!%p7957_p3)
}
0x310d   :  { %s7961_s22 = scalar_lea.hbm %s9330_s10, 128 }
0x310e   :  { %p7962_p4 = scmp.ne.s32.totalorder %s9330_s10, %s7961_s22  ;;  %p7965_p5 = scmp.lt.u32.totalorder %s7961_s22, %s9330_s10 }
0x3110   :  { %p7967_p6 = pnand %p7965_p5, %p7962_p4 }
0x3112   :  { %7970 = shalt.err (!%p7967_p6)
}
0x3113   :  { %5578 = dma.vmem_to_hbm [thread:$0]  %s5576_s19, 128, %s9330_s10, [#allocation7]  }
0x3114   :  { %7973 = dma.done.wait [#allocation3], 128  }
0x3115   :  { %7974 = vsyncadd [#allocation3], 4294967168 }
0x3116   :  { %7975 = dma.done.wait [#allocation7], 128  }
0x3117   :  { %7976 = vsyncadd [#allocation7], 4294967168 }
0x3118   :  { %5585 = vsyncpa [#allocation3], 1 }
0x3119   :  { %5586 = vsyncpa [#allocation7], 1 }
0x311a   :  { %5587 = vsyncpa [#allocation4], 1 }

</bundles_post_ra>
